<compile_context>
chip_gen: v6e
topology: v6e:2x2x1
jax: 0.10.0
libtpu: 0.0.40
codegen_flags: <defaults>
</compile_context>

<pallas_src>
import functools

import jax
import jax.numpy as jnp
from jax.experimental import pallas as pl
from jax.experimental.pallas import tpu as pltpu


# --------------------------- tiling / compiler utils -------------------------

_VMEM_LIMIT_CACHE = None


def _vmem_limit_bytes():
    """64 MiB scoped VMEM on 128-MiB parts (v5e/v6e), 32 MiB otherwise (v7x-safe)."""
    global _VMEM_LIMIT_CACHE
    if _VMEM_LIMIT_CACHE is None:
        limit = 32 * 1024 * 1024
        try:
            cap = int(getattr(pltpu.get_tpu_info(), "vmem_capacity_bytes", 0))
            if cap >= 96 * 1024 * 1024:
                limit = 64 * 1024 * 1024
        except Exception:
            pass
        _VMEM_LIMIT_CACHE = limit
    return _VMEM_LIMIT_CACHE


def _compiler_params():
    return pltpu.CompilerParams(
        dimension_semantics=("parallel",),
        vmem_limit_bytes=_vmem_limit_bytes(),
    )


def _row_tile(rows, cap):
    """8-aligned row tile; always >= 2 grid steps so both v7x TensorCores are used."""
    if rows <= 8:
        return rows
    half = -(-rows // 2)                     # cdiv(rows, 2)
    tm = min(cap, (half + 7) // 8 * 8)
    return max(8, min(tm, rows))


def _const_spec(shape):
    zeros = (0,) * len(shape)
    return pl.BlockSpec(shape, lambda i, _z=zeros: _z)


def _ln(x, g, b, eps=1e-5):
    mu = jnp.mean(x, axis=-1, keepdims=True)
    var = jnp.mean((x - mu) ** 2, axis=-1, keepdims=True)
    return (x - mu) * jax.lax.rsqrt(var + eps) * g + b


# ----------------------------- Pallas kernels -------------------------------

def _linear_kernel(x_ref, w_ref, b_ref, o_ref):
    x = x_ref[...].astype(jnp.bfloat16)
    o_ref[...] = (jnp.dot(x, w_ref[...], preferred_element_type=jnp.float32)
                  + b_ref[...])


def pallas_linear(x, w, b, *, cap=2048):
    """y = x @ w + b, row-tiled.  x: (R, Din), w: (Din, Dout), b: (Dout,)."""
    R, Din = x.shape
    Dout = w.shape[1]
    tm = _row_tile(R, cap)
    return pl.pallas_call(
        _linear_kernel,
        out_shape=jax.ShapeDtypeStruct((R, Dout), jnp.float32),
        grid=(pl.cdiv(R, tm),),
        in_specs=[pl.BlockSpec((tm, Din), lambda i: (i, 0)),
                  _const_spec((Din, Dout)),
                  _const_spec((1, Dout))],
        out_specs=pl.BlockSpec((tm, Dout), lambda i: (i, 0)),
        compiler_params=_compiler_params(),
    )(x.astype(jnp.float32), w.astype(jnp.bfloat16),
      b.reshape(1, Dout).astype(jnp.float32))


def _ff_kernel(x_ref, g_ref, b_ref, w1_ref, b1_ref, w2_ref, b2_ref, alpha_ref,
               o_ref):
    # fused: prenorm LayerNorm -> W1 -> gelu -> W2 -> re-zero residual (degree-0)
    x = x_ref[...].astype(jnp.float32)
    h = _ln(x, g_ref[...], b_ref[...])
    f = (jnp.dot(h.astype(jnp.bfloat16), w1_ref[...],
                 preferred_element_type=jnp.float32) + b1_ref[...])
    f = jax.nn.gelu(f)
    f = (jnp.dot(f.astype(jnp.bfloat16), w2_ref[...],
                 preferred_element_type=jnp.float32) + b2_ref[...])
    o_ref[...] = x + alpha_ref[0, 0] * f


def pallas_ff(x, p, *, cap=2048):
    R, C0 = x.shape
    Dhid = p['W1'].shape[1]
    tm = _row_tile(R, cap)
    return pl.pallas_call(
        _ff_kernel,
        out_shape=jax.ShapeDtypeStruct((R, C0), jnp.float32),
        grid=(pl.cdiv(R, tm),),
        in_specs=[pl.BlockSpec((tm, C0), lambda i: (i, 0)),
                  _const_spec((1, C0)), _const_spec((1, C0)),
                  _const_spec((C0, Dhid)), _const_spec((1, Dhid)),
                  _const_spec((Dhid, C0)), _const_spec((1, C0)),
                  _const_spec((1, 1))],
        out_specs=pl.BlockSpec((tm, C0), lambda i: (i, 0)),
        compiler_params=_compiler_params(),
    )(x.astype(jnp.float32),
      p['prenorm']['g0'].reshape(1, C0).astype(jnp.float32),
      p['prenorm']['b0'].reshape(1, C0).astype(jnp.float32),
      p['W1'].astype(jnp.bfloat16),
      p['b1'].reshape(1, Dhid).astype(jnp.float32),
      p['W2'].astype(jnp.bfloat16),
      p['b2'].reshape(1, C0).astype(jnp.float32),
      jnp.reshape(p['alpha'], (1, 1)).astype(jnp.float32))


def _attn_kernel(x0_ref, nbr0_ref, edge_ref, dist_ref, v1_ref,
                 g0_ref, b0_ref, ge_ref, be_ref,
                 wq_ref, bq_ref, wkn_ref, wke_ref, wkd_ref, bkv_ref,
                 wo0_ref, bo0_ref, alpha_ref,
                 o0_ref, o1_ref,
                 *, heads, dim_head, dv0, dv1, max_radius):
    f32, bf16 = jnp.float32, jnp.bfloat16
    tm = x0_ref.shape[0]
    k_nbr = dist_ref.shape[1]
    dh_v = dim_head + dv0          # per-head [K_h | V0_h] width (head-major columns)
    d1 = dv1 * 3

    x0 = x0_ref[...]                                               # (tm, C0) f32
    g0, b0 = g0_ref[...], b0_ref[...]

    # ---- degree-0 prenorm + query projection (softmax scale folded into Wq) ----
    h0 = _ln(x0, g0, b0)
    q = (jnp.dot(h0.astype(bf16), wq_ref[...],
                 preferred_element_type=f32) + bq_ref[...])        # (tm, H*Dh)

    # ---- neighbor deg-0 prenorm + edge LayerNorm + fused head-major K|V0 proj ----
    n0 = _ln(nbr0_ref[...].astype(f32), g0, b0)                    # (tm*K, C0)
    e = _ln(edge_ref[...].astype(f32), ge_ref[...], be_ref[...])   # (tm*K, E)
    kv = (jnp.dot(n0.astype(bf16), wkn_ref[...], preferred_element_type=f32)
          + jnp.dot(e.astype(bf16), wke_ref[...], preferred_element_type=f32)
          + bkv_ref[...])                                          # (tm*K, H*(Dh+Dv0))
    dist = dist_ref[...]                                           # (tm, K) f32
    kv = kv.reshape(tm, k_nbr, -1) + dist[..., None] * wkd_ref[...][None]

    v1 = v1_ref[...].astype(f32)                                   # (tm, K, H*Dv1*3)

    # ---- radius mask computed in-kernel (no HBM-materialized bias) ----
    bias = jnp.where(dist <= max_radius, 0.0, -1e9)                # (tm, K)

    out0_parts, out1_parts = [], []
    for h in range(heads):
        chunk = kv[:, :, h * dh_v:(h + 1) * dh_v]                  # contiguous per head
        kh = chunk[..., :dim_head]                                 # (tm, K, Dh)
        v0h = chunk[..., dim_head:]                                # (tm, K, Dv0)
        qh = q[:, h * dim_head:(h + 1) * dim_head]                 # (tm, Dh)

        logits = jnp.sum(qh[:, None, :] * kh, axis=-1) + bias      # (tm, K)
        m = jnp.max(logits, axis=-1, keepdims=True)
        p = jnp.exp(logits - m)
        attn = p * pl.reciprocal(jnp.sum(p, axis=-1, keepdims=True), approx=True)

        out0_parts.append(jnp.sum(attn[:, :, None] * v0h, axis=1))            # (tm, Dv0)
        out1_parts.append(jnp.sum(attn[:, :, None] *
                                  v1[:, :, h * d1:(h + 1) * d1], axis=1))     # (tm, 3*Dv1)

    # ---- single fused deg-0 output projection (all heads, one MXU push) ----
    out0 = jnp.concatenate(out0_parts, axis=-1)                    # (tm, H*Dv0)
    delta0 = (jnp.dot(out0.astype(bf16), wo0_ref[...],
                      preferred_element_type=f32) + bo0_ref[...])
    o0_ref[...] = x0 + alpha_ref[0, 0] * delta0                    # re-zero residual
    # ---- single full-width deg-1 store (no per-head masked stores) ----
    o1_ref[...] = jnp.concatenate(out1_parts, axis=-1).astype(o1_ref.dtype)


def pallas_attention_block(x0, nbr0, edges, dist, v1, p, edge_ln,
                           *, heads, dim_head, dv0, dv1,
                           max_radius=16.0, cap=1024):
    R, C0 = x0.shape
    K = dist.shape[1]
    E = edges.shape[1]
    Dq = heads * dim_head
    Dkv = heads * (dim_head + dv0)
    D1 = heads * dv1 * 3
    tm = _row_tile(R, cap)

    # fuse Wk and Wv0 into one head-major weight: per-head [K_h | V0_h] columns are
    # contiguous; rows split by input group (neighbor deg-0 feats | edges | distance)
    kvdim = p['Wk'].shape[0]
    wk_h = p['Wk'].reshape(kvdim, heads, dim_head)
    wv_h = p['Wv0'].reshape(kvdim, heads, dv0)
    wkv = jnp.concatenate([wk_h, wv_h], axis=-1).reshape(kvdim, Dkv)
    bkv = jnp.concatenate([p['bk'].reshape(heads, dim_head),
                           p['bv0'].reshape(heads, dv0)], axis=-1).reshape(Dkv)
    wk_n, wk_e, wk_d = wkv[:C0], wkv[C0:C0 + E], wkv[C0 + E:]

    scale = 1.0 / (dim_head ** 0.5)    # folded into the query projection

    kernel = functools.partial(_attn_kernel, heads=heads, dim_head=dim_head,
                               dv0=dv0, dv1=dv1, max_radius=max_radius)
    return pl.pallas_call(
        kernel,
        out_shape=(jax.ShapeDtypeStruct((R, C0), jnp.float32),
                   jax.ShapeDtypeStruct((R, D1), jnp.bfloat16)),
        grid=(pl.cdiv(R, tm),),
        in_specs=[
            pl.BlockSpec((tm, C0), lambda i: (i, 0)),              # x0 (residual + q)
            pl.BlockSpec((tm * K, C0), lambda i: (i, 0)),          # gathered deg-0 nbrs
            pl.BlockSpec((tm * K, E), lambda i: (i, 0)),           # gathered edges (raw)
            pl.BlockSpec((tm, K), lambda i: (i, 0)),               # neighbor distances
            pl.BlockSpec((tm, K, D1), lambda i: (i, 0, 0)),        # deg-1 values
            _const_spec((1, C0)), _const_spec((1, C0)),            # prenorm g0, b0
            _const_spec((1, E)), _const_spec((1, E)),              # edge LN g, b
            _const_spec((C0, Dq)), _const_spec((1, Dq)),           # Wq, bq (pre-scaled)
            _const_spec((C0, Dkv)), _const_spec((E, Dkv)),         # Wk|Wv0 (nbr, edge)
            _const_spec((1, Dkv)), _const_spec((1, Dkv)),          # Wk|Wv0 (dist), bias
            _const_spec((heads * dv0, C0)), _const_spec((1, C0)),  # Wo0, bo0
            _const_spec((1, 1)),                                   # re-zero alpha
        ],
        out_specs=(pl.BlockSpec((tm, C0), lambda i: (i, 0)),
                   pl.BlockSpec((tm, D1), lambda i: (i, 0))),
        compiler_params=_compiler_params(),
    )(x0.astype(jnp.float32),
      nbr0.astype(jnp.bfloat16),
      edges.astype(jnp.bfloat16),
      dist.astype(jnp.float32),
      v1.astype(jnp.bfloat16),
      p['prenorm']['g0'].reshape(1, C0).astype(jnp.float32),
      p['prenorm']['b0'].reshape(1, C0).astype(jnp.float32),
      edge_ln['g'].reshape(1, E).astype(jnp.float32),
      edge_ln['b'].reshape(1, E).astype(jnp.float32),
      (p['Wq'] * scale).astype(jnp.bfloat16),
      (p['bq'] * scale).reshape(1, Dq).astype(jnp.float32),
      wk_n.astype(jnp.bfloat16),
      wk_e.astype(jnp.bfloat16),
      wk_d.reshape(1, Dkv).astype(jnp.float32),
      bkv.reshape(1, Dkv).astype(jnp.float32),
      p['Wo0'].astype(jnp.bfloat16),
      p['bo0'].reshape(1, C0).astype(jnp.float32),
      jnp.reshape(p['alpha'], (1, 1)).astype(jnp.float32))


# ------------------------------- glue helpers --------------------------------

def _gather_neighbors(x, idx):
    # x: (B, N, ...), idx: (B, N, K) -> (B, N, K, ...)
    return jax.vmap(lambda xb, ib: xb[ib])(x, idx)


def _mix_deg1(x1, w):
    # SE(3)-equivariant degree-1 channel mix (..., C, 3) -> (..., C', 3).
    # Deliberately left to XLA: far below one MXU pass.
    return jnp.einsum('...ci,cd->...di', x1, w)


def _fiber_norm_deg1(x1, pn):
    # FiberNorm degree-1 part: norm-gated, direction-preserving normalization.
    norms = jnp.sqrt(jnp.sum(x1 ** 2, axis=-1) + 1e-8)             # (B, N, C1)
    ln = _ln(norms, pn['g1'], pn['b1'])
    scale = jax.nn.gelu(ln) / (norms + 1e-8)
    return x1 * scale[..., None]


def _attention_block(x0, x1, edges_flat, rel_pos, dist2, nbr_idx, p, edge_ln,
                     heads, dim_head, dv0, dv1):
    B, N, C0 = x0.shape
    K = nbr_idx.shape[-1]
    R = B * N
    C1 = x1.shape[-2]

    # degree-1: prenorm + value channel-mix BEFORE the gather (the mix commutes with
    # the row gather), then add the rel-pos contribution -- K-fold less einsum work
    # and no per-pair concat. TODO(synk): could be folded into the attention kernel
    # once Mosaic exposes a cheap in-kernel row gather.
    h1 = _fiber_norm_deg1(x1, p['prenorm'])                        # (B,N,C1,3)
    hv1 = _mix_deg1(h1, p['Wv1'][:C1])                             # (B,N,H*Dv1,3)
    nv1 = _gather_neighbors(hv1, nbr_idx)                          # (B,N,K,H*Dv1,3)
    v1 = nv1 + rel_pos[:, :, :, None, :] * p['Wv1'][C1][None, None, None, :, None]
    v1 = v1.reshape(R, K, heads * dv1 * 3)                         # head-contiguous

    # raw gathered degree-0 neighbor feats in bf16 (prenorm LN is fused in-kernel).
    # TODO(synk): an in-kernel gather from a VMEM-resident node table would cut this
    # K-times-duplicated HBM stream, but arbitrary row gathers don't lower in Mosaic.
    nbr0 = _gather_neighbors(x0.astype(jnp.bfloat16), nbr_idx).reshape(R * K, C0)

    o0, out1 = pallas_attention_block(
        x0.reshape(R, C0), nbr0, edges_flat, dist2, v1, p, edge_ln,
        heads=heads, dim_head=dim_head, dv0=dv0, dv1=dv1)

    o1 = _mix_deg1(out1.astype(jnp.float32).reshape(B, N, heads * dv1, 3), p['Wo1'])
    # FiberDropout is identity in eval mode; re-zero residual for degree-1.
    return o0.reshape(B, N, C0), x1 + p['alpha'] * o1


def _ff_block(x0, x1, p):
    B, N, C0 = x0.shape
    x0_new = pallas_ff(x0.reshape(B * N, C0), p).reshape(B, N, C0)
    h1 = _fiber_norm_deg1(x1, p['prenorm'])
    f1 = _mix_deg1(_mix_deg1(h1, p['W1_1']), p['W2_1'])
    return x0_new, x1 + p['alpha'] * f1


def _get_input_and_neighbors(node_feats, pair_feats, coords, top_k):
    # get_input: degree-0 = residue feats; degree-1 = (N, C, O) - CA backbone vectors
    N_at = coords[..., 0, :]
    CA = coords[..., 1, :]
    C_at = coords[..., 2, :]
    O_at = coords[..., 3, :]
    crd = jnp.stack([N_at, C_at, O_at], axis=-2)                   # (B, N, 3, 3)
    feats1 = crd - CA[..., None, :]
    feats0 = node_feats

    d = jnp.linalg.norm(CA[:, :, None, :] - CA[:, None, :, :], axis=-1)
    B, N = d.shape[:2]
    d = d + jnp.eye(N, dtype=d.dtype)[None] * 1e9                  # exclude self
    _, nbr_idx = jax.lax.top_k(-d, top_k)                          # nearest K
    nbr_ca = _gather_neighbors(CA, nbr_idx)                        # (B, N, K, 3)
    rel_pos = nbr_ca - CA[:, :, None, :]
    dist = jnp.linalg.norm(rel_pos, axis=-1)                       # (B, N, K)

    edges = jnp.take_along_axis(pair_feats, nbr_idx[..., None], axis=2)
    return feats0, feats1, edges, rel_pos, dist, nbr_idx


# ------------------------------ full forward ---------------------------------

def se3_transformer_forward(params, node_feats, pair_feats, coords, *, cfg,
                            top_k=8):
    heads, dim_head = cfg['heads'], cfg['dim_head']
    dv0, dv1 = cfg['dv0'], cfg['dv1']

    feats0, feats1, edges, rel_pos, dist, nbr_idx = _get_input_and_neighbors(
        node_feats, pair_feats, coords, top_k)

    B, N, K, E = edges.shape
    R = B * N
    # raw gathered edges (bf16); the (pre-layer) edge LayerNorm is fused into the
    # attention kernel (same global params every layer => identical result)
    edges_flat = edges.reshape(R * K, E).astype(jnp.bfloat16)
    dist2 = dist.reshape(R, K)

    # TODO(synk): the spherical-harmonic / Clebsch-Gordan equivariant basis
    # (get_basis) and the basis-contracted TFN convolution have no clean minimal
    # Pallas equivalent; keys/values use invariant (deg-0, edge, distance) and
    # equivariant (deg-1, rel_pos) channel mixes instead.

    # project_in (abstract in the reference module): per-degree linear projection
    x0 = pallas_linear(feats0.reshape(R, -1), params['Wp0'],
                       params['bp0']).reshape(B, N, -1)
    x1 = _mix_deg1(feats1, params['Wp1'])

    for lp in params['layers']:
        x0, x1 = _attention_block(x0, x1, edges_flat, rel_pos, dist2, nbr_idx,
                                  lp['attn'], params['edge_ln'],
                                  heads, dim_head, dv0, dv1)
        x0, x1 = _ff_block(x0, x1, lp['ff'])

    # project_out (abstract in the reference module): back to input fiber dims
    out0 = pallas_linear(x0.reshape(R, -1), params['Wq_out'],
                         params['bq_out']).reshape(B, N, -1)
    out1 = _mix_deg1(x1, params['W1_out'])
    return {'0': out0[..., None], '1': out1}


# ------------------------------ parameter init -------------------------------

def init_params(key, *, d0_in=16, hidden0=32, hidden1=8, edge_dim=8,
                heads=2, dim_head=16, dv0=16, dv1=4, depth=2, hidden_mult=2):
    keys = iter(jax.random.split(key, 256))

    def dense(din, dout):
        return jax.random.normal(next(keys), (din, dout), jnp.float32) / jnp.sqrt(float(din))

    def bias(d):
        return jnp.zeros((d,), jnp.float32)

    def norm(c0, c1):
        return {'g0': jnp.ones((c0,)), 'b0': jnp.zeros((c0,)),
                'g1': jnp.ones((c1,)), 'b1': jnp.zeros((c1,))}

    kv_dim = hidden0 + edge_dim + 1

    def attn_params():
        return {
            'prenorm': norm(hidden0, hidden1),
            'Wq': dense(hidden0, heads * dim_head), 'bq': bias(heads * dim_head),
            'Wk': dense(kv_dim, heads * dim_head), 'bk': bias(heads * dim_head),
            'Wv0': dense(kv_dim, heads * dv0), 'bv0': bias(heads * dv0),
            'Wv1': dense(hidden1 + 1, heads * dv1),
            'Wo0': dense(heads * dv0, hidden0), 'bo0': bias(hidden0),
            'Wo1': dense(heads * dv1, hidden1),
            'alpha': jnp.float32(0.1),   # re-zero residual scale (learnable; small init)
        }

    def ff_params():
        return {
            'prenorm': norm(hidden0, hidden1),
            'W1': dense(hidden0, hidden0 * hidden_mult), 'b1': bias(hidden0 * hidden_mult),
            'W2': dense(hidden0 * hidden_mult, hidden0), 'b2': bias(hidden0),
            'W1_1': dense(hidden1, hidden1 * hidden_mult),
            'W2_1': dense(hidden1 * hidden_mult, hidden1),
            'alpha': jnp.float32(0.1),
        }

    params = {
        'edge_ln': {'g': jnp.ones((edge_dim,)), 'b': jnp.zeros((edge_dim,))},
        'Wp0': dense(d0_in, hidden0), 'bp0': bias(hidden0),
        'Wp1': dense(3, hidden1),
        'Wq_out': dense(hidden0, d0_in), 'bq_out': bias(d0_in),
        'W1_out': dense(hidden1, 3),
        'layers': [{'attn': attn_params(), 'ff': ff_params()} for _ in range(depth)],
    }
    cfg = {'heads': heads, 'dim_head': dim_head, 'dv0': dv0, 'dv1': dv1}
    return params, cfg


if __name__ == "__main__":
    key = jax.random.PRNGKey(0)
    k1, k2, k3, kp = jax.random.split(key, 4)
    B, N, D0, E, TOPK = 2, 16, 16, 8, 8
    node_feats = jax.random.normal(k1, (B, N, D0), jnp.float32)
    pair_feats = jax.random.normal(k2, (B, N, N, E), jnp.float32)
    # protein-like coordinates: 4 backbone atoms (N, CA, C, O) per residue
    coords = (jax.random.normal(k3, (B, N, 4, 3), jnp.float32) * 3.0
              + jnp.arange(N, dtype=jnp.float32)[None, :, None, None] * 1.5)

    params, cfg = init_params(kp, d0_in=D0, edge_dim=E, depth=2)
    fwd = jax.jit(functools.partial(se3_transformer_forward, cfg=cfg, top_k=TOPK))
    out = fwd(params, node_feats, pair_feats, coords)
    jax.tree_util.tree_map(jax.block_until_ready, out)

    assert out['0'].shape == (B, N, D0, 1), out['0'].shape
    assert out['1'].shape == (B, N, 3, 3), out['1'].shape
    assert bool(jnp.all(jnp.isfinite(out['0']))) and bool(jnp.all(jnp.isfinite(out['1'])))
    print("KERNEL_OK")
</pallas_src>

<mosaic_0001>
module attributes {stable_mosaic.version = 11 : i64} {
  func.func @_linear_kernel(%arg0: i32, %arg1: memref<16x16xf32, #tpu.memory_space<vmem>>, %arg2: memref<16x32xbf16, #tpu.memory_space<vmem>>, %arg3: memref<1x32xf32, #tpu.memory_space<vmem>>, %arg4: memref<16x32xf32, #tpu.memory_space<vmem>>) attributes {dimension_semantics = [#tpu.dimension_semantics<parallel>], iteration_bounds = array<i64: 2>, scalar_prefetch = 0 : i64, scratch_operands = 0 : i64, tpu.core_type = #tpu.core_type<tc>, window_params = [{transform_indices = @transform_0, window_bounds = array<i64: 16, 16>}, {pipeline_mode = #tpu.pipeline_mode<synchronous>, transform_indices = @transform_1, window_bounds = array<i64: 16, 32>}, {pipeline_mode = #tpu.pipeline_mode<synchronous>, transform_indices = @transform_2, window_bounds = array<i64: 1, 32>}, {transform_indices = @transform_3, window_bounds = array<i64: 16, 32>}]} {
    %c0 = arith.constant 0 : index
    %c0_0 = arith.constant 0 : index
    %0 = vector.load %arg1[%c0, %c0_0] : memref<16x16xf32, #tpu.memory_space<vmem>>, vector<16x16xf32>
    %1 = arith.truncf %0 : vector<16x16xf32> to vector<16x16xbf16>
    %c0_1 = arith.constant 0 : index
    %c0_2 = arith.constant 0 : index
    %2 = vector.load %arg2[%c0_1, %c0_2] : memref<16x32xbf16, #tpu.memory_space<vmem>>, vector<16x32xbf16>
    %cst = arith.constant dense<0.000000e+00> : vector<16x32xf32>
    %3 = tpu.matmul %1, %2, %cst {dimension_numbers = #tpu.dot_dimension_numbers<[1], [0], [0], [1], [0, 0, 1, 1], [], []>} : vector<16x16xbf16>, vector<16x32xbf16>, vector<16x32xf32> -> vector<16x32xf32>
    %c0_3 = arith.constant 0 : index
    %c0_4 = arith.constant 0 : index
    %4 = vector.load %arg3[%c0_3, %c0_4] : memref<1x32xf32, #tpu.memory_space<vmem>>, vector<1x32xf32>
    %5 = vector.broadcast %4 : vector<1x32xf32> to vector<16x32xf32>
    %6 = arith.addf %3, %5 : vector<16x32xf32>
    %c0_5 = arith.constant 0 : index
    %c0_6 = arith.constant 0 : index
    %7 = vector.load %arg4[%c0_5, %c0_6] : memref<16x32xf32, #tpu.memory_space<vmem>>, vector<16x32xf32>
    tpu.vector_store %arg4[%c0_5, %c0_6], %6 {strides = array<i32>} : memref<16x32xf32, #tpu.memory_space<vmem>>, vector<16x32xf32>,
    return
  }
  func.func @transform_0(%arg0: i32) -> (i32, i32) {
    %c0_i32 = arith.constant 0 : i32
    %c0_i32_0 = arith.constant 0 : i32
    return %arg0, %c0_i32 : i32, i32
  }
  func.func @transform_1(%arg0: i32) -> (i32, i32) {
    %c0_i32 = arith.constant 0 : i32
    %c0_i32_0 = arith.constant 0 : i32
    %c0_i32_1 = arith.constant 0 : i32
    return %c0_i32, %c0_i32_0 : i32, i32
  }
  func.func @transform_2(%arg0: i32) -> (i32, i32) {
    %c0_i32 = arith.constant 0 : i32
    %c0_i32_0 = arith.constant 0 : i32
    %c0_i32_1 = arith.constant 0 : i32
    return %c0_i32, %c0_i32_0 : i32, i32
  }
  func.func @transform_3(%arg0: i32) -> (i32, i32) {
    %c0_i32 = arith.constant 0 : i32
    %c0_i32_0 = arith.constant 0 : i32
    return %arg0, %c0_i32 : i32, i32
  }
}

module attributes {stable_mosaic.version = 11 : i64} {
  func.func @_attn_kernel(%arg0: i32, %arg1: memref<16x32xf32, #tpu.memory_space<vmem>>, %arg2: memref<128x32xbf16, #tpu.memory_space<vmem>>, %arg3: memref<128x8xbf16, #tpu.memory_space<vmem>>, %arg4: memref<16x8xf32, #tpu.memory_space<vmem>>, %arg5: memref<16x8x24xbf16, #tpu.memory_space<vmem>>, %arg6: memref<1x32xf32, #tpu.memory_space<vmem>>, %arg7: memref<1x32xf32, #tpu.memory_space<vmem>>, %arg8: memref<1x8xf32, #tpu.memory_space<vmem>>, %arg9: memref<1x8xf32, #tpu.memory_space<vmem>>, %arg10: memref<32x32xbf16, #tpu.memory_space<vmem>>, %arg11: memref<1x32xf32, #tpu.memory_space<vmem>>, %arg12: memref<32x64xbf16, #tpu.memory_space<vmem>>, %arg13: memref<8x64xbf16, #tpu.memory_space<vmem>>, %arg14: memref<1x64xf32, #tpu.memory_space<vmem>>, %arg15: memref<1x64xf32, #tpu.memory_space<vmem>>, %arg16: memref<32x32xbf16, #tpu.memory_space<vmem>>, %arg17: memref<1x32xf32, #tpu.memory_space<vmem>>, %arg18: memref<1x1xf32, #tpu.memory_space<vmem>>, %arg19: memref<16x32xf32, #tpu.memory_space<vmem>>, %arg20: memref<16x24xbf16, #tpu.memory_space<vmem>>) attributes {dimension_semantics = [#tpu.dimension_semantics<parallel>], iteration_bounds = array<i64: 2>, scalar_prefetch = 0 : i64, scratch_operands = 0 : i64, tpu.core_type = #tpu.core_type<tc>, window_params = [{transform_indices = @transform_0, window_bounds = array<i64: 16, 32>}, {transform_indices = @transform_1, window_bounds = array<i64: 128, 32>}, {transform_indices = @transform_2, window_bounds = array<i64: 128, 8>}, {transform_indices = @transform_3, window_bounds = array<i64: 16, 8>}, {transform_indices = @transform_4, window_bounds = array<i64: 16, 8, 24>}, {pipeline_mode = #tpu.pipeline_mode<synchronous>, transform_indices = @transform_5, window_bounds = array<i64: 1, 32>}, {pipeline_mode = #tpu.pipeline_mode<synchronous>, transform_indices = @transform_6, window_bounds = array<i64: 1, 32>}, {pipeline_mode = #tpu.pipeline_mode<synchronous>, transform_indices = @transform_7, window_bounds = array<i64: 1, 8>}, {pipeline_mode = #tpu.pipeline_mode<synchronous>, transform_indices = @transform_8, window_bounds = array<i64: 1, 8>}, {pipeline_mode = #tpu.pipeline_mode<synchronous>, transform_indices = @transform_9, window_bounds = array<i64: 32, 32>}, {pipeline_mode = #tpu.pipeline_mode<synchronous>, transform_indices = @transform_10, window_bounds = array<i64: 1, 32>}, {pipeline_mode = #tpu.pipeline_mode<synchronous>, transform_indices = @transform_11, window_bounds = array<i64: 32, 64>}, {pipeline_mode = #tpu.pipeline_mode<synchronous>, transform_indices = @transform_12, window_bounds = array<i64: 8, 64>}, {pipeline_mode = #tpu.pipeline_mode<synchronous>, transform_indices = @transform_13, window_bounds = array<i64: 1, 64>}, {pipeline_mode = #tpu.pipeline_mode<synchronous>, transform_indices = @transform_14, window_bounds = array<i64: 1, 64>}, {pipeline_mode = #tpu.pipeline_mode<synchronous>, transform_indices = @transform_15, window_bounds = array<i64: 32, 32>}, {pipeline_mode = #tpu.pipeline_mode<synchronous>, transform_indices = @transform_16, window_bounds = array<i64: 1, 32>}, {pipeline_mode = #tpu.pipeline_mode<synchronous>, transform_indices = @transform_17, window_bounds = array<i64: 1, 1>}, {transform_indices = @transform_18, window_bounds = array<i64: 16, 32>}, {transform_indices = @transform_19, window_bounds = array<i64: 16, 24>}]} {
    %c0 = arith.constant 0 : index
    %c0_0 = arith.constant 0 : index
    %0 = vector.load %arg1[%c0, %c0_0] : memref<16x32xf32, #tpu.memory_space<vmem>>, vector<16x32xf32>
    %c0_1 = arith.constant 0 : index
    %c0_2 = arith.constant 0 : index
    %1 = vector.load %arg6[%c0_1, %c0_2] : memref<1x32xf32, #tpu.memory_space<vmem>>, vector<1x32xf32>
    %c0_3 = arith.constant 0 : index
    %c0_4 = arith.constant 0 : index
    %2 = vector.load %arg7[%c0_3, %c0_4] : memref<1x32xf32, #tpu.memory_space<vmem>>, vector<1x32xf32>
    %cst = arith.constant dense<0.000000e+00> : vector<16xf32>
    %3 = vector.multi_reduction <add>, %0, %cst [1] : vector<16x32xf32> to vector<16xf32>
    %4 = vector.shape_cast %3 : vector<16xf32> to vector<16x1xf32>
    %cst_5 = arith.constant 3.200000e+01 : f32
    %5 = vector.broadcast %cst_5 : f32 to vector<16x1xf32>
    %6 = arith.divf %4, %5 : vector<16x1xf32>
    %7 = vector.broadcast %6 : vector<16x1xf32> to vector<16x32xf32>
    %8 = arith.subf %0, %7 : vector<16x32xf32>
    %9 = arith.mulf %8, %8 : vector<16x32xf32>
    %cst_6 = arith.constant dense<0.000000e+00> : vector<16xf32>
    %10 = vector.multi_reduction <add>, %9, %cst_6 [1] : vector<16x32xf32> to vector<16xf32>
    %11 = vector.shape_cast %10 : vector<16xf32> to vector<16x1xf32>
    %cst_7 = arith.constant 3.200000e+01 : f32
    %12 = vector.broadcast %cst_7 : f32 to vector<16x1xf32>
    %13 = arith.divf %11, %12 : vector<16x1xf32>
    %14 = vector.broadcast %6 : vector<16x1xf32> to vector<16x32xf32>
    %15 = arith.subf %0, %14 : vector<16x32xf32>
    %cst_8 = arith.constant 9.99999974E-6 : f32
    %16 = vector.broadcast %cst_8 : f32 to vector<16x1xf32>
    %17 = arith.addf %13, %16 : vector<16x1xf32>
    %18 = math.rsqrt %17 : vector<16x1xf32>
    %19 = vector.broadcast %18 : vector<16x1xf32> to vector<16x32xf32>
    %20 = arith.mulf %15, %19 : vector<16x32xf32>
    %21 = vector.broadcast %1 : vector<1x32xf32> to vector<16x32xf32>
    %22 = arith.mulf %20, %21 : vector<16x32xf32>
    %23 = vector.broadcast %2 : vector<1x32xf32> to vector<16x32xf32>
    %24 = arith.addf %22, %23 : vector<16x32xf32>
    %25 = arith.truncf %24 : vector<16x32xf32> to vector<16x32xbf16>
    %c0_9 = arith.constant 0 : index
    %c0_10 = arith.constant 0 : index
    %26 = vector.load %arg10[%c0_9, %c0_10] : memref<32x32xbf16, #tpu.memory_space<vmem>>, vector<32x32xbf16>
    %cst_11 = arith.constant dense<0.000000e+00> : vector<16x32xf32>
    %27 = tpu.matmul %25, %26, %cst_11 {dimension_numbers = #tpu.dot_dimension_numbers<[1], [0], [0], [1], [0, 0, 1, 1], [], []>} : vector<16x32xbf16>, vector<32x32xbf16>, vector<16x32xf32> -> vector<16x32xf32>
    %c0_12 = arith.constant 0 : index
    %c0_13 = arith.constant 0 : index
    %28 = vector.load %arg11[%c0_12, %c0_13] : memref<1x32xf32, #tpu.memory_space<vmem>>, vector<1x32xf32>
    %29 = vector.broadcast %28 : vector<1x32xf32> to vector<16x32xf32>
    %30 = arith.addf %27, %29 : vector<16x32xf32>
    %c0_14 = arith.constant 0 : index
    %c0_15 = arith.constant 0 : index
    %31 = vector.load %arg2[%c0_14, %c0_15] : memref<128x32xbf16, #tpu.memory_space<vmem>>, vector<128x32xbf16>
    %32 = arith.extf %31 : vector<128x32xbf16> to vector<128x32xf32>
    %cst_16 = arith.constant dense<0.000000e+00> : vector<128xf32>
    %33 = vector.multi_reduction <add>, %32, %cst_16 [1] : vector<128x32xf32> to vector<128xf32>
    %34 = vector.shape_cast %33 : vector<128xf32> to vector<128x1xf32>
    %cst_17 = arith.constant 3.200000e+01 : f32
    %35 = vector.broadcast %cst_17 : f32 to vector<128x1xf32>
    %36 = arith.divf %34, %35 : vector<128x1xf32>
    %37 = vector.broadcast %36 : vector<128x1xf32> to vector<128x32xf32>
    %38 = arith.subf %32, %37 : vector<128x32xf32>
    %39 = arith.mulf %38, %38 : vector<128x32xf32>
    %cst_18 = arith.constant dense<0.000000e+00> : vector<128xf32>
    %40 = vector.multi_reduction <add>, %39, %cst_18 [1] : vector<128x32xf32> to vector<128xf32>
    %41 = vector.shape_cast %40 : vector<128xf32> to vector<128x1xf32>
    %cst_19 = arith.constant 3.200000e+01 : f32
    %42 = vector.broadcast %cst_19 : f32 to vector<128x1xf32>
    %43 = arith.divf %41, %42 : vector<128x1xf32>
    %44 = vector.broadcast %36 : vector<128x1xf32> to vector<128x32xf32>
    %45 = arith.subf %32, %44 : vector<128x32xf32>
    %cst_20 = arith.constant 9.99999974E-6 : f32
    %46 = vector.broadcast %cst_20 : f32 to vector<128x1xf32>
    %47 = arith.addf %43, %46 : vector<128x1xf32>
    %48 = math.rsqrt %47 : vector<128x1xf32>
    %49 = vector.broadcast %48 : vector<128x1xf32> to vector<128x32xf32>
    %50 = arith.mulf %45, %49 : vector<128x32xf32>
    %51 = vector.broadcast %1 : vector<1x32xf32> to vector<128x32xf32>
    %52 = arith.mulf %50, %51 : vector<128x32xf32>
    %53 = vector.broadcast %2 : vector<1x32xf32> to vector<128x32xf32>
    %54 = arith.addf %52, %53 : vector<128x32xf32>
    %c0_21 = arith.constant 0 : index
    %c0_22 = arith.constant 0 : index
    %55 = vector.load %arg3[%c0_21, %c0_22] : memref<128x8xbf16, #tpu.memory_space<vmem>>, vector<128x8xbf16>
    %56 = arith.extf %55 : vector<128x8xbf16> to vector<128x8xf32>
    %c0_23 = arith.constant 0 : index
    %c0_24 = arith.constant 0 : index
    %57 = vector.load %arg8[%c0_23, %c0_24] : memref<1x8xf32, #tpu.memory_space<vmem>>, vector<1x8xf32>
    %c0_25 = arith.constant 0 : index
    %c0_26 = arith.constant 0 : index
    %58 = vector.load %arg9[%c0_25, %c0_26] : memref<1x8xf32, #tpu.memory_space<vmem>>, vector<1x8xf32>
    %cst_27 = arith.constant dense<0.000000e+00> : vector<128xf32>
    %59 = vector.multi_reduction <add>, %56, %cst_27 [1] : vector<128x8xf32> to vector<128xf32>
    %60 = vector.shape_cast %59 : vector<128xf32> to vector<128x1xf32>
    %cst_28 = arith.constant 8.000000e+00 : f32
    %61 = vector.broadcast %cst_28 : f32 to vector<128x1xf32>
    %62 = arith.divf %60, %61 : vector<128x1xf32>
    %63 = vector.broadcast %62 : vector<128x1xf32> to vector<128x8xf32>
    %64 = arith.subf %56, %63 : vector<128x8xf32>
    %65 = arith.mulf %64, %64 : vector<128x8xf32>
    %cst_29 = arith.constant dense<0.000000e+00> : vector<128xf32>
    %66 = vector.multi_reduction <add>, %65, %cst_29 [1] : vector<128x8xf32> to vector<128xf32>
    %67 = vector.shape_cast %66 : vector<128xf32> to vector<128x1xf32>
    %cst_30 = arith.constant 8.000000e+00 : f32
    %68 = vector.broadcast %cst_30 : f32 to vector<128x1xf32>
    %69 = arith.divf %67, %68 : vector<128x1xf32>
    %70 = vector.broadcast %62 : vector<128x1xf32> to vector<128x8xf32>
    %71 = arith.subf %56, %70 : vector<128x8xf32>
    %cst_31 = arith.constant 9.99999974E-6 : f32
    %72 = vector.broadcast %cst_31 : f32 to vector<128x1xf32>
    %73 = arith.addf %69, %72 : vector<128x1xf32>
    %74 = math.rsqrt %73 : vector<128x1xf32>
    %75 = vector.broadcast %74 : vector<128x1xf32> to vector<128x8xf32>
    %76 = arith.mulf %71, %75 : vector<128x8xf32>
    %77 = vector.broadcast %57 : vector<1x8xf32> to vector<128x8xf32>
    %78 = arith.mulf %76, %77 : vector<128x8xf32>
    %79 = vector.broadcast %58 : vector<1x8xf32> to vector<128x8xf32>
    %80 = arith.addf %78, %79 : vector<128x8xf32>
    %81 = arith.truncf %54 : vector<128x32xf32> to vector<128x32xbf16>
    %c0_32 = arith.constant 0 : index
    %c0_33 = arith.constant 0 : index
    %82 = vector.load %arg12[%c0_32, %c0_33] : memref<32x64xbf16, #tpu.memory_space<vmem>>, vector<32x64xbf16>
    %cst_34 = arith.constant dense<0.000000e+00> : vector<128x64xf32>
    %83 = tpu.matmul %81, %82, %cst_34 {dimension_numbers = #tpu.dot_dimension_numbers<[1], [0], [0], [1], [0, 0, 1, 1], [], []>} : vector<128x32xbf16>, vector<32x64xbf16>, vector<128x64xf32> -> vector<128x64xf32>
    %84 = arith.truncf %80 : vector<128x8xf32> to vector<128x8xbf16>
    %c0_35 = arith.constant 0 : index
    %c0_36 = arith.constant 0 : index
    %85 = vector.load %arg13[%c0_35, %c0_36] : memref<8x64xbf16, #tpu.memory_space<vmem>>, vector<8x64xbf16>
    %cst_37 = arith.constant dense<0.000000e+00> : vector<128x64xf32>
    %86 = tpu.matmul %84, %85, %cst_37 {dimension_numbers = #tpu.dot_dimension_numbers<[1], [0], [0], [1], [0, 0, 1, 1], [], []>} : vector<128x8xbf16>, vector<8x64xbf16>, vector<128x64xf32> -> vector<128x64xf32>
    %87 = arith.addf %83, %86 : vector<128x64xf32>
    %c0_38 = arith.constant 0 : index
    %c0_39 = arith.constant 0 : index
    %88 = vector.load %arg15[%c0_38, %c0_39] : memref<1x64xf32, #tpu.memory_space<vmem>>, vector<1x64xf32>
    %89 = vector.broadcast %88 : vector<1x64xf32> to vector<128x64xf32>
    %90 = arith.addf %87, %89 : vector<128x64xf32>
    %c0_40 = arith.constant 0 : index
    %c0_41 = arith.constant 0 : index
    %91 = vector.load %arg4[%c0_40, %c0_41] : memref<16x8xf32, #tpu.memory_space<vmem>>, vector<16x8xf32>
    %92 = vector.shape_cast %90 : vector<128x64xf32> to vector<16x8x64xf32>
    %93 = vector.shape_cast %91 : vector<16x8xf32> to vector<16x8x1xf32>
    %c0_42 = arith.constant 0 : index
    %c0_43 = arith.constant 0 : index
    %94 = vector.load %arg14[%c0_42, %c0_43] : memref<1x64xf32, #tpu.memory_space<vmem>>, vector<1x64xf32>
    %95 = vector.shape_cast %94 : vector<1x64xf32> to vector<1x1x64xf32>
    %96 = vector.broadcast %93 : vector<16x8x1xf32> to vector<16x8x64xf32>
    %97 = vector.broadcast %95 : vector<1x1x64xf32> to vector<16x8x64xf32>
    %98 = arith.mulf %96, %97 : vector<16x8x64xf32>
    %99 = arith.addf %92, %98 : vector<16x8x64xf32>
    %c0_44 = arith.constant 0 : index
    %c0_45 = arith.constant 0 : index
    %c0_46 = arith.constant 0 : index
    %100 = vector.load %arg5[%c0_44, %c0_45, %c0_46] : memref<16x8x24xbf16, #tpu.memory_space<vmem>>, vector<16x8x24xbf16>
    %101 = arith.extf %100 : vector<16x8x24xbf16> to vector<16x8x24xf32>
    %cst_47 = arith.constant 1.600000e+01 : f32
    %102 = vector.broadcast %cst_47 : f32 to vector<16x8xf32>
    %103 = arith.cmpf ole, %91, %102 : vector<16x8xf32>
    %cst_48 = arith.constant 0.000000e+00 : f32
    %cst_49 = arith.constant -1.000000e+09 : f32
    %104 = vector.broadcast %cst_48 : f32 to vector<16x8xf32>
    %105 = vector.broadcast %cst_49 : f32 to vector<16x8xf32>
    %106 = arith.select %103, %104, %105 : vector<16x8xi1>, vector<16x8xf32>
    %107 = vector.extract_strided_slice %99 {offsets = [0, 0, 0], sizes = [16, 8, 32], strides = [1, 1, 1]} : vector<16x8x64xf32> to vector<16x8x32xf32>
    %108 = vector.extract_strided_slice %107 {offsets = [0, 0, 0], sizes = [16, 8, 16], strides = [1, 1, 1]} : vector<16x8x32xf32> to vector<16x8x16xf32>
    %109 = vector.extract_strided_slice %107 {offsets = [0, 0, 16], sizes = [16, 8, 16], strides = [1, 1, 1]} : vector<16x8x32xf32> to vector<16x8x16xf32>
    %110 = vector.extract_strided_slice %30 {offsets = [0, 0], sizes = [16, 16], strides = [1, 1]} : vector<16x32xf32> to vector<16x16xf32>
    %111 = vector.shape_cast %110 : vector<16x16xf32> to vector<16x1x16xf32>
    %112 = vector.broadcast %111 : vector<16x1x16xf32> to vector<16x8x16xf32>
    %113 = arith.mulf %112, %108 : vector<16x8x16xf32>
    %cst_50 = arith.constant dense<0.000000e+00> : vector<16x8xf32>
    %114 = vector.multi_reduction <add>, %113, %cst_50 [2] : vector<16x8x16xf32> to vector<16x8xf32>
    %115 = arith.addf %114, %106 : vector<16x8xf32>
    %cst_51 = arith.constant dense<0xFF800000> : vector<16xf32>
    %116 = vector.multi_reduction <maximumf>, %115, %cst_51 [1] : vector<16x8xf32> to vector<16xf32>
    %117 = vector.shape_cast %116 : vector<16xf32> to vector<16x1xf32>
    %118 = vector.broadcast %117 : vector<16x1xf32> to vector<16x8xf32>
    %119 = arith.subf %115, %118 : vector<16x8xf32>
    %120 = math.exp %119 : vector<16x8xf32>
    %cst_52 = arith.constant dense<0.000000e+00> : vector<16xf32>
    %121 = vector.multi_reduction <add>, %120, %cst_52 [1] : vector<16x8xf32> to vector<16xf32>
    %122 = vector.shape_cast %121 : vector<16xf32> to vector<16x1xf32>
    %123 = tpu.reciprocal %122 {approx = true} : vector<16x1xf32> -> vector<16x1xf32>
    %124 = vector.broadcast %123 : vector<16x1xf32> to vector<16x8xf32>
    %125 = arith.mulf %120, %124 : vector<16x8xf32>
    %126 = vector.shape_cast %125 : vector<16x8xf32> to vector<16x8x1xf32>
    %127 = vector.broadcast %126 : vector<16x8x1xf32> to vector<16x8x16xf32>
    %128 = arith.mulf %127, %109 : vector<16x8x16xf32>
    %cst_53 = arith.constant dense<0.000000e+00> : vector<16x16xf32>
    %129 = vector.multi_reduction <add>, %128, %cst_53 [1] : vector<16x8x16xf32> to vector<16x16xf32>
    %130 = vector.shape_cast %125 : vector<16x8xf32> to vector<16x8x1xf32>
    %131 = vector.extract_strided_slice %101 {offsets = [0, 0, 0], sizes = [16, 8, 12], strides = [1, 1, 1]} : vector<16x8x24xf32> to vector<16x8x12xf32>
    %132 = vector.broadcast %130 : vector<16x8x1xf32> to vector<16x8x12xf32>
    %133 = arith.mulf %132, %131 : vector<16x8x12xf32>
    %cst_54 = arith.constant dense<0.000000e+00> : vector<16x12xf32>
    %134 = vector.multi_reduction <add>, %133, %cst_54 [1] : vector<16x8x12xf32> to vector<16x12xf32>
    %135 = vector.extract_strided_slice %99 {offsets = [0, 0, 32], sizes = [16, 8, 32], strides = [1, 1, 1]} : vector<16x8x64xf32> to vector<16x8x32xf32>
    %136 = vector.extract_strided_slice %135 {offsets = [0, 0, 0], sizes = [16, 8, 16], strides = [1, 1, 1]} : vector<16x8x32xf32> to vector<16x8x16xf32>
    %137 = vector.extract_strided_slice %135 {offsets = [0, 0, 16], sizes = [16, 8, 16], strides = [1, 1, 1]} : vector<16x8x32xf32> to vector<16x8x16xf32>
    %138 = vector.extract_strided_slice %30 {offsets = [0, 16], sizes = [16, 16], strides = [1, 1]} : vector<16x32xf32> to vector<16x16xf32>
    %139 = vector.shape_cast %138 : vector<16x16xf32> to vector<16x1x16xf32>
    %140 = vector.broadcast %139 : vector<16x1x16xf32> to vector<16x8x16xf32>
    %141 = arith.mulf %140, %136 : vector<16x8x16xf32>
    %cst_55 = arith.constant dense<0.000000e+00> : vector<16x8xf32>
    %142 = vector.multi_reduction <add>, %141, %cst_55 [2] : vector<16x8x16xf32> to vector<16x8xf32>
    %143 = arith.addf %142, %106 : vector<16x8xf32>
    %cst_56 = arith.constant dense<0xFF800000> : vector<16xf32>
    %144 = vector.multi_reduction <maximumf>, %143, %cst_56 [1] : vector<16x8xf32> to vector<16xf32>
    %145 = vector.shape_cast %144 : vector<16xf32> to vector<16x1xf32>
    %146 = vector.broadcast %145 : vector<16x1xf32> to vector<16x8xf32>
    %147 = arith.subf %143, %146 : vector<16x8xf32>
    %148 = math.exp %147 : vector<16x8xf32>
    %cst_57 = arith.constant dense<0.000000e+00> : vector<16xf32>
    %149 = vector.multi_reduction <add>, %148, %cst_57 [1] : vector<16x8xf32> to vector<16xf32>
    %150 = vector.shape_cast %149 : vector<16xf32> to vector<16x1xf32>
    %151 = tpu.reciprocal %150 {approx = true} : vector<16x1xf32> -> vector<16x1xf32>
    %152 = vector.broadcast %151 : vector<16x1xf32> to vector<16x8xf32>
    %153 = arith.mulf %148, %152 : vector<16x8xf32>
    %154 = vector.shape_cast %153 : vector<16x8xf32> to vector<16x8x1xf32>
    %155 = vector.broadcast %154 : vector<16x8x1xf32> to vector<16x8x16xf32>
    %156 = arith.mulf %155, %137 : vector<16x8x16xf32>
    %cst_58 = arith.constant dense<0.000000e+00> : vector<16x16xf32>
    %157 = vector.multi_reduction <add>, %156, %cst_58 [1] : vector<16x8x16xf32> to vector<16x16xf32>
    %158 = vector.shape_cast %153 : vector<16x8xf32> to vector<16x8x1xf32>
    %159 = vector.extract_strided_slice %101 {offsets = [0, 0, 12], sizes = [16, 8, 12], strides = [1, 1, 1]} : vector<16x8x24xf32> to vector<16x8x12xf32>
    %160 = vector.broadcast %158 : vector<16x8x1xf32> to vector<16x8x12xf32>
    %161 = arith.mulf %160, %159 : vector<16x8x12xf32>
    %cst_59 = arith.constant dense<0.000000e+00> : vector<16x12xf32>
    %162 = vector.multi_reduction <add>, %161, %cst_59 [1] : vector<16x8x12xf32> to vector<16x12xf32>
    %163 = tpu.concatenate %129, %157 in 1 : vector<16x16xf32>, vector<16x16xf32> -> vector<16x32xf32>
    %164 = arith.truncf %163 : vector<16x32xf32> to vector<16x32xbf16>
    %c0_60 = arith.constant 0 : index
    %c0_61 = arith.constant 0 : index
    %165 = vector.load %arg16[%c0_60, %c0_61] : memref<32x32xbf16, #tpu.memory_space<vmem>>, vector<32x32xbf16>
    %cst_62 = arith.constant dense<0.000000e+00> : vector<16x32xf32>
    %166 = tpu.matmul %164, %165, %cst_62 {dimension_numbers = #tpu.dot_dimension_numbers<[1], [0], [0], [1], [0, 0, 1, 1], [], []>} : vector<16x32xbf16>, vector<32x32xbf16>, vector<16x32xf32> -> vector<16x32xf32>
    %c0_63 = arith.constant 0 : index
    %c0_64 = arith.constant 0 : index
    %167 = vector.load %arg17[%c0_63, %c0_64] : memref<1x32xf32, #tpu.memory_space<vmem>>, vector<1x32xf32>
    %168 = vector.broadcast %167 : vector<1x32xf32> to vector<16x32xf32>
    %169 = arith.addf %166, %168 : vector<16x32xf32>
    %c0_65 = arith.constant 0 : index
    %c0_66 = arith.constant 0 : index
    %170 = vector.load %arg18[%c0_65, %c0_66] : memref<1x1xf32, #tpu.memory_space<vmem>>, vector<1x1xf32>
    %171 = vector.extract %170[0, 0] : f32 from vector<1x1xf32>
    %172 = vector.broadcast %171 : f32 to vector<16x32xf32>
    %173 = arith.mulf %172, %169 : vector<16x32xf32>
    %174 = arith.addf %0, %173 : vector<16x32xf32>
    %c0_67 = arith.constant 0 : index
    %c0_68 = arith.constant 0 : index
    %175 = vector.load %arg19[%c0_67, %c0_68] : memref<16x32xf32, #tpu.memory_space<vmem>>, vector<16x32xf32>
    tpu.vector_store %arg19[%c0_67, %c0_68], %174 {strides = array<i32>} : memref<16x32xf32, #tpu.memory_space<vmem>>, vector<16x32xf32>,
    %176 = tpu.concatenate %134, %162 in 1 : vector<16x12xf32>, vector<16x12xf32> -> vector<16x24xf32>
    %177 = arith.truncf %176 : vector<16x24xf32> to vector<16x24xbf16>
    %c0_69 = arith.constant 0 : index
    %c0_70 = arith.constant 0 : index
    %178 = vector.load %arg20[%c0_69, %c0_70] : memref<16x24xbf16, #tpu.memory_space<vmem>>, vector<16x24xbf16>
    tpu.vector_store %arg20[%c0_69, %c0_70], %177 {strides = array<i32>} : memref<16x24xbf16, #tpu.memory_space<vmem>>, vector<16x24xbf16>,
    return
  }
  func.func @transform_0(%arg0: i32) -> (i32, i32) {
    %c0_i32 = arith.constant 0 : i32
    %c0_i32_0 = arith.constant 0 : i32
    return %arg0, %c0_i32 : i32, i32
  }
  func.func @transform_1(%arg0: i32) -> (i32, i32) {
    %c0_i32 = arith.constant 0 : i32
    %c0_i32_0 = arith.constant 0 : i32
    return %arg0, %c0_i32 : i32, i32
  }
  func.func @transform_2(%arg0: i32) -> (i32, i32) {
    %c0_i32 = arith.constant 0 : i32
    %c0_i32_0 = arith.constant 0 : i32
    return %arg0, %c0_i32 : i32, i32
  }
  func.func @transform_3(%arg0: i32) -> (i32, i32) {
    %c0_i32 = arith.constant 0 : i32
    %c0_i32_0 = arith.constant 0 : i32
    return %arg0, %c0_i32 : i32, i32
  }
  func.func @transform_4(%arg0: i32) -> (i32, i32, i32) {
    %c0_i32 = arith.constant 0 : i32
    %c0_i32_0 = arith.constant 0 : i32
    %c0_i32_1 = arith.constant 0 : i32
    return %arg0, %c0_i32, %c0_i32_0 : i32, i32, i32
  }
  func.func @transform_5(%arg0: i32) -> (i32, i32) {
    %c0_i32 = arith.constant 0 : i32
    %c0_i32_0 = arith.constant 0 : i32
    %c0_i32_1 = arith.constant 0 : i32
    return %c0_i32, %c0_i32_0 : i32, i32
  }
  func.func @transform_6(%arg0: i32) -> (i32, i32) {
    %c0_i32 = arith.constant 0 : i32
    %c0_i32_0 = arith.constant 0 : i32
    %c0_i32_1 = arith.constant 0 : i32
    return %c0_i32, %c0_i32_0 : i32, i32
  }
  func.func @transform_7(%arg0: i32) -> (i32, i32) {
    %c0_i32 = arith.constant 0 : i32
    %c0_i32_0 = arith.constant 0 : i32
    %c0_i32_1 = arith.constant 0 : i32
    return %c0_i32, %c0_i32_0 : i32, i32
  }
  func.func @transform_8(%arg0: i32) -> (i32, i32) {
    %c0_i32 = arith.constant 0 : i32
    %c0_i32_0 = arith.constant 0 : i32
    %c0_i32_1 = arith.constant 0 : i32
    return %c0_i32, %c0_i32_0 : i32, i32
  }
  func.func @transform_9(%arg0: i32) -> (i32, i32) {
    %c0_i32 = arith.constant 0 : i32
    %c0_i32_0 = arith.constant 0 : i32
    %c0_i32_1 = arith.constant 0 : i32
    return %c0_i32, %c0_i32_0 : i32, i32
  }
  func.func @transform_10(%arg0: i32) -> (i32, i32) {
    %c0_i32 = arith.constant 0 : i32
    %c0_i32_0 = arith.constant 0 : i32
    %c0_i32_1 = arith.constant 0 : i32
    return %c0_i32, %c0_i32_0 : i32, i32
  }
  func.func @transform_11(%arg0: i32) -> (i32, i32) {
    %c0_i32 = arith.constant 0 : i32
    %c0_i32_0 = arith.constant 0 : i32
    %c0_i32_1 = arith.constant 0 : i32
    return %c0_i32, %c0_i32_0 : i32, i32
  }
  func.func @transform_12(%arg0: i32) -> (i32, i32) {
    %c0_i32 = arith.constant 0 : i32
    %c0_i32_0 = arith.constant 0 : i32
    %c0_i32_1 = arith.constant 0 : i32
    return %c0_i32, %c0_i32_0 : i32, i32
  }
  func.func @transform_13(%arg0: i32) -> (i32, i32) {
    %c0_i32 = arith.constant 0 : i32
    %c0_i32_0 = arith.constant 0 : i32
    %c0_i32_1 = arith.constant 0 : i32
    return %c0_i32, %c0_i32_0 : i32, i32
  }
  func.func @transform_14(%arg0: i32) -> (i32, i32) {
    %c0_i32 = arith.constant 0 : i32
    %c0_i32_0 = arith.constant 0 : i32
    %c0_i32_1 = arith.constant 0 : i32
    return %c0_i32, %c0_i32_0 : i32, i32
  }
  func.func @transform_15(%arg0: i32) -> (i32, i32) {
    %c0_i32 = arith.constant 0 : i32
    %c0_i32_0 = arith.constant 0 : i32
    %c0_i32_1 = arith.constant 0 : i32
    return %c0_i32, %c0_i32_0 : i32, i32
  }
  func.func @transform_16(%arg0: i32) -> (i32, i32) {
    %c0_i32 = arith.constant 0 : i32
    %c0_i32_0 = arith.constant 0 : i32
    %c0_i32_1 = arith.constant 0 : i32
    return %c0_i32, %c0_i32_0 : i32, i32
  }
  func.func @transform_17(%arg0: i32) -> (i32, i32) {
    %c0_i32 = arith.constant 0 : i32
    %c0_i32_0 = arith.constant 0 : i32
    %c0_i32_1 = arith.constant 0 : i32
    return %c0_i32, %c0_i32_0 : i32, i32
  }
  func.func @transform_18(%arg0: i32) -> (i32, i32) {
    %c0_i32 = arith.constant 0 : i32
    %c0_i32_0 = arith.constant 0 : i32
    return %arg0, %c0_i32 : i32, i32
  }
  func.func @transform_19(%arg0: i32) -> (i32, i32) {
    %c0_i32 = arith.constant 0 : i32
    %c0_i32_0 = arith.constant 0 : i32
    return %arg0, %c0_i32 : i32, i32
  }
}

module attributes {stable_mosaic.version = 11 : i64} {
  func.func @_ff_kernel(%arg0: i32, %arg1: memref<16x32xf32, #tpu.memory_space<vmem>>, %arg2: memref<1x32xf32, #tpu.memory_space<vmem>>, %arg3: memref<1x32xf32, #tpu.memory_space<vmem>>, %arg4: memref<32x64xbf16, #tpu.memory_space<vmem>>, %arg5: memref<1x64xf32, #tpu.memory_space<vmem>>, %arg6: memref<64x32xbf16, #tpu.memory_space<vmem>>, %arg7: memref<1x32xf32, #tpu.memory_space<vmem>>, %arg8: memref<1x1xf32, #tpu.memory_space<vmem>>, %arg9: memref<16x32xf32, #tpu.memory_space<vmem>>) attributes {dimension_semantics = [#tpu.dimension_semantics<parallel>], iteration_bounds = array<i64: 2>, scalar_prefetch = 0 : i64, scratch_operands = 0 : i64, tpu.core_type = #tpu.core_type<tc>, window_params = [{transform_indices = @transform_0, window_bounds = array<i64: 16, 32>}, {pipeline_mode = #tpu.pipeline_mode<synchronous>, transform_indices = @transform_1, window_bounds = array<i64: 1, 32>}, {pipeline_mode = #tpu.pipeline_mode<synchronous>, transform_indices = @transform_2, window_bounds = array<i64: 1, 32>}, {pipeline_mode = #tpu.pipeline_mode<synchronous>, transform_indices = @transform_3, window_bounds = array<i64: 32, 64>}, {pipeline_mode = #tpu.pipeline_mode<synchronous>, transform_indices = @transform_4, window_bounds = array<i64: 1, 64>}, {pipeline_mode = #tpu.pipeline_mode<synchronous>, transform_indices = @transform_5, window_bounds = array<i64: 64, 32>}, {pipeline_mode = #tpu.pipeline_mode<synchronous>, transform_indices = @transform_6, window_bounds = array<i64: 1, 32>}, {pipeline_mode = #tpu.pipeline_mode<synchronous>, transform_indices = @transform_7, window_bounds = array<i64: 1, 1>}, {transform_indices = @transform_8, window_bounds = array<i64: 16, 32>}]} {
    %c0 = arith.constant 0 : index
    %c0_0 = arith.constant 0 : index
    %0 = vector.load %arg1[%c0, %c0_0] : memref<16x32xf32, #tpu.memory_space<vmem>>, vector<16x32xf32>
    %c0_1 = arith.constant 0 : index
    %c0_2 = arith.constant 0 : index
    %1 = vector.load %arg2[%c0_1, %c0_2] : memref<1x32xf32, #tpu.memory_space<vmem>>, vector<1x32xf32>
    %c0_3 = arith.constant 0 : index
    %c0_4 = arith.constant 0 : index
    %2 = vector.load %arg3[%c0_3, %c0_4] : memref<1x32xf32, #tpu.memory_space<vmem>>, vector<1x32xf32>
    %cst = arith.constant dense<0.000000e+00> : vector<16xf32>
    %3 = vector.multi_reduction <add>, %0, %cst [1] : vector<16x32xf32> to vector<16xf32>
    %4 = vector.shape_cast %3 : vector<16xf32> to vector<16x1xf32>
    %cst_5 = arith.constant 3.200000e+01 : f32
    %5 = vector.broadcast %cst_5 : f32 to vector<16x1xf32>
    %6 = arith.divf %4, %5 : vector<16x1xf32>
    %7 = vector.broadcast %6 : vector<16x1xf32> to vector<16x32xf32>
    %8 = arith.subf %0, %7 : vector<16x32xf32>
    %9 = arith.mulf %8, %8 : vector<16x32xf32>
    %cst_6 = arith.constant dense<0.000000e+00> : vector<16xf32>
    %10 = vector.multi_reduction <add>, %9, %cst_6 [1] : vector<16x32xf32> to vector<16xf32>
    %11 = vector.shape_cast %10 : vector<16xf32> to vector<16x1xf32>
    %cst_7 = arith.constant 3.200000e+01 : f32
    %12 = vector.broadcast %cst_7 : f32 to vector<16x1xf32>
    %13 = arith.divf %11, %12 : vector<16x1xf32>
    %14 = vector.broadcast %6 : vector<16x1xf32> to vector<16x32xf32>
    %15 = arith.subf %0, %14 : vector<16x32xf32>
    %cst_8 = arith.constant 9.99999974E-6 : f32
    %16 = vector.broadcast %cst_8 : f32 to vector<16x1xf32>
    %17 = arith.addf %13, %16 : vector<16x1xf32>
    %18 = math.rsqrt %17 : vector<16x1xf32>
    %19 = vector.broadcast %18 : vector<16x1xf32> to vector<16x32xf32>
    %20 = arith.mulf %15, %19 : vector<16x32xf32>
    %21 = vector.broadcast %1 : vector<1x32xf32> to vector<16x32xf32>
    %22 = arith.mulf %20, %21 : vector<16x32xf32>
    %23 = vector.broadcast %2 : vector<1x32xf32> to vector<16x32xf32>
    %24 = arith.addf %22, %23 : vector<16x32xf32>
    %25 = arith.truncf %24 : vector<16x32xf32> to vector<16x32xbf16>
    %c0_9 = arith.constant 0 : index
    %c0_10 = arith.constant 0 : index
    %26 = vector.load %arg4[%c0_9, %c0_10] : memref<32x64xbf16, #tpu.memory_space<vmem>>, vector<32x64xbf16>
    %cst_11 = arith.constant dense<0.000000e+00> : vector<16x64xf32>
    %27 = tpu.matmul %25, %26, %cst_11 {dimension_numbers = #tpu.dot_dimension_numbers<[1], [0], [0], [1], [0, 0, 1, 1], [], []>} : vector<16x32xbf16>, vector<32x64xbf16>, vector<16x64xf32> -> vector<16x64xf32>
    %c0_12 = arith.constant 0 : index
    %c0_13 = arith.constant 0 : index
    %28 = vector.load %arg5[%c0_12, %c0_13] : memref<1x64xf32, #tpu.memory_space<vmem>>, vector<1x64xf32>
    %29 = vector.broadcast %28 : vector<1x64xf32> to vector<16x64xf32>
    %30 = arith.addf %27, %29 : vector<16x64xf32>
    %31 = arith.mulf %30, %30 : vector<16x64xf32>
    %32 = arith.mulf %30, %31 : vector<16x64xf32>
    %cst_14 = arith.constant 4.471500e-02 : f32
    %33 = vector.broadcast %cst_14 : f32 to vector<16x64xf32>
    %34 = arith.mulf %33, %32 : vector<16x64xf32>
    %35 = arith.addf %30, %34 : vector<16x64xf32>
    %cst_15 = arith.constant 0.797884583 : f32
    %36 = vector.broadcast %cst_15 : f32 to vector<16x64xf32>
    %37 = arith.mulf %36, %35 : vector<16x64xf32>
    %38 = math.tanh %37 : vector<16x64xf32>
    %cst_16 = arith.constant 1.000000e+00 : f32
    %39 = vector.broadcast %cst_16 : f32 to vector<16x64xf32>
    %40 = arith.addf %39, %38 : vector<16x64xf32>
    %cst_17 = arith.constant 5.000000e-01 : f32
    %41 = vector.broadcast %cst_17 : f32 to vector<16x64xf32>
    %42 = arith.mulf %41, %40 : vector<16x64xf32>
    %43 = arith.mulf %30, %42 : vector<16x64xf32>
    %44 = arith.truncf %43 : vector<16x64xf32> to vector<16x64xbf16>
    %c0_18 = arith.constant 0 : index
    %c0_19 = arith.constant 0 : index
    %45 = vector.load %arg6[%c0_18, %c0_19] : memref<64x32xbf16, #tpu.memory_space<vmem>>, vector<64x32xbf16>
    %cst_20 = arith.constant dense<0.000000e+00> : vector<16x32xf32>
    %46 = tpu.matmul %44, %45, %cst_20 {dimension_numbers = #tpu.dot_dimension_numbers<[1], [0], [0], [1], [0, 0, 1, 1], [], []>} : vector<16x64xbf16>, vector<64x32xbf16>, vector<16x32xf32> -> vector<16x32xf32>
    %c0_21 = arith.constant 0 : index
    %c0_22 = arith.constant 0 : index
    %47 = vector.load %arg7[%c0_21, %c0_22] : memref<1x32xf32, #tpu.memory_space<vmem>>, vector<1x32xf32>
    %48 = vector.broadcast %47 : vector<1x32xf32> to vector<16x32xf32>
    %49 = arith.addf %46, %48 : vector<16x32xf32>
    %c0_23 = arith.constant 0 : index
    %c0_24 = arith.constant 0 : index
    %50 = vector.load %arg8[%c0_23, %c0_24] : memref<1x1xf32, #tpu.memory_space<vmem>>, vector<1x1xf32>
    %51 = vector.extract %50[0, 0] : f32 from vector<1x1xf32>
    %52 = vector.broadcast %51 : f32 to vector<16x32xf32>
    %53 = arith.mulf %52, %49 : vector<16x32xf32>
    %54 = arith.addf %0, %53 : vector<16x32xf32>
    %c0_25 = arith.constant 0 : index
    %c0_26 = arith.constant 0 : index
    %55 = vector.load %arg9[%c0_25, %c0_26] : memref<16x32xf32, #tpu.memory_space<vmem>>, vector<16x32xf32>
    tpu.vector_store %arg9[%c0_25, %c0_26], %54 {strides = array<i32>} : memref<16x32xf32, #tpu.memory_space<vmem>>, vector<16x32xf32>,
    return
  }
  func.func @transform_0(%arg0: i32) -> (i32, i32) {
    %c0_i32 = arith.constant 0 : i32
    %c0_i32_0 = arith.constant 0 : i32
    return %arg0, %c0_i32 : i32, i32
  }
  func.func @transform_1(%arg0: i32) -> (i32, i32) {
    %c0_i32 = arith.constant 0 : i32
    %c0_i32_0 = arith.constant 0 : i32
    %c0_i32_1 = arith.constant 0 : i32
    return %c0_i32, %c0_i32_0 : i32, i32
  }
  func.func @transform_2(%arg0: i32) -> (i32, i32) {
    %c0_i32 = arith.constant 0 : i32
    %c0_i32_0 = arith.constant 0 : i32
    %c0_i32_1 = arith.constant 0 : i32
    return %c0_i32, %c0_i32_0 : i32, i32
  }
  func.func @transform_3(%arg0: i32) -> (i32, i32) {
    %c0_i32 = arith.constant 0 : i32
    %c0_i32_0 = arith.constant 0 : i32
    %c0_i32_1 = arith.constant 0 : i32
    return %c0_i32, %c0_i32_0 : i32, i32
  }
  func.func @transform_4(%arg0: i32) -> (i32, i32) {
    %c0_i32 = arith.constant 0 : i32
    %c0_i32_0 = arith.constant 0 : i32
    %c0_i32_1 = arith.constant 0 : i32
    return %c0_i32, %c0_i32_0 : i32, i32
  }
  func.func @transform_5(%arg0: i32) -> (i32, i32) {
    %c0_i32 = arith.constant 0 : i32
    %c0_i32_0 = arith.constant 0 : i32
    %c0_i32_1 = arith.constant 0 : i32
    return %c0_i32, %c0_i32_0 : i32, i32
  }
  func.func @transform_6(%arg0: i32) -> (i32, i32) {
    %c0_i32 = arith.constant 0 : i32
    %c0_i32_0 = arith.constant 0 : i32
    %c0_i32_1 = arith.constant 0 : i32
    return %c0_i32, %c0_i32_0 : i32, i32
  }
  func.func @transform_7(%arg0: i32) -> (i32, i32) {
    %c0_i32 = arith.constant 0 : i32
    %c0_i32_0 = arith.constant 0 : i32
    %c0_i32_1 = arith.constant 0 : i32
    return %c0_i32, %c0_i32_0 : i32, i32
  }
  func.func @transform_8(%arg0: i32) -> (i32, i32) {
    %c0_i32 = arith.constant 0 : i32
    %c0_i32_0 = arith.constant 0 : i32
    return %arg0, %c0_i32 : i32, i32
  }
}

module attributes {stable_mosaic.version = 11 : i64} {
  func.func @_linear_kernel(%arg0: i32, %arg1: memref<16x32xf32, #tpu.memory_space<vmem>>, %arg2: memref<32x16xbf16, #tpu.memory_space<vmem>>, %arg3: memref<1x16xf32, #tpu.memory_space<vmem>>, %arg4: memref<16x16xf32, #tpu.memory_space<vmem>>) attributes {dimension_semantics = [#tpu.dimension_semantics<parallel>], iteration_bounds = array<i64: 2>, scalar_prefetch = 0 : i64, scratch_operands = 0 : i64, tpu.core_type = #tpu.core_type<tc>, window_params = [{transform_indices = @transform_0, window_bounds = array<i64: 16, 32>}, {pipeline_mode = #tpu.pipeline_mode<synchronous>, transform_indices = @transform_1, window_bounds = array<i64: 32, 16>}, {pipeline_mode = #tpu.pipeline_mode<synchronous>, transform_indices = @transform_2, window_bounds = array<i64: 1, 16>}, {transform_indices = @transform_3, window_bounds = array<i64: 16, 16>}]} {
    %c0 = arith.constant 0 : index
    %c0_0 = arith.constant 0 : index
    %0 = vector.load %arg1[%c0, %c0_0] : memref<16x32xf32, #tpu.memory_space<vmem>>, vector<16x32xf32>
    %1 = arith.truncf %0 : vector<16x32xf32> to vector<16x32xbf16>
    %c0_1 = arith.constant 0 : index
    %c0_2 = arith.constant 0 : index
    %2 = vector.load %arg2[%c0_1, %c0_2] : memref<32x16xbf16, #tpu.memory_space<vmem>>, vector<32x16xbf16>
    %cst = arith.constant dense<0.000000e+00> : vector<16x16xf32>
    %3 = tpu.matmul %1, %2, %cst {dimension_numbers = #tpu.dot_dimension_numbers<[1], [0], [0], [1], [0, 0, 1, 1], [], []>} : vector<16x32xbf16>, vector<32x16xbf16>, vector<16x16xf32> -> vector<16x16xf32>
    %c0_3 = arith.constant 0 : index
    %c0_4 = arith.constant 0 : index
    %4 = vector.load %arg3[%c0_3, %c0_4] : memref<1x16xf32, #tpu.memory_space<vmem>>, vector<1x16xf32>
    %5 = vector.broadcast %4 : vector<1x16xf32> to vector<16x16xf32>
    %6 = arith.addf %3, %5 : vector<16x16xf32>
    %c0_5 = arith.constant 0 : index
    %c0_6 = arith.constant 0 : index
    %7 = vector.load %arg4[%c0_5, %c0_6] : memref<16x16xf32, #tpu.memory_space<vmem>>, vector<16x16xf32>
    tpu.vector_store %arg4[%c0_5, %c0_6], %6 {strides = array<i32>} : memref<16x16xf32, #tpu.memory_space<vmem>>, vector<16x16xf32>,
    return
  }
  func.func @transform_0(%arg0: i32) -> (i32, i32) {
    %c0_i32 = arith.constant 0 : i32
    %c0_i32_0 = arith.constant 0 : i32
    return %arg0, %c0_i32 : i32, i32
  }
  func.func @transform_1(%arg0: i32) -> (i32, i32) {
    %c0_i32 = arith.constant 0 : i32
    %c0_i32_0 = arith.constant 0 : i32
    %c0_i32_1 = arith.constant 0 : i32
    return %c0_i32, %c0_i32_0 : i32, i32
  }
  func.func @transform_2(%arg0: i32) -> (i32, i32) {
    %c0_i32 = arith.constant 0 : i32
    %c0_i32_0 = arith.constant 0 : i32
    %c0_i32_1 = arith.constant 0 : i32
    return %c0_i32, %c0_i32_0 : i32, i32
  }
  func.func @transform_3(%arg0: i32) -> (i32, i32) {
    %c0_i32 = arith.constant 0 : i32
    %c0_i32_0 = arith.constant 0 : i32
    return %arg0, %c0_i32 : i32, i32
  }
}

</mosaic_0001>

<bundles_post_ra>
// kernel: se3_transformer_forward.6
= control target key start
LH: loop header
LB: loop body
LE: loop exit
PB: predicated region body
PF: predicated region fallthrough
CT: control target
= control target key end

     0   :  { %s360_s12 = smov 0   ;;  %s383_s0 = inlined_call_operand.vmem [shape: f32[32,16], index: 0, kind: input, shape index: {}]   ;;  %s384_s1 = inlined_call_operand.vmem [shape: bf16[16,32], index: 1, kind: input, shape index: {}]   ;;  %s385_s2 = inlined_call_operand.vmem [shape: f32[1,32], index: 2, kind: input, shape index: {}]   ;;  %s386_s3 = inlined_call_operand.vmem [shape: f32[32,32], index: 3, kind: output, shape index: {}]  }
   0x1 LB: > { %s297_s13 = sadd.s32 4294967295, %s336_s12   ;;  %p301_p0 = scmp.ge.s32.totalorder %s336_s12, 1  ;;  %s336_s12 = sphi %s360_s12, %s13_s12  }
   0x2   : > { %p138_p1 = scmp.lt.s32.totalorder %s336_s12, 3 }
   0x4   : > { %p139_p2 = pnand %p301_p0, %p138_p1 }
   0x5   : > { %s302_s16 = sshll.u32 (!%p139_p2), %s297_s13, 1 }
   0x6   : > { %142 = sbr.rel (%p139_p2) target bundleno = 217 (0xd9), region = 32  ;;  %p163_p3 = scmp.lt.s32.totalorder (!%p139_p2), %s302_s16, 3 }
   0xb   : > { %v329_v0 = vld [vmem:[%s384_s1] sm:$0xff]   ;;  %v338_v1 = vmov 0.0   ;;  %vm339_vm0 = vmmov 0   ;;  %s388_s16 = smov (!%p163_p3, %s302_s16), 3  ;;  %vm193_vm1 = vcmask 130048   ;;  %vm238_vm2 = vcmask 261120  }
   0xc   : > { %313 = vmatprep.subr.bf16.mxu0 %v338_v1  ;;  %315 = vmatprep.mubr.msk.bf16.mxu0 %vm339_vm0, %v338_v1  ;;  %s303_s17 = sshll.u32 %s388_s16, 3  ;;  %v306_v5 = vld [vmem:[%s385_s2] ss:$0 sm:$0xff] }
   0xd   : > { %314 = vmatpush3.bf16.msra.mxu0 %v329_v0  ;;  %s166_s20 = scalar_lea.vmem %s383_s0, %s303_s17  ;;  %s172_s25 = scalar_lea.vmem %s386_s3, %s303_s17 }
   0xe   : > { %v175_v2 = vld [vmem:[%s166_s20] sm:$0xff]  ;;  %v176_v3 = vld [vmem:[%s166_s20 + $0x8] sm:$0xff] }
   0xf   : > { %v177_v4 = vpack.c.bf16 %v176_v3, %v175_v2 }
  0x11   : > { %316 = vmatmul.mubr.msk.bf16.vlgmr.msra.gmra.mxu0 %vm193_vm1, %v177_v4 }
  0xd1   : > { %v231_v6 = vpop.f32.mrf.mxu0 }
  0xd2   : > { %v232_v7 = vadd.f32 %v306_v5, %v231_v6 }
  0xd3   : > { %v317_v8 = vpop.f32.mrf.mxu0 }
  0xd4   : > { %239 = vst.msk [vmem:[%s172_s25] sm:$0xff] %vm238_vm2, %v232_v7 }
  0xd5   : > { %v234_v9 = vpop.f32.mrf.mxu0 }
  0xd6   : > { %v235_v10 = vadd.f32 %v306_v5, %v234_v9 }
  0xd7   : > { %v318_v11 = vpop.f32.mrf.mxu0 }
  0xd8   : > { %240 = vst.msk [vmem:[%s172_s25 + $0x8] sm:$0xff] %vm238_vm2, %v235_v10 }
  0xd9 PF: > { %s13_s12 = sadd.s32 1, %s336_s12  }
  0xda   : > { %p10_p4 = scmp.ge.s32.totalorder %s13_s12, 4  }
  0xdc   :  { %12 = sbr.rel (!%p10_p4) target bundleno = 1 (0x1), region = 62 }

// kernel: se3_transformer_forward.7
= control target key start
LH: loop header
LB: loop body
LE: loop exit
PB: predicated region body
PF: predicated region fallthrough
CT: control target
= control target key end

     0   :  { %s5137_s20 = smov 0   ;;  %s7231_s0 = inlined_call_operand.vmem [shape: f32[32,32], index: 0, kind: input, shape index: {}]   ;;  %s7232_s1 = inlined_call_operand.vmem [shape: bf16[256,32], index: 1, kind: input, shape index: {}]   ;;  %s7233_s2 = inlined_call_operand.vmem [shape: bf16[256,8], index: 2, kind: input, shape index: {}]   ;;  %s7234_s3 = inlined_call_operand.vmem [shape: f32[32,8], index: 3, kind: input, shape index: {}]   ;;  %s7235_s4 = inlined_call_operand.vmem [shape: bf16[32,8,24], index: 4, kind: input, shape index: {}]   ;;  %s7236_s5 = inlined_call_operand.vmem [shape: f32[1,32], index: 5, kind: input, shape index: {}]   ;;  %s7237_s6 = inlined_call_operand.vmem [shape: f32[1,32], index: 6, kind: input, shape index: {}]   ;;  %s7238_s7 = inlined_call_operand.vmem [shape: f32[1,8], index: 7, kind: input, shape index: {}]   ;;  %s7239_s8 = inlined_call_operand.vmem [shape: f32[1,8], index: 8, kind: input, shape index: {}]   ;;  %s7240_s9 = inlined_call_operand.vmem [shape: bf16[32,32], index: 9, kind: input, shape index: {}]   ;;  %s7241_s10 = inlined_call_operand.vmem [shape: f32[1,32], index: 10, kind: input, shape index: {}]   ;;  %s7242_s11 = inlined_call_operand.vmem [shape: bf16[32,64], index: 11, kind: input, shape index: {}]   ;;  %s7243_s12 = inlined_call_operand.vmem [shape: bf16[8,64], index: 12, kind: input, shape index: {}]   ;;  %s7244_s13 = inlined_call_operand.vmem [shape: f32[1,64], index: 13, kind: input, shape index: {}]   ;;  %s7245_s14 = inlined_call_operand.vmem [shape: f32[1,64], index: 14, kind: input, shape index: {}]   ;;  %s7246_s15 = inlined_call_operand.vmem [shape: bf16[32,32], index: 15, kind: input, shape index: {}]   ;;  %s7247_s16 = inlined_call_operand.vmem [shape: f32[1,32], index: 16, kind: input, shape index: {}]   ;;  %s7248_s17 = inlined_call_operand.<no memory space> [shape: f32[1,1], index: 17, kind: input, shape index: {}]   ;;  %s7249_s18 = inlined_call_operand.vmem [shape: f32[32,32], index: 18, kind: output, shape index: {0}]   ;;  %s7250_s19 = inlined_call_operand.vmem [shape: bf16[32,24], index: 19, kind: output, shape index: {1}]  }
   0x1   :  { %7316 = sst [smem:[#allocation25_spill]] %s7231_s0  ;;  %v25_v0 = vstv %s7248_s17 }
   0x2   :  { %7317 = sst [smem:[#allocation26_spill]] %s7232_s1  ;;  %26 = vst [vmem:[#allocation2] sm:$0x1] %v25_v0 }
   0x3   :  { %7318 = sst [smem:[#allocation27_spill]] %s7233_s2 }
   0x4   :  { %7319 = sst [smem:[#allocation28_spill]] %s7234_s3 }
   0x5 LB: > { %s4588_s21 = sadd.s32 4294967295, %s5025_s20   ;;  %p4592_p0 = scmp.ge.s32.totalorder %s5025_s20, 1  ;;  %s5025_s20 = sphi %s5137_s20, %s32_s20  }
   0x6   : > { %p587_p1 = scmp.lt.s32.totalorder %s5025_s20, 3 }
   0x8   : > { %p588_p2 = pnand %p4592_p0, %p587_p1 }
   0xa   : > { %591 = sbr.rel (%p588_p2) target bundleno = 2448 (0x990), region = 92 }
   0xf   : > { %s4593_s1 = sshll.u32 %s4588_s21, 1  ;;  %s4595_s22 = sshll.u32 %s4588_s21, 4  ;;  %vm715_vm0 = vcmask 261120   ;;  %vm1133_vm1 = vcmask 64512   ;;  %vm5028_vm2 = vmmov 0   ;;  %vm1432_vm3 = vcmask 1043456  }
  0x10   : > { %p669_p3 = scmp.lt.s32.totalorder %s4593_s1, 3  ;;  %p675_p4 = scmp.lt.s32.totalorder %s4595_s22, 31  ;;  %vm2074_vm6 = vcmask 130048   ;;  %vm2399_vm7 = vcmask 1041409   ;;  %vm2401_vm8 = vcmask 1042434   ;;  %vm2403_vm9 = vcmask 1043459  }
  0x11   : > { %s7320_s24 = sld [smem:[#allocation25_spill]]  ;;  %vm2407_vm10 = vcmask 1045509   ;;  %vm2405_vm11 = vcmask 1044484   ;;  %vm2409_vm12 = vcmask 1046534   ;;  %vm2411_vm13 = vcmask 1047559  }
  0x12   : > { %s7418_s1 = smov (!%p669_p3, %s4593_s1), 3  ;;  %s7420_s22 = smov (!%p675_p4, %s4595_s22), 31  ;;  %vm2904_vm14 = vcmask 261248   ;;  %vm3033_vm15 = vcmask 97280  }
  0x13   : > { %s5148_s17 = sshll.u32 %s7418_s1, 3  ;;  %s5161_s3 = sshll.u32 %s7420_s22, 2 }
  0x14   : > { %s7321_s28 = sld [smem:[#allocation26_spill]] }
  0x15   : > { %s7322_s21 = sld [smem:[#allocation27_spill]] }
  0x17   : > { %s5154_s25 = scalar_lea.vmem %s7320_s24, %s5148_s17  ;;  %s7324_s24 = sld [smem:[#allocation28_spill]] }
  0x18   : > { %v5157_v1 = vld [vmem:[%s5154_s25] sm:$0xff]  ;;  %v5164_v3 = vld [vmem:[%s5154_s25 + $0x8] sm:$0xff] }
  0x19   : > { %v716_v2 = vsel %vm715_vm0, %v5157_v1, 0.0  ;;  %v719_v5 = vsel %vm715_vm0, %v5164_v3, 0.0 }
  0x1a   : > { %717 = vadd.xlane.f32.xlu0 %v716_v2  ;;  %s5170_s29 = scalar_lea.vmem %s7321_s28, %s5161_s3  ;;  %s5033_s28 = smov 96  }
  0x1b   : > { %s5176_s2 = scalar_lea.vmem %s7322_s21, %s5161_s3  ;;  %v5179_v4 = vld [vmem:[%s5170_s29] sm:$0xff]   ;;  %v5190_v10 = vld [vmem:[%s5170_s29 + $0x8] sm:$0xff]   ;;  %v5215_v21 = vld [vmem:[%s5170_s29 + $0x10] sm:$0xff]   ;;  %s6814_s21 = scalar_lea.vmem %s7235_s4, %s5161_s3 }
  0x1c   : > { %v5184_v6 = vld [vmem:[%s5176_s2] sm:$0xff]   ;;  %v4647_v7 = vunpack.c.l.bf16 %v5179_v4  ;;  %v4648_v8 = vunpack.c.h.bf16 %v5179_v4  ;;  %v4651_v13 = vunpack.c.l.bf16 %v5190_v10  ;;  %v5204_v16 = vld [vmem:[%s5176_s2 + $0x8] sm:$0xff]   ;;  %v4652_v20 = vunpack.c.h.bf16 %v5190_v10  ;;  %v5226_v26 = vld [vmem:[%s5176_s2 + $0x10] sm:$0xff]  }
  0x1d   : > { %v4679_v9 = vunpack.c.l.bf16 %v5184_v6  ;;  %v4680_v15 = vunpack.c.h.bf16 %v5184_v6  ;;  %v4683_v18 = vunpack.c.l.bf16 %v5204_v16  ;;  %v4655_v23 = vunpack.c.l.bf16 %v5215_v21  ;;  %v5237_v31 = vld [vmem:[%s5170_s29 + $0x18] sm:$0xff]   ;;  %v5259_v41 = vld [vmem:[%s5170_s29 + $0x20] sm:$0xff]   ;;  %v5281_v51 = vld [vmem:[%s5170_s29 + $0x28] sm:$0xff]   ;;  %s690_s26 = scalar_lea.vmem %s7324_s24, %s5148_s17  ;;  %s4606_s24 = sshll.u32 %s7418_s1, 2 }
  0x1e   : > { %v859_v11 = vsel %vm715_vm0, %v4647_v7, 0.0  ;;  %720 = vadd.xlane.f32.xlu0 %v719_v5  ;;  %v862_v14 = vsel %vm715_vm0, %v4648_v8, 0.0  ;;  %v865_v17 = vsel %vm715_vm0, %v4651_v13, 0.0  ;;  %v868_v24 = vsel %vm715_vm0, %v4652_v20, 0.0  ;;  %v5248_v36 = vld [vmem:[%s5176_s2 + $0x18] sm:$0xff]   ;;  %v5270_v46 = vld [vmem:[%s5176_s2 + $0x20] sm:$0xff]   ;;  %s708_s27 = scalar_lea.vmem %s7250_s19, %s4606_s24 }
  0x1f   : > { %860 = vadd.xlane.f32.xlu1 %v859_v11  ;;  %v1134_v12 = vsel %vm1133_vm1, %v4679_v9, 0.0  ;;  %v1137_v19 = vsel %vm1133_vm1, %v4680_v15, 0.0  ;;  %v1140_v22 = vsel %vm1133_vm1, %v4683_v18, 0.0  ;;  %v4684_v25 = vunpack.c.h.bf16 %v5204_v16  ;;  %v5292_v56 = vld [vmem:[%s5176_s2 + $0x28] sm:$0xff]   ;;  %v5303_v61 = vld [vmem:[%s5170_s29 + $0x30] sm:$0xff]  }
  0x20   : > { %v871_v27 = vsel %vm715_vm0, %v4655_v23, 0.0  ;;  %v4687_v28 = vunpack.c.l.bf16 %v5226_v26  ;;  %v4656_v30 = vunpack.c.h.bf16 %v5215_v21  ;;  %v4659_v33 = vunpack.c.l.bf16 %v5237_v31  ;;  %v5314_v5 = vld [vmem:[%s5176_s2 + $0x30] sm:$0xff]  }
  0x21   : > { %v1143_v29 = vsel %vm1133_vm1, %v4684_v25, 0.0  ;;  %v4688_v35 = vunpack.c.h.bf16 %v5226_v26  ;;  %v4691_v38 = vunpack.c.l.bf16 %v5248_v36  ;;  %v4660_v40 = vunpack.c.h.bf16 %v5237_v31 }
  0x22   : > { %1135 = vadd.xlane.f32.xlu0 %v1134_v12  ;;  %v1146_v32 = vsel %vm1133_vm1, %v4687_v28, 0.0  ;;  %v874_v34 = vsel %vm715_vm0, %v4656_v30, 0.0  ;;  %v877_v37 = vsel %vm715_vm0, %v4659_v33, 0.0  ;;  %v4663_v43 = vunpack.c.l.bf16 %v5259_v41 }
  0x23   : > { %863 = vadd.xlane.f32.xlu1 %v862_v14  ;;  %v1149_v39 = vsel %vm1133_vm1, %v4688_v35, 0.0  ;;  %v1152_v42 = vsel %vm1133_vm1, %v4691_v38, 0.0  ;;  %v880_v44 = vsel %vm715_vm0, %v4660_v40, 0.0  ;;  %v4692_v45 = vunpack.c.h.bf16 %v5248_v36 }
  0x24   : > { %v883_v47 = vsel %vm715_vm0, %v4663_v43, 0.0  ;;  %v4695_v48 = vunpack.c.l.bf16 %v5270_v46  ;;  %v4664_v50 = vunpack.c.h.bf16 %v5259_v41  ;;  %v4667_v53 = vunpack.c.l.bf16 %v5281_v51 }
  0x25   : > { %v1155_v49 = vsel %vm1133_vm1, %v4692_v45, 0.0  ;;  %v4696_v55 = vunpack.c.h.bf16 %v5270_v46  ;;  %v4699_v58 = vunpack.c.l.bf16 %v5292_v56  ;;  %v4668_v60 = vunpack.c.h.bf16 %v5281_v51 }
  0x26   : > { %866 = vadd.xlane.f32.xlu0 %v865_v17  ;;  %v1158_v52 = vsel %vm1133_vm1, %v4695_v48, 0.0  ;;  %v886_v54 = vsel %vm715_vm0, %v4664_v50, 0.0  ;;  %v889_v57 = vsel %vm715_vm0, %v4667_v53, 0.0  ;;  %v4671_v63 = vunpack.c.l.bf16 %v5303_v61 }
  0x27   : > { %1138 = vadd.xlane.f32.xlu1 %v1137_v19  ;;  %v1161_v59 = vsel %vm1133_vm1, %v4696_v55, 0.0  ;;  %v1164_v62 = vsel %vm1133_vm1, %v4699_v58, 0.0  ;;  %v892_v0 = vsel %vm715_vm0, %v4668_v60, 0.0  ;;  %v4700_v2 = vunpack.c.h.bf16 %v5292_v56  ;;  %v5325_v19 = vld [vmem:[%s5170_s29 + $0x38] sm:$0xff]   ;;  %s5031_s29 = smov 112  }
  0x28   : > { %v895_v11 = vsel %vm715_vm0, %v4671_v63, 0.0  ;;  %v4703_v12 = vunpack.c.l.bf16 %v5314_v5  ;;  %v4672_v17 = vunpack.c.h.bf16 %v5303_v61 }
  0x29   : > { %v1167_v14 = vsel %vm1133_vm1, %v4700_v2, 0.0 }
  0x2a   : > { %1141 = vadd.xlane.f32.xlu0 %v1140_v22  ;;  %v1170_v22 = vsel %vm1133_vm1, %v4703_v12, 0.0 }
  0x2b   : > { %869 = vadd.xlane.f32.xlu1 %v868_v24  ;;  %v4675_v24 = vunpack.c.l.bf16 %v5325_v19 }
  0x2e   : > { %872 = vadd.xlane.f32.xlu0 %v871_v27  ;;  %v898_v27 = vsel %vm715_vm0, %v4672_v17, 0.0 }
  0x2f   : > { %1144 = vadd.xlane.f32.xlu1 %v1143_v29  ;;  %v7255_v29 = vunpack.c.h.bf16 %v5314_v5 }
  0x32   : > { %1147 = vadd.xlane.f32.xlu0 %v1146_v32  ;;  %v5336_v32 = vld [vmem:[%s5176_s2 + $0x38] sm:$0xff]   ;;  %s702_s2 = scalar_lea.vmem %s7249_s18, %s5148_s17 }
  0x33   : > { %875 = vadd.xlane.f32.xlu1 %v874_v34  ;;  %v901_v34 = vsel %vm715_vm0, %v4675_v24, 0.0 }
  0x36   : > { %878 = vadd.xlane.f32.xlu0 %v877_v37  ;;  %v7254_v37 = vunpack.c.l.bf16 %v5336_v32 }
  0x37   : > { %1150 = vadd.xlane.f32.xlu1 %v1149_v39  ;;  %v1173_v39 = vsel %vm1133_vm1, %v7255_v29, 0.0 }
  0x3a   : > { %1153 = vadd.xlane.f32.xlu0 %v1152_v42  ;;  %v7253_v42 = vunpack.c.h.bf16 %v5325_v19 }
  0x3b   : > { %881 = vadd.xlane.f32.xlu1 %v880_v44  ;;  %v1176_v44 = vsel %vm1133_vm1, %v7254_v37, 0.0 }
  0x3e   : > { %884 = vadd.xlane.f32.xlu0 %v883_v47  ;;  %v904_v47 = vsel %vm715_vm0, %v7253_v42, 0.0 }
  0x3f   : > { %1156 = vadd.xlane.f32.xlu1 %v1155_v49  ;;  %v7252_v49 = vunpack.c.h.bf16 %v5336_v32 }
  0x42   : > { %1159 = vadd.xlane.f32.xlu0 %v1158_v52  ;;  %v1179_v52 = vsel %vm1133_vm1, %v7252_v49, 0.0 }
  0x43   : > { %887 = vadd.xlane.f32.xlu1 %v886_v54  ;;  %v7251_v54 = vlaneseq }
  0x46   : > { %890 = vadd.xlane.f32.xlu0 %v889_v57  ;;  %v5357_v57 = vshrl.u32 %v7251_v54, 7 }
  0x47   : > { %1162 = vadd.xlane.f32.xlu1 %v1161_v59 }
  0x48   : > { %7323 = vst [vmem:[#allocation3_spill] sm:$0xff] %v5357_v57  ;;  %v5364_v59 = vsub.s32 0, %v5357_v57 }
  0x4a   : > { %1165 = vadd.xlane.f32.xlu0 %v1164_v62  ;;  %7325 = vst [vmem:[#allocation4_spill] sm:$0xff] %v5364_v59  ;;  %v5367_v62 = vsub.s32 1, %v5357_v57 }
  0x4b   : > { %893 = vadd.xlane.f32.xlu1 %v892_v0  ;;  %v5369_v0 = vld [vmem:[%s690_s26] sm:$0xff] }
  0x4c   : > { %vm1874_vm4 = vcmp.le.f32.partialorder %v5369_v0, 16.0 }
  0x4e   : > { %896 = vadd.xlane.f32.xlu0 %v895_v11  ;;  %v1701_v11 = vrot.slane %v5369_v0, %v5367_v62 }
  0x4f   : > { %1168 = vadd.xlane.f32.xlu1 %v1167_v14  ;;  %v1694_v14 = vrot.slane %v5369_v0, %v5364_v59 }
  0x52   : > { %1171 = vadd.xlane.f32.xlu0 %v1170_v22  ;;  %v5375_v22 = vld [vmem:[%s690_s26 + $0x8] sm:$0xff] }
  0x53   : > { %899 = vadd.xlane.f32.xlu1 %v898_v27  ;;  %v1750_v27 = vrot.slane %v5375_v22, %v5364_v59  ;;  %vm1875_vm5 = vcmp.le.f32.partialorder %v5375_v22, 16.0 }
  0x56   : > { %902 = vadd.xlane.f32.xlu0 %v901_v34 }
  0x57   : > { %1174 = vadd.xlane.f32.xlu1 %v1173_v39 }
  0x5a   : > { %1177 = vadd.xlane.f32.xlu0 %v1176_v44 }
  0x5b   : > { %905 = vadd.xlane.f32.xlu1 %v904_v47 }
  0x5f   : > { %1180 = vadd.xlane.f32.xlu1 %v1179_v52 }
  0x70   : > { %1703 = vbcast.lane.b32.xlu1 %v1701_v11, 256  ;;  %1696 = vbcast.lane.b32.xlu0 %v1694_v14, 256 }
  0x74   : > { %1752 = vbcast.lane.b32.xlu1 %v1750_v27, 256 }
  0xa3   : > { %v718_v34 = vpop.xlane.xlu0 %717 }
  0xa4   : > { %v723_v39 = vmul.f32 0.03125, %v718_v34 }
  0xa6   : > { %v5380_v44 = vsub.f32 %v5157_v1, %v723_v39 }
  0xa7   : > { %v721_v47 = vpop.xlane.xlu0 %720 }
  0xa8   : > { %v861_v52 = vpop.xlane.xlu1 %860  ;;  %v724_v54 = vmul.f32 0.03125, %v721_v47  ;;  %v727_v49 = vmul.f32 %v5380_v44, %v5380_v44 }
  0xa9   : > { %v907_v42 = vmul.f32 0.03125, %v861_v52 }
  0xaa   : > { %v5385_v37 = vsub.f32 %v5164_v3, %v724_v54  ;;  %v729_v11 = vsel %vm715_vm0, %v727_v49, 0.0 }
  0xab   : > { %v5390_v14 = vsub.f32 %v4647_v7, %v907_v42  ;;  %730 = vadd.xlane.f32.xlu0 %v729_v11  ;;  %v1136_v27 = vpop.xlane.xlu0 %1135 }
  0xac   : > { %v864_v1 = vpop.xlane.xlu1 %863  ;;  %v1183_v34 = vmul.f32 0.125, %v1136_v27  ;;  %v728_v39 = vmul.f32 %v5385_v37, %v5385_v37 }
  0xad   : > { %v908_v47 = vmul.f32 0.03125, %v864_v1  ;;  %v939_v52 = vmul.f32 %v5390_v14, %v5390_v14 }
  0xae   : > { %v5398_v3 = vsub.f32 %v4679_v9, %v1183_v34  ;;  %v732_v49 = vsel %vm715_vm0, %v728_v39, 0.0 }
  0xaf   : > { %v5403_v7 = vsub.f32 %v4648_v8, %v908_v47  ;;  %v955_v42 = vsel %vm715_vm0, %v939_v52, 0.0  ;;  %733 = vadd.xlane.f32.xlu1 %v732_v49  ;;  %v867_v54 = vpop.xlane.xlu0 %866 }
  0xb0   : > { %v1139_v11 = vpop.xlane.xlu1 %1138  ;;  %956 = vadd.xlane.f32.xlu0 %v955_v42  ;;  %v909_v27 = vmul.f32 0.03125, %v867_v54  ;;  %v1215_v1 = vmul.f32 %v5398_v3, %v5398_v3 }
  0xb1   : > { %v1184_v29 = vmul.f32 0.125, %v1139_v11  ;;  %v940_v9 = vmul.f32 %v5403_v7, %v5403_v7 }
  0xb2   : > { %v5412_v34 = vsub.f32 %v4651_v13, %v909_v27  ;;  %v1231_v4 = vsel %vm1133_vm1, %v1215_v1, 0.0 }
  0xb3   : > { %v5417_v8 = vsub.f32 %v4680_v15, %v1184_v29  ;;  %v958_v39 = vsel %vm715_vm0, %v940_v9, 0.0  ;;  %v1142_v47 = vpop.xlane.xlu0 %1141 }
  0xb4   : > { %v870_v52 = vpop.xlane.xlu1 %869  ;;  %959 = vadd.xlane.f32.xlu1 %v958_v39  ;;  %1232 = vadd.xlane.f32.xlu0 %v1231_v4  ;;  %v1185_v49 = vmul.f32 0.125, %v1142_v47  ;;  %v941_v42 = vmul.f32 %v5412_v34, %v5412_v34 }
  0xb5   : > { %v910_v54 = vmul.f32 0.03125, %v870_v52  ;;  %v1216_v13 = vmul.f32 %v5417_v8, %v5417_v8 }
  0xb6   : > { %v5426_v11 = vsub.f32 %v4683_v18, %v1185_v49  ;;  %v961_v6 = vsel %vm715_vm0, %v941_v42, 0.0 }
  0xb7   : > { %v5431_v15 = vsub.f32 %v4652_v20, %v910_v54  ;;  %v1234_v29 = vsel %vm1133_vm1, %v1216_v13, 0.0  ;;  %v873_v27 = vpop.xlane.xlu0 %872 }
  0xb8   : > { %v1145_v1 = vpop.xlane.xlu1 %1144  ;;  %1235 = vadd.xlane.f32.xlu1 %v1234_v29  ;;  %962 = vadd.xlane.f32.xlu0 %v961_v6  ;;  %v911_v9 = vmul.f32 0.03125, %v873_v27  ;;  %v1217_v4 = vmul.f32 %v5426_v11, %v5426_v11 }
  0xb9   : > { %v1186_v39 = vmul.f32 0.125, %v1145_v1  ;;  %v942_v18 = vmul.f32 %v5431_v15, %v5431_v15 }
  0xba   : > { %v5440_v47 = vsub.f32 %v4655_v23, %v911_v9  ;;  %v1237_v10 = vsel %vm1133_vm1, %v1217_v4, 0.0 }
  0xbb   : > { %v5445_v20 = vsub.f32 %v4684_v25, %v1186_v39  ;;  %v964_v52 = vsel %vm715_vm0, %v942_v18, 0.0  ;;  %v1148_v49 = vpop.xlane.xlu0 %1147 }
  0xbc   : > { %v876_v42 = vpop.xlane.xlu1 %875  ;;  %965 = vadd.xlane.f32.xlu1 %v964_v52  ;;  %1238 = vadd.xlane.f32.xlu0 %v1237_v10  ;;  %v1187_v54 = vmul.f32 0.125, %v1148_v49  ;;  %v943_v13 = vmul.f32 %v5440_v47, %v5440_v47 }
  0xbd   : > { %v912_v6 = vmul.f32 0.03125, %v876_v42  ;;  %v1218_v23 = vmul.f32 %v5445_v20, %v5445_v20 }
  0xbe   : > { %v5454_v29 = vsub.f32 %v4687_v28, %v1187_v54  ;;  %v967_v16 = vsel %vm715_vm0, %v943_v13, 0.0 }
  0xbf   : > { %v5459_v25 = vsub.f32 %v4656_v30, %v912_v6  ;;  %v1240_v27 = vsel %vm1133_vm1, %v1218_v23, 0.0  ;;  %v879_v1 = vpop.xlane.xlu0 %878 }
  0xc0   : > { %v1151_v9 = vpop.xlane.xlu1 %1150  ;;  %1241 = vadd.xlane.f32.xlu1 %v1240_v27  ;;  %968 = vadd.xlane.f32.xlu0 %v967_v16  ;;  %v913_v4 = vmul.f32 0.03125, %v879_v1  ;;  %v1219_v39 = vmul.f32 %v5454_v29, %v5454_v29 }
  0xc1   : > { %v1188_v18 = vmul.f32 0.125, %v1151_v9  ;;  %v944_v28 = vmul.f32 %v5459_v25, %v5459_v25 }
  0xc2   : > { %v5468_v10 = vsub.f32 %v4659_v33, %v913_v4  ;;  %v1243_v21 = vsel %vm1133_vm1, %v1219_v39, 0.0 }
  0xc3   : > { %v5473_v30 = vsub.f32 %v4688_v35, %v1188_v18  ;;  %v970_v52 = vsel %vm715_vm0, %v944_v28, 0.0  ;;  %v1154_v49 = vpop.xlane.xlu0 %1153 }
  0xc4   : > { %v882_v42 = vpop.xlane.xlu1 %881  ;;  %971 = vadd.xlane.f32.xlu1 %v970_v52  ;;  %1244 = vadd.xlane.f32.xlu0 %v1243_v21  ;;  %v1189_v54 = vmul.f32 0.125, %v1154_v49  ;;  %v945_v13 = vmul.f32 %v5468_v10, %v5468_v10 }
  0xc5   : > { %v914_v6 = vmul.f32 0.03125, %v882_v42  ;;  %v1220_v33 = vmul.f32 %v5473_v30, %v5473_v30 }
  0xc6   : > { %v5482_v23 = vsub.f32 %v4691_v38, %v1189_v54  ;;  %v973_v26 = vsel %vm715_vm0, %v945_v13, 0.0 }
  0xc7   : > { %v5487_v35 = vsub.f32 %v4660_v40, %v914_v6  ;;  %v1246_v16 = vsel %vm1133_vm1, %v1220_v33, 0.0  ;;  %v885_v27 = vpop.xlane.xlu0 %884 }
  0xc8   : > { %v1157_v1 = vpop.xlane.xlu1 %1156  ;;  %1247 = vadd.xlane.f32.xlu1 %v1246_v16  ;;  %974 = vadd.xlane.f32.xlu0 %v973_v26  ;;  %v915_v9 = vmul.f32 0.03125, %v885_v27  ;;  %v1221_v4 = vmul.f32 %v5482_v23, %v5482_v23 }
  0xc9   : > { %v1190_v39 = vmul.f32 0.125, %v1157_v1  ;;  %v946_v38 = vmul.f32 %v5487_v35, %v5487_v35 }
  0xca   : > { %v5496_v18 = vsub.f32 %v4663_v43, %v915_v9  ;;  %v1249_v31 = vsel %vm1133_vm1, %v1221_v4, 0.0  ;;  %v4871_v43 = vld [vmem:[%s7240_s9 + $0x8] sm:$0xff]   ;;  %v4872_v9 = vld [vmem:[%s7240_s9] sm:$0xff]  }
  0xcb   : > { %v5501_v40 = vsub.f32 %v4692_v45, %v1190_v39  ;;  %v976_v28 = vsel %vm715_vm0, %v946_v38, 0.0  ;;  %v1160_v21 = vpop.xlane.xlu0 %1159  ;;  %v7256_v45 = vmov 0.0  }
  0xcc   : > { %v888_v52 = vpop.xlane.xlu1 %887  ;;  %977 = vadd.xlane.f32.xlu1 %v976_v28  ;;  %1250 = vadd.xlane.f32.xlu0 %v1249_v31  ;;  %v1191_v49 = vmul.f32 0.125, %v1160_v21  ;;  %v947_v42 = vmul.f32 %v5496_v18, %v5496_v18 }
  0xcd   : > { %v916_v54 = vmul.f32 0.03125, %v888_v52  ;;  %v1222_v36 = vmul.f32 %v5501_v40, %v5501_v40  ;;  %4787 = vmatprep.subr.bf16.mxu0 %v7256_v45  ;;  %4791 = vmatprep.mubr.msk.bf16.mxu0 %vm5028_vm2, %v7256_v45 }
  0xce   : > { %v5514_v13 = vsub.f32 %v4695_v48, %v1191_v49  ;;  %v979_v6 = vsel %vm715_vm0, %v947_v42, 0.0  ;;  %4788 = vmatpush3.bf16.msra.mxu0 %v4871_v43 }
  0xcf   : > { %v5519_v33 = vsub.f32 %v4664_v50, %v916_v54  ;;  %v1252_v26 = vsel %vm1133_vm1, %v1222_v36, 0.0  ;;  %v891_v16 = vpop.xlane.xlu0 %890  ;;  %4789 = vmatprep.subr.bf16.mxu0 %v7256_v45 }
  0xd0   : > { %v1163_v27 = vpop.xlane.xlu1 %1162  ;;  %1253 = vadd.xlane.f32.xlu1 %v1252_v26  ;;  %980 = vadd.xlane.f32.xlu0 %v979_v6  ;;  %v917_v1 = vmul.f32 0.03125, %v891_v16  ;;  %v1223_v48 = vmul.f32 %v5514_v13, %v5514_v13  ;;  %v5559_v6 = vld [vmem:[%s7242_s11 + $0x8] sm:$0xff]  }
  0xd1   : > { %v1192_v4 = vmul.f32 0.125, %v1163_v27  ;;  %v948_v41 = vmul.f32 %v5519_v33, %v5519_v33 }
  0xd2   : > { %v5532_v50 = vsub.f32 %v4667_v53, %v917_v1  ;;  %v1255_v39 = vsel %vm1133_vm1, %v1223_v48, 0.0  ;;  %4790 = vmatpush3.bf16.msra.mxu0 %v4872_v9 }
  0xd3   : > { %v5537_v38 = vsub.f32 %v4696_v55, %v1192_v4  ;;  %v982_v31 = vsel %vm715_vm0, %v948_v41, 0.0  ;;  %v1166_v28 = vpop.xlane.xlu0 %1165  ;;  %4813 = vmatprep.subr.bf16.mxu0 %v5559_v6 }
  0xd4   : > { %v894_v21 = vpop.xlane.xlu1 %893  ;;  %983 = vadd.xlane.f32.xlu1 %v982_v31  ;;  %1256 = vadd.xlane.f32.xlu0 %v1255_v39  ;;  %v1193_v52 = vmul.f32 0.125, %v1166_v28  ;;  %v949_v49 = vmul.f32 %v5532_v50, %v5532_v50 }
  0xd5   : > { %v918_v42 = vmul.f32 0.03125, %v894_v21  ;;  %v1224_v53 = vmul.f32 %v5537_v38, %v5537_v38 }
  0xd6   : > { %v5548_v46 = vsub.f32 %v4699_v58, %v1193_v52  ;;  %v985_v55 = vsel %vm715_vm0, %v949_v49, 0.0 }
  0xd7   : > { %v5553_v43 = vsub.f32 %v4668_v60, %v918_v42  ;;  %v1258_v54 = vsel %vm1133_vm1, %v1224_v53, 0.0  ;;  %v897_v36 = vpop.xlane.xlu0 %896 }
  0xd8   : > { %v1169_v26 = vpop.xlane.xlu1 %1168  ;;  %1259 = vadd.xlane.f32.xlu1 %v1258_v54  ;;  %986 = vadd.xlane.f32.xlu0 %v985_v55  ;;  %v919_v16 = vmul.f32 0.03125, %v897_v36  ;;  %v1225_v58 = vmul.f32 %v5548_v46, %v5548_v46 }
  0xd9   : > { %v1194_v27 = vmul.f32 0.125, %v1169_v26  ;;  %v950_v51 = vmul.f32 %v5553_v43, %v5553_v43 }
  0xda   : > { %v5568_v60 = vsub.f32 %v4671_v63, %v919_v16  ;;  %v1261_v1 = vsel %vm1133_vm1, %v1225_v58, 0.0  ;;  %v7326_v16 = vunpack.c.h.bf16 %v5314_v5  ;;  %v7327_v5 = vunpack.c.l.bf16 %v5336_v32 }
  0xdb   : > { %v5573_v48 = vsub.f32 %v4700_v2, %v1194_v27  ;;  %v988_v9 = vsel %vm715_vm0, %v950_v51, 0.0  ;;  %v1172_v4 = vpop.xlane.xlu0 %1171 }
  0xdc   : > { %v900_v41 = vpop.xlane.xlu1 %899  ;;  %989 = vadd.xlane.f32.xlu1 %v988_v9  ;;  %1262 = vadd.xlane.f32.xlu0 %v1261_v1  ;;  %v1195_v39 = vmul.f32 0.125, %v1172_v4  ;;  %v951_v31 = vmul.f32 %v5568_v60, %v5568_v60 }
  0xdd   : > { %v920_v28 = vmul.f32 0.03125, %v900_v41  ;;  %v1226_v63 = vmul.f32 %v5573_v48, %v5573_v48 }
  0xde   : > { %v5582_v21 = vsub.f32 %v4703_v12, %v1195_v39  ;;  %v991_v56 = vsel %vm715_vm0, %v951_v31, 0.0  ;;  %v1407_v12 = vld [vmem:[%s7243_s12] sm:$0xf] }
  0xdf   : > { %v5587_v2 = vsub.f32 %v4672_v17, %v920_v28  ;;  %v1264_v52 = vsel %vm1133_vm1, %v1226_v63, 0.0  ;;  %v903_v49 = vpop.xlane.xlu0 %902  ;;  %4841 = vmatprep.subr.msk.bf16.mxu1 %vm1432_vm3, %v1407_v12  ;;  %v1434_v17 = vsel %vm1432_vm3, %v1407_v12, 0  ;;  %v7328_v28 = vunpack.c.h.bf16 %v5325_v19 }
  0xe0   : > { %v1175_v42 = vpop.xlane.xlu1 %1174  ;;  %1265 = vadd.xlane.f32.xlu1 %v1264_v52  ;;  %992 = vadd.xlane.f32.xlu0 %v991_v56  ;;  %v921_v53 = vmul.f32 0.03125, %v903_v49  ;;  %v1227_v55 = vmul.f32 %v5582_v21, %v5582_v21  ;;  %v7329_v12 = vunpack.c.h.bf16 %v5336_v32  ;;  %v1757_v32 = vrot.slane %v5375_v22, %v5367_v62 }
  0xe1   : > { %v1196_v54 = vmul.f32 0.125, %v1175_v42  ;;  %v952_v61 = vmul.f32 %v5587_v2, %v5587_v2  ;;  %4796 = vmatpush3.bf16.msra.mxu1 %v1434_v17  ;;  %vm4447_vm3 = vcmask 191488  }
  0xe2   : > { %v5599_v36 = vsub.f32 %v4675_v24, %v921_v53  ;;  %v1267_v26 = vsel %vm1133_vm1, %v1227_v55, 0.0  ;;  %4833 = vmatprep.subr.bf16.mxu1 %v7256_v45 }
  0xe3   : > { %v5604_v58 = vsub.f32 %v7326_v16, %v1196_v54  ;;  %v994_v27 = vsel %vm715_vm0, %v952_v61, 0.0  ;;  %v1178_v51 = vpop.xlane.xlu0 %1177  ;;  %v5639_v16 = vsub.s32 3, %v5357_v57 }
  0xe4   : > { %v906_v1 = vpop.xlane.xlu1 %905  ;;  %995 = vadd.xlane.f32.xlu1 %v994_v27  ;;  %1268 = vadd.xlane.f32.xlu0 %v1267_v26  ;;  %v1197_v9 = vmul.f32 0.125, %v1178_v51  ;;  %v953_v24 = vmul.f32 %v5599_v36, %v5599_v36  ;;  %v5636_v26 = vsub.s32 2, %v5357_v57 }
  0xe5   : > { %v922_v4 = vmul.f32 0.03125, %v906_v1  ;;  %v1228_v41 = vmul.f32 %v5604_v58, %v5604_v58  ;;  %v1715_v1 = vrot.slane %v5369_v0, %v5639_v16 }
  0xe6   : > { %v5614_v39 = vsub.f32 %v7327_v5, %v1197_v9  ;;  %v997_v31 = vsel %vm715_vm0, %v953_v24, 0.0  ;;  %v1708_v27 = vrot.slane %v5369_v0, %v5636_v26  ;;  %v1764_v51 = vrot.slane %v5375_v22, %v5636_v26 }
  0xe7   : > { %v5619_v63 = vsub.f32 %v7328_v28, %v922_v4  ;;  %v1270_v56 = vsel %vm1133_vm1, %v1228_v41, 0.0  ;;  %v5650_v9 = vsub.s32 4, %v5357_v57  ;;  %v1771_v24 = vrot.slane %v5375_v22, %v5639_v16 }
  0xe8   : > { %v1181_v52 = vpop.xlane.xlu1 %1180  ;;  %1271 = vadd.xlane.f32.xlu1 %v1270_v56  ;;  %998 = vadd.xlane.f32.xlu0 %v997_v31  ;;  %v1229_v49 = vmul.f32 %v5614_v39, %v5614_v39  ;;  %v5657_v41 = vsub.s32 5, %v5357_v57  ;;  %v5664_v28 = vsub.s32 6, %v5357_v57 }
  0xe9   : > { %v1198_v42 = vmul.f32 0.125, %v1181_v52  ;;  %v954_v53 = vmul.f32 %v5619_v63, %v5619_v63  ;;  %v1722_v4 = vrot.slane %v5369_v0, %v5650_v9  ;;  %v1778_v5 = vrot.slane %v5375_v22, %v5650_v9 }
  0xea   : > { %v1273_v55 = vsel %vm1133_vm1, %v1229_v49, 0.0  ;;  %v1729_v31 = vrot.slane %v5369_v0, %v5657_v41  ;;  %v1785_v56 = vrot.slane %v5375_v22, %v5657_v41  ;;  %v1736_v52 = vrot.slane %v5369_v0, %v5664_v28 }
  0xeb   : > { %v5629_v54 = vsub.f32 %v7329_v12, %v1198_v42  ;;  %v1000_v19 = vsel %vm715_vm0, %v954_v53, 0.0  ;;  %v5671_v49 = vsub.s32 7, %v5357_v57  ;;  %v1792_v42 = vrot.slane %v5375_v22, %v5664_v28 }
  0xec   : > { %1001 = vadd.xlane.f32.xlu1 %v1000_v19  ;;  %1274 = vadd.xlane.f32.xlu0 %v1273_v55  ;;  %v5029_v12 = vmov -1e+09  }
  0xed   : > { %v1230_v61 = vmul.f32 %v5629_v54, %v5629_v54  ;;  %v1743_v53 = vrot.slane %v5369_v0, %v5671_v49  ;;  %v1799_v55 = vrot.slane %v5375_v22, %v5671_v49  ;;  %v5680_v19 = vsel %vm1874_vm4, 0.0, %v5029_v12  ;;  %v5689_v0 = vpop.permute.xlu0 %1696 }
  0xee   : > { %7331 = vst [vmem:[#allocation6_spill] sm:$0xff] %v5689_v0 }
  0xef   : > { %v1276_v17 = vsel %vm1133_vm1, %v1230_v61, 0.0  ;;  %v2128_v61 = vrot.slane %v5680_v19, %v5364_v59 }
  0xf0   : > { %1277 = vadd.xlane.f32.xlu1 %v1276_v17  ;;  %v5685_v17 = vpop.permute.xlu1 %1703 }
  0xf1   : > { %7330 = vst [vmem:[#allocation5_spill] sm:$0xff] %v5685_v17 }
 0x101   : > { %1759 = vbcast.lane.b32.xlu1 %v1757_v32, 256  ;;  %v2135_v32 = vrot.slane %v5680_v19, %v5367_v62 }
 0x102   : > { %1710 = vbcast.lane.b32.xlu0 %v1708_v27, 256  ;;  %v5691_v27 = vsel %vm1875_vm5, 0.0, %v5029_v12 }
 0x105   : > { %1766 = vbcast.lane.b32.xlu1 %v1764_v51, 256  ;;  %v2142_v51 = vrot.slane %v5680_v19, %v5636_v26 }
 0x106   : > { %1717 = vbcast.lane.b32.xlu0 %v1715_v1, 256  ;;  %v2184_v1 = vrot.slane %v5691_v27, %v5364_v59 }
 0x109   : > { %1773 = vbcast.lane.b32.xlu1 %v1771_v24, 256  ;;  %v5697_v24 = vpop.permute.xlu1 %1752 }
 0x10a   : > { %1724 = vbcast.lane.b32.xlu0 %v1722_v4, 256  ;;  %7332 = vst [vmem:[#allocation7_spill] sm:$0xff] %v5697_v24 }
 0x10d   : > { %1780 = vbcast.lane.b32.xlu1 %v1778_v5, 256 }
 0x10e   : > { %1731 = vbcast.lane.b32.xlu0 %v1729_v31, 256 }
 0x111   : > { %1787 = vbcast.lane.b32.xlu1 %v1785_v56, 256 }
 0x112   : > { %1738 = vbcast.lane.b32.xlu0 %v1736_v52, 256 }
 0x115   : > { %1794 = vbcast.lane.b32.xlu1 %v1792_v42, 256 }
 0x116   : > { %1745 = vbcast.lane.b32.xlu0 %v1743_v53, 256 }
 0x119   : > { %1801 = vbcast.lane.b32.xlu1 %v1799_v55, 256 }
 0x11a   : > { %2130 = vbcast.lane.b32.xlu0 %v2128_v61, 256 }
 0x11d   : > { %2137 = vbcast.lane.b32.xlu1 %v2135_v32, 256 }
 0x11e   : > { %2144 = vbcast.lane.b32.xlu0 %v2142_v51, 256 }
 0x121   : > { %2186 = vbcast.lane.b32.xlu1 %v2184_v1, 256 }
 0x134   : > { %v731_v22 = vpop.xlane.xlu0 %730 }
 0x135   : > { %v735_v4 = vmul.f32 0.03125, %v731_v22 }
 0x137   : > { %v737_v5 = vadd.f32 1e-05, %v735_v4 }
 0x138   : > { %v734_v31 = vpop.xlane.xlu1 %733 }
 0x139   : > { %4877 = vrsqrt.f32 %v737_v5  ;;  %v736_v56 = vmul.f32 0.03125, %v734_v31  ;;  %v957_v52 = vpop.xlane.xlu0 %956 }
 0x13a   : > { %v1003_v42 = vmul.f32 0.03125, %v957_v52 }
 0x13b   : > { %v738_v53 = vadd.f32 1e-05, %v736_v56 }
 0x13c   : > { %v1019_v55 = vadd.f32 1e-05, %v1003_v42 }
 0x13d   : > { %4879 = vrsqrt.f32 %v738_v53  ;;  %v960_v12 = vpop.xlane.xlu1 %959  ;;  %v1233_v61 = vpop.xlane.xlu0 %1232 }
 0x13e   : > { %4881 = vrsqrt.f32 %v1019_v55  ;;  %v1004_v32 = vmul.f32 0.03125, %v960_v12  ;;  %v1279_v45 = vmul.f32 0.125, %v1233_v61 }
 0x140   : > { %v1020_v59 = vadd.f32 1e-05, %v1004_v32  ;;  %v1295_v24 = vadd.f32 1e-05, %v1279_v45 }
 0x141   : > { %v1236_v17 = vpop.xlane.xlu1 %1235  ;;  %v963_v51 = vpop.xlane.xlu0 %962 }
 0x142   : > { %4883 = vrsqrt.f32 %v1020_v59  ;;  %v1280_v22 = vmul.f32 0.125, %v1236_v17  ;;  %v1005_v1 = vmul.f32 0.03125, %v963_v51  ;;  %v5703_v59 = vld [vmem:[%s7236_s5] ss:$0 sm:$0xff] }
 0x143   : > { %4885 = vrsqrt.f32 %v1295_v24 }
 0x144   : > { %v1296_v4 = vadd.f32 1e-05, %v1280_v22  ;;  %v1021_v5 = vadd.f32 1e-05, %v1005_v1 }
 0x145   : > { %v966_v31 = vpop.xlane.xlu1 %965  ;;  %v1239_v52 = vpop.xlane.xlu0 %1238 }
 0x146   : > { %v4878_v56 = vpop.eup %4877  ;;  %4887 = vrsqrt.f32 %v1296_v4  ;;  %v1006_v42 = vmul.f32 0.03125, %v966_v31  ;;  %v1281_v53 = vmul.f32 0.125, %v1239_v52  ;;  %v5710_v31 = vld [vmem:[%s7237_s6] ss:$0 sm:$0xff] }
 0x147   : > { %4889 = vrsqrt.f32 %v1021_v5  ;;  %v741_v55 = vmul.f32 %v4878_v56, %v5380_v44 }
 0x148   : > { %v1022_v12 = vadd.f32 1e-05, %v1006_v42  ;;  %v1297_v61 = vadd.f32 1e-05, %v1281_v53 }
 0x149   : > { %v1242_v45 = vpop.xlane.xlu1 %1241  ;;  %v969_v17 = vpop.xlane.xlu0 %968  ;;  %v749_v4 = vmul.f32 %v5703_v59, %v741_v55 }
 0x14a   : > { %v4880_v24 = vpop.eup %4879  ;;  %4891 = vrsqrt.f32 %v1022_v12  ;;  %v1282_v32 = vmul.f32 0.125, %v1242_v45  ;;  %v1007_v51 = vmul.f32 0.03125, %v969_v17 }
 0x14b   : > { %v4882_v22 = vpop.eup %4881  ;;  %4893 = vrsqrt.f32 %v1297_v61  ;;  %v742_v1 = vmul.f32 %v4880_v24, %v5385_v37  ;;  %v757_v37 = vadd.f32 %v5710_v31, %v749_v4 }
 0x14c   : > { %v1298_v44 = vadd.f32 1e-05, %v1282_v32  ;;  %v1023_v5 = vadd.f32 1e-05, %v1007_v51  ;;  %v1051_v52 = vmul.f32 %v4882_v22, %v5390_v14 }
 0x14d   : > { %v972_v56 = vpop.xlane.xlu1 %971  ;;  %v1245_v42 = vpop.xlane.xlu0 %1244  ;;  %v750_v53 = vmul.f32 %v5703_v59, %v742_v1 }
 0x14e   : > { %4895 = vrsqrt.f32 %v1298_v44  ;;  %v1008_v12 = vmul.f32 0.03125, %v972_v56  ;;  %v1283_v61 = vmul.f32 0.125, %v1245_v42  ;;  %v1067_v17 = vmul.f32 %v5703_v59, %v1051_v52  ;;  %v4874_v44 = vld [vmem:[%s7242_s11] sm:$0xff]  }
 0x14f   : > { %v4884_v45 = vpop.eup %4883  ;;  %4897 = vrsqrt.f32 %v1023_v5  ;;  %v758_v55 = vadd.f32 %v5710_v31, %v750_v53  ;;  %v5726_v52 = vld [vmem:[%s7238_s7] ss:$0 sm:$0xff] }
 0x150   : > { %v4886_v24 = vpop.eup %4885  ;;  %v1024_v32 = vadd.f32 1e-05, %v1008_v12  ;;  %v1299_v51 = vadd.f32 1e-05, %v1283_v61  ;;  %v1052_v14 = vmul.f32 %v4884_v45, %v5403_v7 }
 0x151   : > { %v1248_v22 = vpop.xlane.xlu1 %1247  ;;  %v975_v0 = vpop.xlane.xlu0 %974  ;;  %v759_v57 = vpack.c.bf16 %v758_v55, %v757_v37  ;;  %v1327_v1 = vmul.f32 %v4886_v24, %v5398_v3  ;;  %v1083_v3 = vadd.f32 %v5710_v31, %v1067_v17 }
 0x152   : > { %4899 = vrsqrt.f32 %v1024_v32  ;;  %v1284_v4 = vmul.f32 0.125, %v1248_v22  ;;  %v1009_v5 = vmul.f32 0.03125, %v975_v0  ;;  %v1068_v56 = vmul.f32 %v5703_v59, %v1052_v14 }
 0x153   : > { %v4888_v7 = vpop.eup %4887  ;;  %4901 = vrsqrt.f32 %v1299_v51  ;;  %4792 = vmatmul.mubr.msk.bf16.vlgmr.msra.gmra.mxu0 %vm715_vm0, %v759_v57  ;;  %v1349_v24 = vmul.f32 %v5726_v52, %v1327_v1  ;;  %v5738_v51 = vld [vmem:[%s7239_s8] ss:$0 sm:$0xff] }
 0x154   : > { %v4890_v42 = vpop.eup %4889  ;;  %v1300_v53 = vadd.f32 1e-05, %v1284_v4  ;;  %v1025_v12 = vadd.f32 1e-05, %v1009_v5  ;;  %v1084_v61 = vadd.f32 %v5710_v31, %v1068_v56  ;;  %4814 = vmatpush3.bf16.msra.mxu0 %v5559_v6  ;;  %v1328_v0 = vmul.f32 %v4888_v7, %v5417_v8 }
 0x155   : > { %v1053_v45 = vmul.f32 %v4890_v42, %v5412_v34  ;;  %v978_v37 = vpop.xlane.xlu1 %977  ;;  %v1251_v55 = vpop.xlane.xlu0 %1250  ;;  %4815 = vmatprep.subr.bf16.mxu0 %v4874_v44  ;;  %v1371_v7 = vadd.f32 %v5738_v51, %v1349_v24 }
 0x156   : > { %4903 = vrsqrt.f32 %v1300_v53  ;;  %v1010_v57 = vmul.f32 0.03125, %v978_v37  ;;  %v1285_v32 = vmul.f32 0.125, %v1251_v55  ;;  %v1387_v17 = vpack.c.bf16 %v1084_v61, %v1083_v3 }
 0x157   : > { %v4892_v14 = vpop.eup %4891  ;;  %4905 = vrsqrt.f32 %v1025_v12  ;;  %v1350_v8 = vmul.f32 %v5726_v52, %v1328_v0  ;;  %v1069_v34 = vmul.f32 %v5703_v59, %v1053_v45 }
 0x158   : > { %v4894_v6 = vpop.eup %4893  ;;  %v1054_v22 = vmul.f32 %v4892_v14, %v5431_v15  ;;  %v1026_v1 = vadd.f32 1e-05, %v1010_v57  ;;  %v1301_v4 = vadd.f32 1e-05, %v1285_v32  ;;  %4817 = vmatprep.mubr.msk.bf16.mxu0 %vm715_vm0, %v1387_v17  ;;  %4816 = vmatpush3.bf16.msra.mxu0 %v4874_v44 }
 0x159   : > { %v1254_v5 = vpop.xlane.xlu1 %1253  ;;  %v981_v56 = vpop.xlane.xlu0 %980  ;;  %v1372_v3 = vadd.f32 %v5738_v51, %v1350_v8  ;;  %v1329_v42 = vmul.f32 %v4894_v6, %v5426_v11  ;;  %v1085_v45 = vadd.f32 %v5710_v31, %v1069_v34 }
 0x15a   : > { %4907 = vrsqrt.f32 %v1026_v1  ;;  %v1286_v53 = vmul.f32 0.125, %v1254_v5  ;;  %v1011_v12 = vmul.f32 0.03125, %v981_v56  ;;  %v1070_v61 = vmul.f32 %v5703_v59, %v1054_v22 }
 0x15b   : > { %v4896_v0 = vpop.eup %4895  ;;  %4909 = vrsqrt.f32 %v1301_v4  ;;  %v1399_v15 = vpack.c.bf16 %v1372_v3, %v1371_v7  ;;  %v1351_v17 = vmul.f32 %v5726_v52, %v1329_v42 }
 0x15c   : > { %v4898_v37 = vpop.eup %4897  ;;  %v1302_v44 = vadd.f32 1e-05, %v1286_v53  ;;  %v1027_v55 = vadd.f32 1e-05, %v1011_v12  ;;  %v1086_v57 = vadd.f32 %v5710_v31, %v1070_v61  ;;  %v1330_v24 = vmul.f32 %v4896_v0, %v5445_v20 }
 0x15d   : > { %4797 = vmatprep.mubr.msk.bf16.mxu1 %vm1133_vm1, %v1399_v15  ;;  %v984_v11 = vpop.xlane.xlu1 %983  ;;  %v1257_v32 = vpop.xlane.xlu0 %1256  ;;  %v1055_v14 = vmul.f32 %v4898_v37, %v5440_v47  ;;  %v1373_v47 = vadd.f32 %v5738_v51, %v1351_v17 }
 0x15e   : > { %4911 = vrsqrt.f32 %v1302_v44  ;;  %v1012_v8 = vmul.f32 0.03125, %v984_v11  ;;  %v1287_v6 = vmul.f32 0.125, %v1257_v32  ;;  %v1388_v22 = vpack.c.bf16 %v1086_v57, %v1085_v45 }
 0x15f   : > { %v4900_v34 = vpop.eup %4899  ;;  %4913 = vrsqrt.f32 %v1027_v55  ;;  %v1352_v1 = vmul.f32 %v5726_v52, %v1330_v24  ;;  %v1071_v4 = vmul.f32 %v5703_v59, %v1055_v14 }
 0x160   : > { %v4902_v5 = vpop.eup %4901  ;;  %v1028_v20 = vadd.f32 1e-05, %v1012_v8  ;;  %v1303_v56 = vadd.f32 1e-05, %v1287_v6  ;;  %4818 = vmatmul.mubr.msk.bf16.vlgmr.msra.gmra.mxu0 %vm715_vm0, %v1388_v22  ;;  %v1056_v7 = vmul.f32 %v4900_v34, %v5459_v25 }
 0x161   : > { %v1260_v3 = vpop.xlane.xlu1 %1259  ;;  %v987_v42 = vpop.xlane.xlu0 %986  ;;  %v1374_v53 = vadd.f32 %v5738_v51, %v1352_v1  ;;  %v1331_v12 = vmul.f32 %v4902_v5, %v5454_v29  ;;  %v1087_v44 = vadd.f32 %v5710_v31, %v1071_v4 }
 0x162   : > { %4915 = vrsqrt.f32 %v1028_v20  ;;  %v1288_v61 = vmul.f32 0.125, %v1260_v3  ;;  %v1013_v0 = vmul.f32 0.03125, %v987_v42  ;;  %v1072_v15 = vmul.f32 %v5703_v59, %v1056_v7 }
 0x163   : > { %v4904_v45 = vpop.eup %4903  ;;  %4917 = vrsqrt.f32 %v1303_v56  ;;  %v1400_v37 = vpack.c.bf16 %v1374_v53, %v1373_v47  ;;  %v1353_v17 = vmul.f32 %v5726_v52, %v1331_v12 }
 0x164   : > { %v4906_v55 = vpop.eup %4905  ;;  %v1304_v25 = vadd.f32 1e-05, %v1288_v61  ;;  %v1029_v57 = vadd.f32 1e-05, %v1013_v0  ;;  %v1088_v24 = vadd.f32 %v5710_v31, %v1072_v15  ;;  %v1332_v11 = vmul.f32 %v4904_v45, %v5473_v30 }
 0x165   : > { %4798 = vmatmul.mubr.msk.bf16.vlgmr.msra.gmra.mxu1 %vm1133_vm1, %v1400_v37  ;;  %v990_v29 = vpop.xlane.xlu1 %989  ;;  %v1263_v32 = vpop.xlane.xlu0 %1262  ;;  %v1057_v14 = vmul.f32 %v4906_v55, %v5468_v10  ;;  %v1375_v10 = vadd.f32 %v5738_v51, %v1353_v17 }
 0x166   : > { %4919 = vrsqrt.f32 %v1304_v25  ;;  %v1014_v8 = vmul.f32 0.03125, %v990_v29  ;;  %v1289_v6 = vmul.f32 0.125, %v1263_v32  ;;  %v1389_v22 = vpack.c.bf16 %v1088_v24, %v1087_v44 }
 0x167   : > { %v4908_v34 = vpop.eup %4907  ;;  %4921 = vrsqrt.f32 %v1029_v57  ;;  %v1354_v1 = vmul.f32 %v5726_v52, %v1332_v11  ;;  %v1073_v4 = vmul.f32 %v5703_v59, %v1057_v14 }
 0x168   : > { %v4910_v5 = vpop.eup %4909  ;;  %v1030_v30 = vadd.f32 1e-05, %v1014_v8  ;;  %v1305_v20 = vadd.f32 1e-05, %v1289_v6  ;;  %4821 = vmatprep.mubr.msk.bf16.mxu0 %vm715_vm0, %v1389_v22  ;;  %v1058_v56 = vmul.f32 %v4908_v34, %v5487_v35 }
 0x169   : > { %v1266_v7 = vpop.xlane.xlu1 %1265  ;;  %v993_v3 = vpop.xlane.xlu0 %992  ;;  %v1376_v42 = vadd.f32 %v5738_v51, %v1354_v1  ;;  %v1333_v47 = vmul.f32 %v4910_v5, %v5482_v23  ;;  %v1089_v45 = vadd.f32 %v5710_v31, %v1073_v4 }
 0x16a   : > { %4923 = vrsqrt.f32 %v1030_v30  ;;  %v1290_v53 = vmul.f32 0.125, %v1266_v7  ;;  %v1015_v12 = vmul.f32 0.03125, %v993_v3  ;;  %v1074_v61 = vmul.f32 %v5703_v59, %v1058_v56 }
 0x16b   : > { %v4912_v0 = vpop.eup %4911  ;;  %4925 = vrsqrt.f32 %v1305_v20  ;;  %v1401_v15 = vpack.c.bf16 %v1376_v42, %v1375_v10  ;;  %v1355_v24 = vmul.f32 %v5726_v52, %v1333_v47 }
 0x16c   : > { %v4914_v37 = vpop.eup %4913  ;;  %v1306_v35 = vadd.f32 1e-05, %v1290_v53  ;;  %v1031_v44 = vadd.f32 1e-05, %v1015_v12  ;;  %v1090_v55 = vadd.f32 %v5710_v31, %v1074_v61  ;;  %v1334_v25 = vmul.f32 %v4912_v0, %v5501_v40 }
 0x16d   : > { %4801 = vmatprep.mubr.msk.bf16.mxu1 %vm1133_vm1, %v1401_v15  ;;  %v996_v23 = vpop.xlane.xlu1 %995  ;;  %v1269_v57 = vpop.xlane.xlu0 %1268  ;;  %v1059_v11 = vmul.f32 %v4914_v37, %v5496_v18  ;;  %v1377_v18 = vadd.f32 %v5738_v51, %v1355_v24 }
 0x16e   : > { %4927 = vrsqrt.f32 %v1306_v35  ;;  %v1016_v29 = vmul.f32 0.03125, %v996_v23  ;;  %v1291_v32 = vmul.f32 0.125, %v1269_v57  ;;  %v1390_v17 = vpack.c.bf16 %v1090_v55, %v1089_v45 }
 0x16f   : > { %v4916_v14 = vpop.eup %4915  ;;  %4929 = vrsqrt.f32 %v1031_v44  ;;  %v1356_v8 = vmul.f32 %v5726_v52, %v1334_v25  ;;  %v1075_v6 = vmul.f32 %v5703_v59, %v1059_v11 }
 0x170   : > { %v4918_v22 = vpop.eup %4917  ;;  %v1032_v40 = vadd.f32 1e-05, %v1016_v29  ;;  %v1307_v34 = vadd.f32 1e-05, %v1291_v32  ;;  %4822 = vmatmul.mubr.msk.bf16.gmra.mxu0 %vm715_vm0, %v1390_v17  ;;  %v1060_v1 = vmul.f32 %v4916_v14, %v5519_v33 }
 0x171   : > { %v1272_v4 = vpop.xlane.xlu1 %1271  ;;  %v999_v5 = vpop.xlane.xlu0 %998  ;;  %v1378_v30 = vadd.f32 %v5738_v51, %v1356_v8  ;;  %v1335_v20 = vmul.f32 %v4918_v22, %v5514_v13  ;;  %v1091_v47 = vadd.f32 %v5710_v31, %v1075_v6 }
 0x172   : > { %4931 = vrsqrt.f32 %v1032_v40  ;;  %v1292_v56 = vmul.f32 0.125, %v1272_v4  ;;  %v1017_v7 = vmul.f32 0.03125, %v999_v5  ;;  %v1076_v3 = vmul.f32 %v5703_v59, %v1060_v1 }
 0x173   : > { %v4920_v10 = vpop.eup %4919  ;;  %4933 = vrsqrt.f32 %v1307_v34  ;;  %v1402_v42 = vpack.c.bf16 %v1378_v30, %v1377_v18  ;;  %v1357_v45 = vmul.f32 %v5726_v52, %v1335_v20 }
 0x174   : > { %v4922_v53 = vpop.eup %4921  ;;  %v1308_v33 = vadd.f32 1e-05, %v1292_v56  ;;  %v1033_v12 = vadd.f32 1e-05, %v1017_v7  ;;  %v1092_v61 = vadd.f32 %v5710_v31, %v1076_v3  ;;  %v1336_v0 = vmul.f32 %v4920_v10, %v5537_v38 }
 0x175   : > { %4802 = vmatmul.mubr.msk.bf16.gmra.mxu1 %vm1133_vm1, %v1402_v42  ;;  %v1002_v13 = vpop.xlane.xlu1 %1001  ;;  %v1275_v15 = vpop.xlane.xlu0 %1274  ;;  %v1061_v37 = vmul.f32 %v4922_v53, %v5532_v50  ;;  %v1379_v50 = vadd.f32 %v5738_v51, %v1357_v45 }
 0x176   : > { %4935 = vrsqrt.f32 %v1308_v33  ;;  %v1018_v35 = vmul.f32 0.03125, %v1002_v13  ;;  %v1293_v44 = vmul.f32 0.125, %v1275_v15  ;;  %v1391_v55 = vpack.c.bf16 %v1092_v61, %v1091_v47 }
 0x177   : > { %v4924_v25 = vpop.eup %4923  ;;  %4937 = vrsqrt.f32 %v1033_v12  ;;  %v1358_v23 = vmul.f32 %v5726_v52, %v1336_v0  ;;  %v1077_v57 = vmul.f32 %v5703_v59, %v1061_v37 }
 0x178   : > { %v4926_v24 = vpop.eup %4925  ;;  %v1034_v38 = vadd.f32 1e-05, %v1018_v35  ;;  %v1309_v11 = vadd.f32 1e-05, %v1293_v44  ;;  %4825 = vmatprep.mubr.msk.bf16.mxu0 %vm715_vm0, %v1391_v55  ;;  %v1062_v29 = vmul.f32 %v4924_v25, %v5553_v43 }
 0x179   : > { %v1278_v32 = vpop.xlane.xlu1 %1277  ;;  %v1380_v17 = vadd.f32 %v5738_v51, %v1358_v23  ;;  %v1337_v14 = vmul.f32 %v4926_v24, %v5548_v46  ;;  %v1093_v34 = vadd.f32 %v5710_v31, %v1077_v57 }
 0x17a   : > { %4939 = vrsqrt.f32 %v1034_v38  ;;  %v1294_v8 = vmul.f32 0.125, %v1278_v32  ;;  %v1078_v6 = vmul.f32 %v5703_v59, %v1062_v29 }
 0x17b   : > { %v4928_v22 = vpop.eup %4927  ;;  %4941 = vrsqrt.f32 %v1309_v11  ;;  %v1403_v40 = vpack.c.bf16 %v1380_v17, %v1379_v50  ;;  %v1359_v18 = vmul.f32 %v5726_v52, %v1337_v14  ;;  %v2191_v14 = vrot.slane %v5691_v27, %v5367_v62 }
 0x17c   : > { %v4930_v1 = vpop.eup %4929  ;;  %v1310_v4 = vadd.f32 1e-05, %v1294_v8  ;;  %v1094_v43 = vadd.f32 %v5710_v31, %v1078_v6  ;;  %v1338_v5 = vmul.f32 %v4928_v22, %v5573_v48  ;;  %v2205_v8 = vrot.slane %v5691_v27, %v5639_v16 }
 0x17d   : > { %4805 = vmatprep.mubr.msk.bf16.mxu1 %vm1133_vm1, %v1403_v40  ;;  %v1063_v46 = vmul.f32 %v4930_v1, %v5568_v60  ;;  %v1381_v3 = vadd.f32 %v5738_v51, %v1359_v18  ;;  %2193 = vbcast.lane.b32.xlu1 %v2191_v14, 256  ;;  %v2163_v6 = vrot.slane %v5680_v19, %v5657_v41 }
 0x17e   : > { %4943 = vrsqrt.f32 %v1310_v4  ;;  %v1392_v30 = vpack.c.bf16 %v1094_v43, %v1093_v34  ;;  %v1360_v20 = vmul.f32 %v5726_v52, %v1338_v5  ;;  %v2212_v22 = vrot.slane %v5691_v27, %v5650_v9 }
 0x17f   : > { %v4932_v56 = vpop.eup %4931  ;;  %v1079_v42 = vmul.f32 %v5703_v59, %v1063_v46  ;;  %v2170_v40 = vrot.slane %v5680_v19, %v5664_v28  ;;  %v2219_v34 = vrot.slane %v5691_v27, %v5657_v41  ;;  %v2177_v1 = vrot.slane %v5680_v19, %v5671_v49  ;;  %v4609_v46 = vld [vmem:[%s7241_s10] ss:$0 sm:$0xff] }
 0x180   : > { %v4934_v7 = vpop.eup %4933  ;;  %4826 = vmatmul.mubr.msk.bf16.gmra.mxu0 %vm715_vm0, %v1392_v30  ;;  %v1382_v10 = vadd.f32 %v5738_v51, %v1360_v20  ;;  %v1064_v48 = vmul.f32 %v4932_v56, %v5587_v2  ;;  %v2226_v4 = vrot.slane %v5691_v27, %v5664_v28  ;;  %v2233_v43 = vrot.slane %v5691_v27, %v5671_v49 }
 0x181   : > { %v1339_v47 = vmul.f32 %v4934_v7, %v5582_v21  ;;  %v1095_v61 = vadd.f32 %v5710_v31, %v1079_v42  ;;  %v5030_v5 = vmov 1966171168  }
 0x182   : > { %v1404_v53 = vpack.c.bf16 %v1382_v10, %v1381_v3  ;;  %v1080_v60 = vmul.f32 %v5703_v59, %v1064_v48  ;;  %v1882_v18 = vunpack.c.l.s4 %v5030_v5  ;;  %v7334_v3 = vld [vmem:[#allocation3_spill] sm:$0xff] }
 0x183   : > { %v4936_v33 = vpop.eup %4935  ;;  %v1361_v15 = vmul.f32 %v5726_v52, %v1339_v47 }
 0x184   : > { %v4938_v12 = vpop.eup %4937  ;;  %4806 = vmatmul.mubr.msk.bf16.gmra.mxu1 %vm1133_vm1, %v1404_v53  ;;  %v1096_v0 = vadd.f32 %v5710_v31, %v1080_v60  ;;  %v1340_v13 = vmul.f32 %v4936_v33, %v5604_v58  ;;  %v1883_v30 = vunpack.c.0.s8 %v1882_v18 }
 0x185   : > { %v1065_v2 = vmul.f32 %v4938_v12, %v5599_v36  ;;  %v1383_v44 = vadd.f32 %v5738_v51, %v1361_v15 }
 0x186   : > { %v1393_v45 = vpack.c.bf16 %v1096_v0, %v1095_v61  ;;  %v1362_v21 = vmul.f32 %v5726_v52, %v1340_v13  ;;  %v5872_v10 = vsub.s32 %v1883_v30, %v7334_v3 }
 0x187   : > { %v4940_v37 = vpop.eup %4939  ;;  %v1081_v23 = vmul.f32 %v5703_v59, %v1065_v2 }
 0x188   : > { %v4942_v35 = vpop.eup %4941  ;;  %4829 = vmatprep.mubr.msk.bf16.mxu0 %vm715_vm0, %v1393_v45  ;;  %v1384_v55 = vadd.f32 %v5738_v51, %v1362_v21  ;;  %v1066_v25 = vmul.f32 %v4940_v37, %v5619_v63 }
 0x189   : > { %v1341_v58 = vmul.f32 %v4942_v35, %v5614_v39  ;;  %v1097_v38 = vadd.f32 %v5710_v31, %v1081_v23  ;;  %v5904_v23 = vld [vmem:[%s7245_s14] ss:$0 sm:$0xff] }
 0x18a   : > { %v1405_v57 = vpack.c.bf16 %v1384_v55, %v1383_v44  ;;  %v1082_v36 = vmul.f32 %v5703_v59, %v1066_v25  ;;  %v1711_v44 = vpop.permute.xlu0 %1710  ;;  %v5899_v55 = vld [vmem:[%s7244_s13] ss:$0 sm:$0xff] }
 0x18b   : > { %v4944_v24 = vpop.eup %4943  ;;  %v1363_v32 = vmul.f32 %v5726_v52, %v1341_v58 }
 0x18c   : > { %4809 = vmatprep.mubr.msk.bf16.mxu1 %vm1133_vm1, %v1405_v57  ;;  %v1098_v11 = vadd.f32 %v5710_v31, %v1082_v36  ;;  %v1342_v29 = vmul.f32 %v4944_v24, %v5629_v54  ;;  %v7333_v31 = vmov 0.0   ;;  %v2149_v54 = vrot.slane %v5680_v19, %v5639_v16 }
 0x18d   : > { %v1385_v39 = vadd.f32 %v5738_v51, %v1363_v32  ;;  %v1812_v57 = vmul.f32 %v5899_v55, %v1711_v44 }
 0x18e   : > { %v1394_v50 = vpack.c.bf16 %v1098_v11, %v1097_v38  ;;  %v1364_v63 = vmul.f32 %v5726_v52, %v1342_v29  ;;  %2151 = vbcast.lane.b32.xlu0 %v2149_v54, 256  ;;  %v2198_v52 = vrot.slane %v5691_v27, %v5636_v26  ;;  %v7337_v54 = vld [vmem:[#allocation5_spill] sm:$0xff] }
 0x190   : > { %4830 = vmatmul.mubr.msk.bf16.gmra.mxu0 %vm715_vm0, %v1394_v50  ;;  %v1386_v59 = vadd.f32 %v5738_v51, %v1364_v63  ;;  %2200 = vbcast.lane.b32.xlu1 %v2198_v52, 256  ;;  %v2156_v51 = vrot.slane %v5680_v19, %v5650_v9  ;;  %v1811_v52 = vmul.f32 %v5899_v55, %v7337_v54 }
 0x192   : > { %v1406_v17 = vpack.c.bf16 %v1386_v59, %v1385_v39  ;;  %2158 = vbcast.lane.b32.xlu0 %v2156_v51, 256  ;;  %v7336_v59 = vld [vmem:[#allocation6_spill] sm:$0xff] }
 0x194   : > { %4810 = vmatmul.mubr.msk.bf16.gmra.mxu1 %vm1133_vm1, %v1406_v17  ;;  %2207 = vbcast.lane.b32.xlu1 %v2205_v8, 256  ;;  %v1810_v17 = vmul.f32 %v5899_v55, %v7336_v59 }
 0x195   : > { %4837 = vmatprep.mubr.msk.bf16.mxu1 %vm5028_vm2, %v7333_v31  ;;  %vm4109_vm2 = vcmask 195680  }
 0x196   : > { %2165 = vbcast.lane.b32.xlu0 %v2163_v6, 256 }
 0x198   : > { %2214 = vbcast.lane.b32.xlu1 %v2212_v22, 256 }
 0x19a   : > { %2172 = vbcast.lane.b32.xlu0 %v2170_v40, 256 }
 0x19c   : > { %2221 = vbcast.lane.b32.xlu1 %v2219_v34, 256 }
 0x19e   : > { %2179 = vbcast.lane.b32.xlu0 %v2177_v1, 256 }
 0x1a0   : > { %2228 = vbcast.lane.b32.xlu1 %v2226_v4, 256 }
 0x1a4   : > { %2235 = vbcast.lane.b32.xlu1 %v2233_v43, 256 }
 0x213   : > { %v820_v20 = vpop.f32.mrf.mxu0 }
 0x214   : > { %v821_v56 = vadd.f32 %v4609_v46, %v820_v20 }
 0x215   : > { %v4793_v7 = vpop.f32.mrf.mxu0 }
 0x216   : > { %v1880_v19 = vcombine.high %v821_v56, %v821_v56  ;;  %v1887_v7 = vrot.slane %v821_v56, %v5872_v10 }
 0x217   : > { %v823_v48 = vpop.f32.mrf.mxu0 }
 0x218   : > { %v1894_v42 = vrot.slane %v1880_v19, %v5872_v10  ;;  %v824_v47 = vadd.f32 %v4609_v46, %v823_v48 }
 0x219   : > { %v4794_v27 = vpop.f32.mrf.mxu0 }
 0x21a   : > { %v1896_v53 = vcombine.high %v1894_v42, %v1894_v42  ;;  %v5876_v60 = vrot.slane %v1894_v42, %v5872_v10  ;;  %v1929_v33 = vcombine.high %v824_v47, %v824_v47  ;;  %v5879_v12 = vrot.slane %v824_v47, %v5872_v10 }
 0x21b   : > { %v1903_v47 = vrot.slane %v1887_v7, %v5872_v10 }
 0x21c   : > { %v5882_v61 = vrot.slane %v1896_v53, %v5872_v10  ;;  %v1943_v0 = vrot.slane %v1929_v33, %v5872_v10  ;;  %v1944_v13 = vcombine.high %v5879_v12, %v5879_v12 }
 0x21d   : > { %v1925_v53 = vcombine.high %v1903_v47, %v1903_v47 }
 0x21e   : > { %v1945_v15 = vcombine.high %v1943_v0, %v1943_v0  ;;  %v5888_v2 = vrot.slane %v1943_v0, %v5872_v10  ;;  %v5891_v45 = vrot.slane %v1944_v13, %v5872_v10 }
 0x220   : > { %v4819_v21 = vpop.f32.mrf.mxu0  ;;  %v5894_v37 = vrot.slane %v1945_v15, %v5872_v10  ;;  %v1895_v15 = vcombine.high %v1887_v7, %v1887_v7 }
 0x222   : > { %v1603_v35 = vpop.f32.mrf.mxu0 }
 0x224   : > { %v4820_v36 = vpop.f32.mrf.mxu0 }
 0x225   : > { %v4799_v25 = vpop.f32.mrf.mxu1 }
 0x226   : > { %v1612_v58 = vadd.f32 %v4819_v21, %v4799_v25  ;;  %v1606_v63 = vpop.f32.mrf.mxu0 }
 0x227   : > { %v1470_v24 = vpop.f32.mrf.mxu1 }
 0x228   : > { %v1675_v38 = vadd.f32 %v5904_v23, %v1612_v58  ;;  %v1604_v11 = vadd.f32 %v1603_v35, %v1470_v24  ;;  %v7340_v35 = vld [vmem:[#allocation4_spill] sm:$0xff]  ;;  %v1917_v58 = vrot.slane %v1895_v15, %v5872_v10 }
 0x229   : > { %v4800_v29 = vpop.f32.mrf.mxu1  ;;  %v5942_v44 = vrot.slane %v1925_v53, %v7340_v35 }
 0x22a   : > { %v1673_v32 = vadd.f32 %v5904_v23, %v1604_v11  ;;  %v5909_v50 = vadd.f32 %v1812_v57, %v1675_v38  ;;  %v5952_v24 = vrot.slane %v1917_v58, %v7340_v35 }
 0x22b   : > { %v1473_v39 = vpop.f32.mrf.mxu1 }
 0x22c   : > { %7335 = vst [vmem:[#allocation3_spill] sm:$0xff] %v5909_v50  ;;  %v1607_v14 = vadd.f32 %v1606_v63, %v1473_v39  ;;  %3166 = vrot.lane.b32.xlu0 %v5909_v50, %s5031_s29  ;;  %v5917_v51 = vadd.f32 %v1810_v17, %v1673_v32  ;;  %v2060_v25 = vmul.f32 %v5942_v44, %v5909_v50  ;;  %v1760_v32 = vpop.permute.xlu1 %1759  ;;  %v1718_v39 = vpop.permute.xlu0 %1717 }
 0x22d   : > { %v1615_v63 = vadd.f32 %v4820_v36, %v4800_v29  ;;  %v1813_v54 = vmul.f32 %v5899_v55, %v1718_v39  ;;  %v5971_v36 = vrot.slane %v5879_v12, %v5872_v10  ;;  %v5974_v29 = vrot.slane %v1903_v47, %v7340_v35 }
 0x22e   : > { %7338 = vst [vmem:[#allocation6_spill] sm:$0xff] %v5917_v51  ;;  %v1674_v8 = vadd.f32 %v5904_v23, %v1607_v14  ;;  %v2081_v57 = vsel %vm2074_vm6, %v2060_v25, 0.0 }
 0x22f   : > { %v1676_v14 = vadd.f32 %v5904_v23, %v1615_v63 }
 0x230   : > { %v5920_v6 = vadd.f32 %v1811_v52, %v1674_v8  ;;  %3162 = vrot.lane.b32.xlu0 %v5917_v51, %s5031_s29  ;;  %v5924_v22 = vpop.f32.mrf.mxu0  ;;  %v1767_v17 = vpop.permute.xlu1 %1766 }
 0x231   : > { %v1820_v8 = vmul.f32 %v5899_v55, %v1767_v17 }
 0x232   : > { %7339 = vst [vmem:[#allocation5_spill] sm:$0xff] %v5920_v6  ;;  %3164 = vrot.lane.b32.xlu1 %v5920_v6, %s5031_s29  ;;  %v1619_v40 = vpop.f32.mrf.mxu0  ;;  %v2059_v38 = vmul.f32 %v5952_v24, %v5920_v6 }
 0x234   : > { %v4824_v1 = vpop.f32.mrf.mxu0  ;;  %v2078_v11 = vsel %vm2074_vm6, %v2059_v38, 0.0 }
 0x235   : > { %v5928_v34 = vpop.f32.mrf.mxu1 }
 0x236   : > { %v1622_v30 = vpop.f32.mrf.mxu0 }
 0x237   : > { %v1486_v4 = vpop.f32.mrf.mxu1 }
 0x238   : > { %v1620_v43 = vadd.f32 %v1619_v40, %v1486_v4  ;;  %v5961_v40 = vadd.f32 %v1813_v54, %v1676_v14  ;;  %v1927_v4 = vcombine.high %v1917_v58, %v1917_v58 }
 0x239   : > { %v4804_v5 = vpop.f32.mrf.mxu1 }
 0x23a   : > { %v5931_v18 = vadd.f32 %v5904_v23, %v1620_v43  ;;  %v1631_v46 = vadd.f32 %v4824_v1, %v4804_v5  ;;  %7341 = vst [vmem:[#allocation4_spill] sm:$0xff] %v5961_v40  ;;  %v2058_v43 = vmul.f32 %v5974_v29, %v5917_v51  ;;  %v1974_v5 = vcombine.high %v5971_v36, %v5971_v36 }
 0x23b   : > { %v1489_v20 = vpop.f32.mrf.mxu1 }
 0x23c   : > { %v5935_v19 = vadd.f32 %v5904_v23, %v1631_v46  ;;  %v1623_v48 = vadd.f32 %v1622_v30, %v1489_v20  ;;  %v5981_v46 = vrot.slane %v1927_v4, %v7340_v35  ;;  %v2075_v30 = vsel %vm2074_vm6, %v2058_v43, 0.0 }
 0x23d   : > { %v5987_v10 = vrot.slane %v1974_v5, %v7340_v35 }
 0x23e   : > { %v5938_v42 = vadd.f32 %v5904_v23, %v1623_v48  ;;  %v2061_v20 = vmul.f32 %v5981_v46, %v5961_v40  ;;  %v1725_v48 = vpop.permute.xlu0 %1724 }
 0x23f   : > { %v1814_v54 = vmul.f32 %v5899_v55, %v1725_v48 }
 0x240   : > { %v4827_v27 = vpop.f32.mrf.mxu0  ;;  %v2084_v7 = vsel %vm2074_vm6, %v2061_v20, 0.0 }
 0x242   : > { %v1635_v0 = vpop.f32.mrf.mxu0 }
 0x244   : > { %v4807_v33 = vpop.f32.mrf.mxu1 }
 0x245   : > { %v1644_v59 = vadd.f32 %v4827_v27, %v4807_v33  ;;  %v5993_v27 = vpop.permute.xlu0 %1731  ;;  %v4828_v33 = vpop.f32.mrf.mxu0 }
 0x246   : > { %v1502_v13 = vpop.f32.mrf.mxu1 }
 0x247   : > { %v1636_v21 = vadd.f32 %v1635_v0, %v1502_v13  ;;  %v1683_v52 = vadd.f32 %v5904_v23, %v1644_v59  ;;  %v1774_v13 = vpop.permute.xlu1 %1773  ;;  %v1638_v58 = vpop.f32.mrf.mxu0  ;;  %v1819_v59 = vmul.f32 %v5899_v55, %v1760_v32  ;;  %v1926_v32 = vcombine.high %v5876_v60, %v5876_v60 }
 0x248   : > { %v4808_v53 = vpop.f32.mrf.mxu1  ;;  %v1821_v38 = vmul.f32 %v5899_v55, %v1774_v13 }
 0x249   : > { %v5945_v56 = vadd.f32 %v5904_v23, %v1636_v21  ;;  %v5963_v1 = vadd.f32 %v1820_v8, %v1683_v52  ;;  %v1647_v0 = vadd.f32 %v4828_v33, %v4808_v53  ;;  %v1628_v21 = vadd.f32 %v5924_v22, %v5928_v34  ;;  %v1739_v25 = vpop.permute.xlu0 %1738 }
 0x24a   : > { %v1505_v15 = vpop.f32.mrf.mxu1  ;;  %v1816_v39 = vmul.f32 %v5899_v55, %v1739_v25  ;;  %v6015_v52 = vadd.f32 %v1814_v54, %v5931_v18  ;;  %v1976_v8 = vcombine.high %v5891_v45, %v5891_v45  ;;  %v6026_v4 = vrot.slane %v1926_v32, %v7340_v35 }
 0x24b   : > { %7342 = vst [vmem:[#allocation8_spill] sm:$0xff] %v5963_v1  ;;  %v2068_v12 = vmul.f32 %v5987_v10, %v5963_v1  ;;  %v1679_v63 = vadd.f32 %v5904_v23, %v1628_v21 }
 0x24c   : > { %7346 = vst [vmem:[#allocation12_spill] sm:$0xff] %v6015_v52  ;;  %v6031_v18 = vrot.slane %v1976_v8, %v7340_v35 }
 0x24d   : > { %v2105_v47 = vsel %vm2074_vm6, %v2068_v12, 0.0  ;;  %v6006_v22 = vadd.f32 %v1816_v39, %v1679_v63  ;;  %v1746_v13 = vpop.permute.xlu0 %1745 }
 0x24f   : > { %2082 = vadd.xlane.f32.xlu0 %v2081_v57  ;;  %v1684_v57 = vadd.f32 %v5904_v23, %v1647_v0  ;;  %7344 = vst [vmem:[#allocation10_spill] sm:$0xff] %v6006_v22  ;;  %v2064_v43 = vmul.f32 %v6026_v4, %v6006_v22 }
 0x251   : > { %v6002_v17 = vadd.f32 %v1821_v38, %v1684_v57  ;;  %v2093_v20 = vsel %vm2074_vm6, %v2064_v43, 0.0  ;;  %v1817_v57 = vmul.f32 %v5899_v55, %v1746_v13  ;;  %v5032_v13 = vmov 0  }
 0x252   : > { %4859 = vset.pattern.permute.xlu1 %v5032_v13  ;;  %4860 = vset.pattern.permute.xlu0 %v5032_v13  ;;  %v7352_v13 = vld [vmem:[#allocation7_spill] sm:$0xff] }
 0x253   : > { %7343 = vst [vmem:[#allocation9_spill] sm:$0xff] %v6002_v17  ;;  %v2069_v5 = vmul.f32 %v6031_v18, %v6002_v17  ;;  %v6047_v39 = vadd.f32 %v1817_v57, %v5935_v19  ;;  %v1975_v19 = vcombine.high %v5888_v2, %v5888_v2 }
 0x254   : > { %v4811_v48 = vpop.f32.mrf.mxu1 }
 0x255   : > { %v2108_v12 = vsel %vm2074_vm6, %v2069_v5, 0.0  ;;  %7348 = vst [vmem:[#allocation14_spill] sm:$0xff] %v6047_v39  ;;  %v6067_v8 = vrot.slane %v1975_v19, %v7340_v35 }
 0x256   : > { %2079 = vadd.xlane.f32.xlu1 %v2078_v11  ;;  %v1639_v11 = vadd.f32 %v1638_v58, %v1505_v15  ;;  %v1518_v0 = vpop.f32.mrf.mxu1 }
 0x258   : > { %v1682_v14 = vadd.f32 %v5904_v23, %v1639_v11 }
 0x25a   : > { %v6010_v34 = vadd.f32 %v1819_v59, %v1682_v14  ;;  %v6059_v14 = vrot.slane %v5876_v60, %v7340_v35  ;;  %v4812_v60 = vpop.f32.mrf.mxu1 }
 0x25c   : > { %7345 = vst [vmem:[#allocation11_spill] sm:$0xff] %v6010_v34  ;;  %v2062_v54 = vmul.f32 %v6059_v14, %v6015_v52 }
 0x25e   : > { %v2087_v32 = vsel %vm2074_vm6, %v2062_v54, 0.0 }
 0x265   : > { %3168 = vrot.lane.b32.xlu0 %v5961_v40, %s5031_s29 }
 0x267   : > { %3182 = vrot.lane.b32.xlu1 %v5963_v1, %s5031_s29 }
 0x284   : > { %2076 = vadd.xlane.f32.xlu0 %v2075_v30  ;;  %v1781_v30 = vpop.permute.xlu1 %1780 }
 0x285   : > { %v1822_v38 = vmul.f32 %v5899_v55, %v1781_v30 }
 0x288   : > { %2085 = vadd.xlane.f32.xlu0 %v2084_v7  ;;  %v6037_v7 = vpop.permute.xlu1 %1787 }
 0x28b   : > { %2106 = vadd.xlane.f32.xlu1 %v2105_v47  ;;  %v4831_v47 = vpop.f32.mrf.mxu0 }
 0x28c   : > { %v1660_v53 = vadd.f32 %v4831_v47, %v4811_v48  ;;  %v1795_v33 = vpop.permute.xlu1 %1794  ;;  %v1815_v48 = vmul.f32 %v5899_v55, %v5993_v27  ;;  %v1928_v27 = vcombine.high %v5882_v61, %v5882_v61 }
 0x28d   : > { %v1651_v15 = vpop.f32.mrf.mxu0  ;;  %v1824_v25 = vmul.f32 %v5899_v55, %v1795_v33 }
 0x28e   : > { %v1687_v21 = vadd.f32 %v5904_v23, %v1660_v53  ;;  %v1652_v58 = vadd.f32 %v1651_v15, %v1518_v0  ;;  %v6077_v33 = vadd.f32 %v1815_v48, %v5938_v42  ;;  %v6088_v15 = vrot.slane %v1928_v27, %v7340_v35 }
 0x28f   : > { %v4832_v30 = vpop.f32.mrf.mxu0  ;;  %v1823_v48 = vmul.f32 %v5899_v55, %v6037_v7  ;;  %v1818_v27 = vmul.f32 %v5899_v55, %v7352_v13 }
 0x290   : > { %v6043_v11 = vadd.f32 %v1824_v25, %v1687_v21  ;;  %v1685_v63 = vadd.f32 %v5904_v23, %v1652_v58  ;;  %7350 = vst [vmem:[#allocation16_spill] sm:$0xff] %v6077_v33  ;;  %v2065_v42 = vmul.f32 %v6088_v15, %v6047_v39  ;;  %v6094_v21 = vrot.slane %v5882_v61, %v7340_v35 }
 0x292   : > { %7347 = vst [vmem:[#allocation13_spill] sm:$0xff] %v6043_v11  ;;  %v6051_v59 = vadd.f32 %v1822_v38, %v1685_v63  ;;  %v2072_v43 = vmul.f32 %v6067_v8, %v6043_v11  ;;  %v2096_v58 = vsel %vm2074_vm6, %v2065_v42, 0.0  ;;  %v2063_v57 = vmul.f32 %v6094_v21, %v6077_v33  ;;  %v6105_v63 = vpop.permute.xlu0 %2130 }
 0x293   : > { %v6103_v38 = vrot.slane %v5888_v2, %v7340_v35  ;;  %v1654_v2 = vpop.f32.mrf.mxu0 }
 0x294   : > { %7349 = vst [vmem:[#allocation15_spill] sm:$0xff] %v6051_v59  ;;  %v2117_v5 = vsel %vm2074_vm6, %v2072_v43, 0.0  ;;  %v2090_v61 = vsel %vm2074_vm6, %v2063_v57, 0.0  ;;  %v6133_v57 = vadd.f32 %v1818_v27, %v5945_v56 }
 0x295   : > { %v2070_v54 = vmul.f32 %v6103_v38, %v6051_v59 }
 0x296   : > { %v6113_v43 = vpop.permute.xlu0 %2144  ;;  %7354 = vst [vmem:[#allocation18_spill] sm:$0xff] %v6133_v57 }
 0x29c   : > { %3184 = vrot.lane.b32.xlu1 %v6002_v17, %s5031_s29 }
 0x29e   : > { %3174 = vrot.lane.b32.xlu0 %v6006_v22, %s5031_s29  ;;  %v2017_v22 = vrot.slane %v5891_v45, %v7340_v35 }
 0x2a0   : > { %3180 = vrot.lane.b32.xlu1 %v6010_v34, %s5031_s29  ;;  %v2067_v40 = vmul.f32 %v2017_v22, %v6010_v34 }
 0x2a2   : > { %3170 = vrot.lane.b32.xlu0 %v6015_v52, %s5031_s29  ;;  %v2102_v45 = vsel %vm2074_vm6, %v2067_v40, 0.0 }
 0x2c1   : > { %2094 = vadd.xlane.f32.xlu0 %v2093_v20  ;;  %v1663_v20 = vadd.f32 %v4832_v30, %v4812_v60  ;;  %v1521_v60 = vpop.f32.mrf.mxu1 }
 0x2c2   : > { %v1655_v30 = vadd.f32 %v1654_v2, %v1521_v60  ;;  %v1977_v2 = vcombine.high %v5894_v37, %v5894_v37 }
 0x2c3   : > { %v1688_v47 = vadd.f32 %v5904_v23, %v1663_v20  ;;  %v6117_v20 = vpop.permute.xlu0 %2151 }
 0x2c4   : > { %2109 = vadd.xlane.f32.xlu1 %v2108_v12  ;;  %v1802_v12 = vpop.permute.xlu1 %1801  ;;  %v2041_v27 = vrot.slane %v1977_v2, %v7340_v35 }
 0x2c5   : > { %v1825_v53 = vmul.f32 %v5899_v55, %v1802_v12 }
 0x2c7   : > { %v6079_v0 = vadd.f32 %v1825_v53, %v1688_v47  ;;  %v1686_v47 = vadd.f32 %v5904_v23, %v1655_v30  ;;  %v6124_v53 = vpop.permute.xlu0 %2158 }
 0x2c8   : > { %v6096_v25 = vpop.permute.xlu1 %2137 }
 0x2c9   : > { %7351 = vst [vmem:[#allocation17_spill] sm:$0xff] %v6079_v0  ;;  %v6128_v42 = vadd.f32 %v1823_v48, %v1686_v47  ;;  %v6157_v48 = vrot.slane %v5971_v36, %v7340_v35  ;;  %v6171_v36 = vrot.slane %v5894_v37, %v7340_v35 }
 0x2cb   : > { %7353 = vst [vmem:[#allocation7_spill] sm:$0xff] %v6128_v42  ;;  %v2066_v13 = vmul.f32 %v6157_v48, %v6133_v57  ;;  %v2071_v2 = vmul.f32 %v6171_v36, %v6128_v42 }
 0x2cc   : > { %v6110_v19 = vpop.permute.xlu1 %2186 }
 0x2cd   : > { %v2099_v52 = vsel %vm2074_vm6, %v2066_v13, 0.0  ;;  %v2114_v13 = vsel %vm2074_vm6, %v2071_v2, 0.0 }
 0x2d5   : > { %3190 = vrot.lane.b32.xlu1 %v6043_v11, %s5031_s29 }
 0x2d7   : > { %3176 = vrot.lane.b32.xlu0 %v6047_v39, %s5031_s29 }
 0x2d9   : > { %3186 = vrot.lane.b32.xlu1 %v6051_v59, %s5031_s29 }
 0x2f6   : > { %2088 = vadd.xlane.f32.xlu0 %v2087_v32  ;;  %v2111_v32 = vsel %vm2074_vm6, %v2070_v54, 0.0  ;;  %v6137_v54 = vpop.permute.xlu0 %2165 }
 0x2fa   : > { %v6143_v7 = vpop.permute.xlu0 %2172 }
 0x2fd   : > { %2118 = vadd.xlane.f32.xlu1 %v2117_v5  ;;  %v6115_v5 = vpop.permute.xlu1 %2193 }
 0x301   : > { %v6119_v12 = vpop.permute.xlu1 %2200 }
 0x30c   : > { %3172 = vrot.lane.b32.xlu0 %v6077_v33, %s5031_s29  ;;  %v2073_v33 = vmul.f32 %v2041_v27, %v6079_v0 }
 0x30e   : > { %3192 = vrot.lane.b32.xlu1 %v6079_v0, %s5031_s29  ;;  %v2120_v31 = vsel %vm2074_vm6, %v2073_v33, 0.0 }
 0x32b   : > { %2097 = vadd.xlane.f32.xlu0 %v2096_v58  ;;  %v6130_v58 = vpop.permute.xlu1 %2207 }
 0x32f   : > { %2091 = vadd.xlane.f32.xlu0 %v2090_v61  ;;  %v6141_v23 = vpop.permute.xlu1 %2214  ;;  %v6147_v61 = vpop.permute.xlu0 %2179 }
 0x332   : > { %2112 = vadd.xlane.f32.xlu1 %v2111_v32 }
 0x333   : > { %v6145_v55 = vpop.permute.xlu1 %2221  ;;  %v3167_v56 = vpop.permute.xlu0 %3166 }
 0x337   : > { %v6149_v32 = vpop.permute.xlu1 %2228  ;;  %v3163_v30 = vpop.permute.xlu0 %3162 }
 0x338   : > { %v3210_v2 = vmul.f32 %v3163_v30, %v5974_v29 }
 0x33b   : > { %v6151_v60 = vpop.permute.xlu1 %2235  ;;  %v2083_v39 = vpop.xlane.xlu0 %2082 }
 0x33f   : > { %v3165_v47 = vpop.permute.xlu1 %3164  ;;  %v3169_v59 = vpop.permute.xlu0 %3168 }
 0x340   : > { %v3211_v33 = vmul.f32 %v3165_v47, %v5952_v24  ;;  %v3213_v24 = vmul.f32 %v3169_v59, %v5981_v46  ;;  %v6209_v59 = vadd.f32 %v6113_v43, %v2083_v39 }
 0x343   : > { %3188 = vrot.lane.b32.xlu1 %v6128_v42, %s5031_s29  ;;  %v6165_v11 = vpop.xlane.xlu1 %2079  ;;  %v2077_v50 = vpop.xlane.xlu0 %2076 }
 0x345   : > { %3178 = vrot.lane.b32.xlu0 %v6133_v57, %s5031_s29  ;;  %v3212_v57 = vmul.f32 %v3167_v56, %v5942_v44 }
 0x347   : > { %v3183_v0 = vpop.permute.xlu1 %3182  ;;  %v2086_v17 = vpop.xlane.xlu0 %2085 }
 0x348   : > { %v3220_v40 = vmul.f32 %v3183_v0, %v5987_v10 }
 0x34b   : > { %v3175_v37 = vpop.permute.xlu0 %3174 }
 0x34c   : > { %v3216_v0 = vmul.f32 %v3175_v37, %v6026_v4 }
 0x364   : > { %2100 = vadd.xlane.f32.xlu0 %v2099_v52  ;;  %v2107_v52 = vpop.xlane.xlu1 %2106 }
 0x367   : > { %2121 = vadd.xlane.f32.xlu1 %v2120_v31  ;;  %v3171_v31 = vpop.permute.xlu0 %3170 }
 0x368   : > { %2103 = vadd.xlane.f32.xlu0 %v2102_v45  ;;  %v3185_v34 = vpop.permute.xlu1 %3184 }
 0x36b   : > { %2115 = vadd.xlane.f32.xlu1 %v2114_v13  ;;  %v6187_v45 = vpop.xlane.xlu0 %2094  ;;  %v3221_v13 = vmul.f32 %v3185_v34, %v6031_v18  ;;  %v3214_v18 = vmul.f32 %v3171_v31, %v6059_v14  ;;  %v6224_v31 = vadd.f32 %v6105_v63, %v2077_v50 }
 0x36c   : > { %v3181_v1 = vpop.permute.xlu1 %3180 }
 0x36d   : > { %v3219_v56 = vmul.f32 %v3181_v1, %v2017_v22 }
 0x36f   : > { %v3177_v10 = vpop.permute.xlu0 %3176 }
 0x370   : > { %v6181_v42 = vpop.xlane.xlu1 %2109  ;;  %v3217_v22 = vmul.f32 %v3177_v10, %v6088_v15 }
 0x374   : > { %v3191_v44 = vpop.permute.xlu1 %3190 }
 0x378   : > { %v3187_v29 = vpop.permute.xlu1 %3186 }
 0x379   : > { %v3222_v1 = vmul.f32 %v3187_v29, %v6103_v38 }
 0x37c   : > { %3244 = vrot.lane.b32.xlu1 %v3211_v33, %s5031_s29 }
 0x37e   : > { %3246 = vrot.lane.b32.xlu0 %v3212_v57, %s5031_s29  ;;  %v3224_v57 = vmul.f32 %v3191_v44, %v6067_v8 }
 0x37f   : > { %v6198_v34 = vpop.xlane.xlu0 %2088 }
 0x380   : > { %3262 = vrot.lane.b32.xlu1 %v3220_v40, %s5031_s29  ;;  %v6232_v40 = vadd.f32 %v6119_v12, %v2107_v52 }
 0x382   : > { %3242 = vrot.lane.b32.xlu0 %v3210_v2, %s5031_s29 }
 0x383   : > { %v3173_v4 = vpop.permute.xlu0 %3172 }
 0x384   : > { %3264 = vrot.lane.b32.xlu1 %v3221_v13, %s5031_s29  ;;  %v3215_v14 = vmul.f32 %v3173_v4, %v6094_v21 }
 0x386   : > { %3248 = vrot.lane.b32.xlu0 %v3213_v24, %s5031_s29  ;;  %v6202_v46 = vpop.xlane.xlu1 %2118 }
 0x388   : > { %3260 = vrot.lane.b32.xlu1 %v3219_v56, %s5031_s29 }
 0x38a   : > { %3254 = vrot.lane.b32.xlu0 %v3216_v0, %s5031_s29  ;;  %v3193_v8 = vpop.permute.xlu1 %3192 }
 0x38b   : > { %v3225_v30 = vmul.f32 %v3193_v8, %v2041_v27  ;;  %v6229_v27 = vadd.f32 %v6117_v20, %v2086_v17 }
 0x38c   : > { %3270 = vrot.lane.b32.xlu1 %v3224_v57, %s5031_s29 }
 0x38e   : > { %3250 = vrot.lane.b32.xlu0 %v3214_v18, %s5031_s29 }
 0x390   : > { %3266 = vrot.lane.b32.xlu1 %v3222_v1, %s5031_s29 }
 0x392   : > { %3256 = vrot.lane.b32.xlu0 %v3217_v22, %s5031_s29 }
 0x394   : > { %2292 = vperm.xlu1 %4859, %v6209_v59  }
 0x396   : > { %3252 = vrot.lane.b32.xlu0 %v3215_v14, %s5031_s29 }
 0x398   : > { %3272 = vrot.lane.b32.xlu1 %v3225_v30, %s5031_s29 }
 0x3b4   : > { %v6216_v38 = vpop.xlane.xlu0 %2097 }
 0x3b8   : > { %v6218_v15 = vpop.xlane.xlu0 %2091 }
 0x3bb   : > { %v2113_v47 = vpop.xlane.xlu1 %2112 }
 0x3bc   : > { %v3179_v37 = vpop.permute.xlu0 %3178 }
 0x3bd   : > { %v3218_v39 = vmul.f32 %v3179_v37, %v6157_v48  ;;  %v6238_v48 = vadd.f32 %v6096_v25, %v6165_v11 }
 0x3bf   : > { %v3189_v33 = vpop.permute.xlu1 %3188  ;;  %3258 = vrot.lane.b32.xlu0 %v3218_v39, %s5031_s29  ;;  %v6261_v39 = vadd.f32 %v6124_v53, %v6198_v34  ;;  %v6272_v34 = vadd.f32 %v6141_v23, %v2113_v47 }
 0x3c0   : > { %v3223_v21 = vmul.f32 %v3189_v33, %v6171_v36 }
 0x3c2   : > { %3268 = vrot.lane.b32.xlu1 %v3223_v21, %s5031_s29 }
 0x3c3   : > { %2286 = vperm.xlu0 %4860, %v6224_v31  }
 0x3c6   : > { %2295 = vperm.xlu1 %4859, %v6229_v27  }
 0x3c7   : > { %2316 = vperm.xlu0 %4860, %v6232_v40  }
 0x3ca   : > { %2289 = vperm.xlu1 %4859, %v6238_v48  }
 0x3ed   : > { %v2101_v50 = vpop.xlane.xlu0 %2100 }
 0x3ee   : > { %v6242_v36 = vadd.f32 %v6110_v19, %v2101_v50 }
 0x3f0   : > { %2310 = vperm.xlu1 %4859, %v6242_v36   ;;  %v6249_v2 = vpop.xlane.xlu1 %2121 }
 0x3f1   : > { %v2104_v17 = vpop.xlane.xlu0 %2103 }
 0x3f2   : > { %v6246_v52 = vadd.f32 %v6115_v5, %v2104_v17 }
 0x3f4   : > { %2313 = vperm.xlu0 %4860, %v6246_v52   ;;  %v2116_v44 = vpop.xlane.xlu1 %2115 }
 0x3f5   : > { %v3247_v13 = vpop.permute.xlu0 %3246 }
 0x3f6   : > { %v3296_v10 = vsel %vm2074_vm6, %v3247_v13, 0.0 }
 0x3f8   : > { %v3245_v24 = vpop.permute.xlu1 %3244 }
 0x3f9   : > { %v3243_v11 = vpop.permute.xlu0 %3242  ;;  %v3293_v0 = vsel %vm2074_vm6, %v3245_v24, 0.0  ;;  %v6268_v24 = vadd.f32 %v6130_v58, %v6181_v42  ;;  %v6283_v42 = vadd.f32 %v6149_v32, %v6202_v46  ;;  %v6294_v46 = vadd.f32 %v6137_v54, %v6218_v15 }
 0x3fa   : > { %v3290_v18 = vsel %vm2074_vm6, %v3243_v11, 0.0 }
 0x3fc   : > { %v3263_v29 = vpop.permute.xlu1 %3262 }
 0x3fd   : > { %v3249_v56 = vpop.permute.xlu0 %3248  ;;  %v3320_v1 = vsel %vm2074_vm6, %v3263_v29, 0.0  ;;  %v6277_v29 = vadd.f32 %v6145_v55, %v2116_v44 }
 0x3fe   : > { %v3299_v22 = vsel %vm2074_vm6, %v3249_v56, 0.0 }
 0x400   : > { %v3265_v13 = vpop.permute.xlu1 %3264 }
 0x401   : > { %v3255_v57 = vpop.permute.xlu0 %3254 }
 0x402   : > { %v3308_v8 = vsel %vm2074_vm6, %v3255_v57, 0.0 }
 0x404   : > { %v3261_v11 = vpop.permute.xlu1 %3260 }
 0x405   : > { %v3251_v4 = vpop.permute.xlu0 %3250  ;;  %v3317_v57 = vsel %vm2074_vm6, %v3261_v11, 0.0 }
 0x406   : > { %v3302_v30 = vsel %vm2074_vm6, %v3251_v4, 0.0 }
 0x408   : > { %v3271_v56 = vpop.permute.xlu1 %3270 }
 0x409   : > { %v3257_v14 = vpop.permute.xlu0 %3256 }
 0x40a   : > { %v3311_v37 = vsel %vm2074_vm6, %v3257_v14, 0.0  ;;  %v6299_v14 = vadd.f32 %v6143_v7, %v6187_v45 }
 0x40d   : > { %v3253_v33 = vpop.permute.xlu0 %3252 }
 0x40e   : > { %v3305_v21 = vsel %vm2074_vm6, %v3253_v33, 0.0 }
 0x413   : > { %3297 = vadd.xlane.f32.xlu0 %v3296_v10  ;;  %v3323_v10 = vsel %vm2074_vm6, %v3265_v13, 0.0 }
 0x414   : > { %3294 = vadd.xlane.f32.xlu1 %v3293_v0  ;;  %v3267_v0 = vpop.permute.xlu1 %3266 }
 0x417   : > { %3291 = vadd.xlane.f32.xlu0 %v3290_v18  ;;  %v3332_v18 = vsel %vm2074_vm6, %v3271_v56, 0.0 }
 0x418   : > { %3321 = vadd.xlane.f32.xlu1 %v3320_v1  ;;  %v6285_v47 = vpop.permute.xlu1 %2292  ;;  %v3326_v1 = vsel %vm2074_vm6, %v3267_v0, 0.0 }
 0x41b   : > { %3300 = vadd.xlane.f32.xlu0 %v3299_v22 }
 0x41c   : > { %v3273_v44 = vpop.permute.xlu1 %3272 }
 0x41d   : > { %v3335_v22 = vsel %vm2074_vm6, %v3273_v44, 0.0 }
 0x41f   : > { %3309 = vadd.xlane.f32.xlu0 %v3308_v8 }
 0x423   : > { %3303 = vadd.xlane.f32.xlu0 %v3302_v30 }
 0x427   : > { %3312 = vadd.xlane.f32.xlu0 %v3311_v37 }
 0x429   : > { %2298 = vperm.xlu1 %4859, %v6261_v39  }
 0x42b   : > { %3306 = vadd.xlane.f32.xlu0 %v3305_v21 }
 0x431   : > { %v3259_v50 = vpop.permute.xlu0 %3258 }
 0x432   : > { %v3314_v17 = vsel %vm2074_vm6, %v3259_v50, 0.0 }
 0x433   : > { %3315 = vadd.xlane.f32.xlu0 %v3314_v17 }
 0x434   : > { %v3269_v4 = vpop.permute.xlu1 %3268 }
 0x435   : > { %v3329_v8 = vsel %vm2074_vm6, %v3269_v4, 0.0 }
 0x43e   : > { %v6302_v30 = vpop.permute.xlu0 %2286 }
 0x441   : > { %v6304_v37 = vpop.permute.xlu1 %2295 }
 0x442   : > { %v6306_v33 = vpop.permute.xlu0 %2316 }
 0x445   : > { %v6308_v21 = vpop.permute.xlu1 %2289 }
 0x449   : > { %2319 = vperm.xlu0 %4860, %v6268_v24  }
 0x44d   : > { %3324 = vadd.xlane.f32.xlu1 %v3323_v10  ;;  %2322 = vperm.xlu0 %4860, %v6272_v34  }
 0x451   : > { %3318 = vadd.xlane.f32.xlu1 %v3317_v57  ;;  %2325 = vperm.xlu0 %4860, %v6277_v29  }
 0x455   : > { %3333 = vadd.xlane.f32.xlu1 %v3332_v18  ;;  %2328 = vperm.xlu0 %4860, %v6283_v42   ;;  %v6335_v18 = vadd.f32 %v6151_v60, %v6249_v2 }
 0x459   : > { %3327 = vadd.xlane.f32.xlu1 %v3326_v1 }
 0x45d   : > { %3336 = vadd.xlane.f32.xlu1 %v3335_v22 }
 0x461   : > { %3330 = vadd.xlane.f32.xlu1 %v3329_v8 }
 0x46b   : > { %v6312_v15 = vpop.permute.xlu1 %2310 }
 0x46f   : > { %v6310_v50 = vpop.permute.xlu0 %2313 }
 0x472   : > { %2301 = vperm.xlu1 %4859, %v6294_v46  }
 0x476   : > { %2304 = vperm.xlu1 %4859, %v6299_v14  }
 0x49c   : > { %v3298_v17 = vpop.xlane.xlu0 %3297 }
 0x49d   : > { %v6315_v13 = vadd.f32 %v3298_v17, %v6113_v43  ;;  %v3295_v45 = vpop.xlane.xlu1 %3294 }
 0x49e   : > { %v6318_v11 = vadd.f32 %v3295_v45, %v6096_v25 }
 0x49f   : > { %3377 = vperm.xlu1 %4859, %v6315_v13  }
 0x4a0   : > { %3374 = vperm.xlu0 %4860, %v6318_v11   ;;  %v3292_v56 = vpop.xlane.xlu0 %3291 }
 0x4a1   : > { %v6323_v10 = vadd.f32 %v3292_v56, %v6105_v63  ;;  %v3322_v0 = vpop.xlane.xlu1 %3321 }
 0x4a2   : > { %v6326_v57 = vadd.f32 %v3322_v0, %v6119_v12 }
 0x4a3   : > { %3371 = vperm.xlu1 %4859, %v6323_v10  }
 0x4a4   : > { %3401 = vperm.xlu0 %4860, %v6326_v57   ;;  %v3301_v43 = vpop.xlane.xlu0 %3300 }
 0x4a5   : > { %v6331_v25 = vadd.f32 %v3301_v43, %v6117_v20 }
 0x4a7   : > { %3380 = vperm.xlu1 %4859, %v6331_v25  }
 0x4a8   : > { %2331 = vperm.xlu0 %4860, %v6335_v18   ;;  %v3310_v63 = vpop.xlane.xlu0 %3309 }
 0x4a9   : > { %v6340_v12 = vadd.f32 %v3310_v63, %v6143_v7  ;;  %v6357_v7 = vadd.f32 %v6147_v61, %v6216_v38 }
 0x4ab   : > { %3389 = vperm.xlu1 %4859, %v6340_v12  }
 0x4ac   : > { %v3304_v1 = vpop.xlane.xlu0 %3303 }
 0x4ad   : > { %v6344_v44 = vadd.f32 %v3304_v1, %v6124_v53 }
 0x4af   : > { %3383 = vperm.xlu1 %4859, %v6344_v44  }
 0x4b0   : > { %v3313_v20 = vpop.xlane.xlu0 %3312 }
 0x4b1   : > { %v6361_v53 = vadd.f32 %v3313_v20, %v6147_v61 }
 0x4b3   : > { %7355 = vst [vmem:[#allocation19_spill] sm:$0xff] %v6361_v53 }
 0x4b4   : > { %v3307_v22 = vpop.xlane.xlu0 %3306 }
 0x4b5   : > { %v6348_v2 = vadd.f32 %v3307_v22, %v6137_v54  ;;  %v6364_v54 = vpop.permute.xlu1 %2298 }
 0x4b7   : > { %3386 = vperm.xlu1 %4859, %v6348_v2  }
 0x4bc   : > { %v3316_v4 = vpop.xlane.xlu0 %3315 }
 0x4bd   : > { %v6352_v8 = vadd.f32 %v3316_v4, %v6110_v19 }
 0x4bf   : > { %3395 = vperm.xlu1 %4859, %v6352_v8  }
 0x4c3   : > { %2307 = vperm.xlu1 %4859, %v6357_v7  }
 0x4c7   : > { %3392 = vperm.xlu1 %4859, %v6361_v53  }
 0x4d6   : > { %v3325_v17 = vpop.xlane.xlu1 %3324 }
 0x4d7   : > { %v6367_v45 = vadd.f32 %v3325_v17, %v6130_v58 }
 0x4d9   : > { %3404 = vperm.xlu0 %4860, %v6367_v45  }
 0x4da   : > { %v3319_v19 = vpop.xlane.xlu1 %3318 }
 0x4db   : > { %v6371_v56 = vadd.f32 %v3319_v19, %v6115_v5 }
 0x4dd   : > { %3398 = vperm.xlu0 %4860, %v6371_v56  }
 0x4de   : > { %v3334_v38 = vpop.xlane.xlu1 %3333 }
 0x4df   : > { %v6375_v61 = vadd.f32 %v3334_v38, %v6149_v32  ;;  %v2320_v32 = vpop.permute.xlu0 %2319 }
 0x4e1   : > { %7356 = vst [vmem:[#allocation20_spill] sm:$0xff] %v6375_v61  ;;  %3413 = vperm.xlu0 %4860, %v6375_v61  }
 0x4e2   : > { %v3328_v0 = vpop.xlane.xlu1 %3327 }
 0x4e3   : > { %v6379_v43 = vadd.f32 %v3328_v0, %v6141_v23  ;;  %v2323_v20 = vpop.permute.xlu0 %2322  ;;  %v7359_v23 = vlaneseq }
 0x4e5   : > { %3407 = vperm.xlu0 %4860, %v6379_v43   ;;  %v2334_v17 = vand.u32 127, %v7359_v23 }
 0x4e6   : > { %v3337_v58 = vpop.xlane.xlu1 %3336 }
 0x4e7   : > { %v6387_v5 = vadd.f32 %v3337_v58, %v6151_v60  ;;  %v2326_v4 = vpop.permute.xlu0 %2325  ;;  %v6394_v0 = vsub.s32 %v2334_v17, %v7334_v3 }
 0x4e9   : > { %7358 = vst [vmem:[#allocation22_spill] sm:$0xff] %v6387_v5  ;;  %v2370_v58 = vrot.slane %v6312_v15, %v6394_v0  ;;  %v2382_v51 = vrot.slane %v2320_v32, %v6394_v0  ;;  %v2378_v23 = vrot.slane %v6306_v33, %v6394_v0 }
 0x4ea   : > { %v3331_v63 = vpop.xlane.xlu1 %3330 }
 0x4eb   : > { %v6383_v1 = vadd.f32 %v3331_v63, %v6145_v55  ;;  %v2329_v38 = vpop.permute.xlu0 %2328  ;;  %v2374_v55 = vrot.slane %v6310_v50, %v6394_v0  ;;  %v2390_v50 = vrot.slane %v2326_v4, %v6394_v0 }
 0x4ec   : > { %v2394_v15 = vrot.slane %v2329_v38, %v6394_v0 }
 0x4ed   : > { %7357 = vst [vmem:[#allocation21_spill] sm:$0xff] %v6383_v1  ;;  %3410 = vperm.xlu0 %4860, %v6383_v1   ;;  %v2413_v6 = vsel %vm2399_vm7, %v2374_v55, %v2370_v58 }
 0x4ee   : > { %v2302_v22 = vpop.permute.xlu1 %2301  ;;  %v2414_v61 = vsel %vm2401_vm8, %v2378_v23, %v2413_v6 }
 0x4ef   : > { %v2415_v32 = vsel %vm2403_vm9, %v2382_v51, %v2414_v61  ;;  %v2342_v51 = vrot.slane %v6308_v21, %v6394_v0  ;;  %v2338_v61 = vrot.slane %v6302_v30, %v6394_v0  ;;  %v2350_v21 = vrot.slane %v6304_v37, %v6394_v0 }
 0x4f0   : > { %v2358_v30 = vrot.slane %v2302_v22, %v6394_v0 }
 0x4f1   : > { %3416 = vperm.xlu0 %4860, %v6387_v5   ;;  %v2386_v5 = vrot.slane %v2323_v20, %v6394_v0 }
 0x4f2   : > { %v6391_v19 = vpop.permute.xlu1 %2304 }
 0x4f3   : > { %v2416_v33 = vsel %vm2405_vm11, %v2386_v5, %v2415_v32 }
 0x4f4   : > { %v2417_v20 = vsel %vm2407_vm10, %v2390_v50, %v2416_v33  ;;  %v2400_v50 = vsel %vm2399_vm7, %v2342_v51, %v2338_v61 }
 0x4f5   : > { %v2418_v4 = vsel %vm2409_vm12, %v2394_v15, %v2417_v20  ;;  %v2346_v15 = vrot.slane %v6285_v47, %v6394_v0  ;;  %v2354_v20 = vrot.slane %v6364_v54, %v6394_v0  ;;  %v2362_v47 = vrot.slane %v6391_v19, %v6394_v0 }
 0x51a   : > { %v3378_v63 = vpop.permute.xlu1 %3377 }
 0x51b   : > { %v3375_v60 = vpop.permute.xlu0 %3374 }
 0x51c   : > { %v3425_v33 = vrot.slane %v3375_v60, %v6394_v0  ;;  %v3429_v60 = vrot.slane %v3378_v63, %v6394_v0 }
 0x51e   : > { %v3372_v17 = vpop.permute.xlu1 %3371 }
 0x51f   : > { %v6405_v3 = vpop.permute.xlu0 %3401  ;;  %v3421_v32 = vrot.slane %v3372_v17, %v6394_v0 }
 0x522   : > { %v3381_v53 = vpop.permute.xlu1 %3380 }
 0x523   : > { %v2332_v55 = vpop.permute.xlu0 %2331  ;;  %v3433_v17 = vrot.slane %v3381_v53, %v6394_v0 }
 0x524   : > { %v2398_v58 = vrot.slane %v2332_v55, %v6394_v0  ;;  %v2402_v55 = vsel %vm2401_vm8, %v2346_v15, %v2400_v50 }
 0x526   : > { %v2419_v6 = vsel %vm2411_vm13, %v2398_v58, %v2418_v4  ;;  %v3390_v38 = vpop.permute.xlu1 %3389  ;;  %v3482_v4 = vsel %vm2399_vm7, %v3425_v33, %v3421_v32 }
 0x527   : > { %v2425_v23 = vsel %vm1133_vm1, %v2419_v6, -inf  ;;  %v3483_v37 = vsel %vm2401_vm8, %v3429_v60, %v3482_v4 }
 0x528   : > { %2426 = vmax.xlane.f32.xlu0 %v2425_v23  ;;  %v2404_v23 = vsel %vm2403_vm9, %v2350_v21, %v2402_v55  ;;  %v3484_v53 = vsel %vm2403_vm9, %v3433_v17, %v3483_v37 }
 0x529   : > { %v2406_v51 = vsel %vm2405_vm11, %v2354_v20, %v2404_v23 }
 0x52a   : > { %v3384_v1 = vpop.permute.xlu1 %3383  ;;  %v2408_v61 = vsel %vm2407_vm10, %v2358_v30, %v2406_v51 }
 0x52b   : > { %v3437_v6 = vrot.slane %v3384_v1, %v6394_v0  ;;  %v2410_v63 = vsel %vm2409_vm12, %v2362_v47, %v2408_v61 }
 0x52d   : > { %v3485_v19 = vsel %vm2405_vm11, %v3437_v6, %v3484_v53 }
 0x532   : > { %v3387_v5 = vpop.permute.xlu1 %3386 }
 0x533   : > { %v3441_v54 = vrot.slane %v3387_v5, %v6394_v0  ;;  %v3445_v5 = vrot.slane %v3390_v38, %v6394_v0 }
 0x535   : > { %v3486_v1 = vsel %vm2407_vm10, %v3441_v54, %v3485_v19  ;;  %v3461_v54 = vrot.slane %v6405_v3, %v6394_v0 }
 0x536   : > { %v3487_v20 = vsel %vm2409_vm12, %v3445_v5, %v3486_v1 }
 0x53a   : > { %v3396_v58 = vpop.permute.xlu1 %3395 }
 0x53b   : > { %v3453_v38 = vrot.slane %v3396_v58, %v6394_v0 }
 0x53e   : > { %v2308_v22 = vpop.permute.xlu1 %2307 }
 0x53f   : > { %v2366_v50 = vrot.slane %v2308_v22, %v6394_v0 }
 0x541   : > { %v2412_v32 = vsel %vm2411_vm13, %v2366_v50, %v2410_v63 }
 0x542   : > { %v3393_v15 = vpop.permute.xlu1 %3392  ;;  %v2422_v33 = vsel %vm1133_vm1, %v2412_v32, -inf }
 0x543   : > { %v3449_v55 = vrot.slane %v3393_v15, %v6394_v0  ;;  %2423 = vmax.xlane.f32.xlu1 %v2422_v33 }
 0x545   : > { %v3488_v21 = vsel %vm2411_vm13, %v3449_v55, %v3487_v20 }
 0x546   : > { %v3498_v30 = vsel %vm1133_vm1, %v3488_v21, -inf }
 0x547   : > { %3499 = vmax.xlane.f32.xlu0 %v3498_v30 }
 0x554   : > { %v3405_v4 = vpop.permute.xlu0 %3404 }
 0x555   : > { %v3465_v22 = vrot.slane %v3405_v4, %v6394_v0 }
 0x558   : > { %v3399_v17 = vpop.permute.xlu0 %3398 }
 0x559   : > { %v3457_v60 = vrot.slane %v3399_v17, %v6394_v0 }
 0x55b   : > { %v3489_v6 = vsel %vm2399_vm7, %v3457_v60, %v3453_v38 }
 0x55c   : > { %v3414_v47 = vpop.permute.xlu0 %3413  ;;  %v3490_v51 = vsel %vm2401_vm8, %v3461_v54, %v3489_v6 }
 0x55d   : > { %v3491_v53 = vsel %vm2403_vm9, %v3465_v22, %v3490_v51  ;;  %v3477_v63 = vrot.slane %v3414_v47, %v6394_v0 }
 0x560   : > { %v3408_v23 = vpop.permute.xlu0 %3407 }
 0x561   : > { %v3469_v37 = vrot.slane %v3408_v23, %v6394_v0 }
 0x563   : > { %v3492_v19 = vsel %vm2405_vm11, %v3469_v37, %v3491_v53 }
 0x568   : > { %v3411_v61 = vpop.permute.xlu0 %3410 }
 0x569   : > { %v3473_v50 = vrot.slane %v3411_v61, %v6394_v0 }
 0x56b   : > { %v3493_v58 = vsel %vm2407_vm10, %v3473_v50, %v3492_v19 }
 0x56c   : > { %v3417_v1 = vpop.permute.xlu0 %3416  ;;  %v3494_v32 = vsel %vm2409_vm12, %v3477_v63, %v3493_v58 }
 0x56d   : > { %v3481_v3 = vrot.slane %v3417_v1, %v6394_v0 }
 0x56f   : > { %v3495_v5 = vsel %vm2411_vm13, %v3481_v3, %v3494_v32 }
 0x570   : > { %v3501_v15 = vsel %vm1133_vm1, %v3495_v5, -inf }
 0x571   : > { %3502 = vmax.xlane.f32.xlu0 %v3501_v15 }
 0x5b1   : > { %v6472_v33 = vpop.xlane.xlu0 %2426 }
 0x5b2   : > { %v2465_v55 = vrot.slane %v6472_v33, %v7340_v35  ;;  %v2473_v20 = vrot.slane %v6472_v33, %v5636_v26  ;;  %v2469_v17 = vrot.slane %v6472_v33, %v5367_v62  ;;  %v2477_v6 = vrot.slane %v6472_v33, %v5639_v16 }
 0x5b3   : > { %v2489_v3 = vrot.slane %v6472_v33, %v5664_v28 }
 0x5b4   : > { %v2518_v47 = vsub.f32 %v6242_v36, %v2465_v55  ;;  %v2520_v23 = vsub.f32 %v6232_v40, %v2473_v20  ;;  %v2519_v37 = vsub.f32 %v6246_v52, %v2469_v17  ;;  %v2481_v36 = vrot.slane %v6472_v33, %v5650_v9 }
 0x5b5   : > { %v2485_v52 = vrot.slane %v6472_v33, %v5657_v41 }
 0x5b6   : > { %v2542_v22 = vmul.f32 1.442695, %v2518_v47  ;;  %v2544_v53 = vmul.f32 1.442695, %v2519_v37  ;;  %v2522_v19 = vsub.f32 %v6272_v34, %v2481_v36 }
 0x5b7   : > { %v2523_v32 = vsub.f32 %v6277_v29, %v2485_v52 }
 0x5cc   : > { %v6478_v21 = vpop.xlane.xlu1 %2423 }
 0x5cd   : > { %v2433_v30 = vrot.slane %v6478_v21, %v7340_v35  ;;  %v2437_v4 = vrot.slane %v6478_v21, %v5367_v62  ;;  %v2441_v61 = vrot.slane %v6478_v21, %v5636_v26  ;;  %v2445_v40 = vrot.slane %v6478_v21, %v5639_v16 }
 0x5ce   : > { %v2453_v34 = vrot.slane %v6478_v21, %v5657_v41 }
 0x5cf   : > { %v2510_v60 = vsub.f32 %v6224_v31, %v2433_v30  ;;  %v2511_v38 = vsub.f32 %v6238_v48, %v2437_v4  ;;  %v2521_v31 = vsub.f32 %v6268_v24, %v2477_v6  ;;  %v2546_v48 = vmul.f32 1.442695, %v2520_v23 }
 0x5d0   : > { %v2512_v50 = vsub.f32 %v6209_v59, %v2441_v61  ;;  %v2449_v24 = vrot.slane %v6478_v21, %v5650_v9  ;;  %v2513_v63 = vsub.f32 %v6229_v27, %v2445_v40  ;;  %v2550_v59 = vmul.f32 1.442695, %v2522_v19  ;;  %v6510_v5 = vpop.xlane.xlu0 %3499 }
 0x5d1   : > { %v2526_v54 = vmul.f32 1.442695, %v2510_v60  ;;  %v2528_v51 = vmul.f32 1.442695, %v2511_v38  ;;  %v2548_v58 = vmul.f32 1.442695, %v2521_v31  ;;  %v2524_v27 = vsub.f32 %v6283_v42, %v2489_v3 }
 0x5d2   : > { %v2530_v1 = vmul.f32 1.442695, %v2512_v50  ;;  %v2514_v15 = vsub.f32 %v6261_v39, %v2449_v24  ;;  %v2532_v55 = vmul.f32 1.442695, %v2513_v63  ;;  %v2552_v30 = vmul.f32 1.442695, %v2523_v32 }
 0x5d3   : > { %4945 = vpow2.f32 %v2526_v54  ;;  %v3513_v29 = vrot.slane %v6510_v5, %v5367_v62  ;;  %v2457_v39 = vrot.slane %v6478_v21, %v5664_v28  ;;  %v2515_v17 = vsub.f32 %v6294_v46, %v2453_v34 }
 0x5d4   : > { %4947 = vpow2.f32 %v2528_v51  ;;  %v2534_v47 = vmul.f32 1.442695, %v2514_v15  ;;  %v2493_v42 = vrot.slane %v6472_v33, %v5671_v49  ;;  %v2554_v38 = vmul.f32 1.442695, %v2524_v27 }
 0x5d5   : > { %4949 = vpow2.f32 %v2542_v22  ;;  %v3587_v6 = vsub.f32 %v6318_v11, %v3513_v29  ;;  %v2516_v54 = vsub.f32 %v6299_v14, %v2457_v39  ;;  %v2536_v46 = vmul.f32 1.442695, %v2515_v17 }
 0x5d6   : > { %4951 = vpow2.f32 %v2546_v48  ;;  %v3509_v51 = vrot.slane %v6510_v5, %v7340_v35  ;;  %v2525_v33 = vsub.f32 %v6335_v18, %v2493_v42  ;;  %v3517_v14 = vrot.slane %v6510_v5, %v5636_v26 }
 0x5d7   : > { %4953 = vpow2.f32 %v2544_v53  ;;  %v3604_v22 = vmul.f32 1.442695, %v3587_v6  ;;  %v2538_v61 = vmul.f32 1.442695, %v2516_v54  ;;  %v3521_v53 = vrot.slane %v6510_v5, %v5639_v16 }
 0x5d8   : > { %4955 = vpow2.f32 %v2548_v58  ;;  %v3586_v36 = vsub.f32 %v6323_v10, %v3509_v51  ;;  %v2556_v48 = vmul.f32 1.442695, %v2525_v33  ;;  %v3588_v40 = vsub.f32 %v6315_v13, %v3517_v14 }
 0x5d9   : > { %4957 = vpow2.f32 %v2530_v1  ;;  %v3525_v19 = vrot.slane %v6510_v5, %v5650_v9  ;;  %v3589_v58 = vsub.f32 %v6331_v25, %v3521_v53  ;;  %v3529_v1 = vrot.slane %v6510_v5, %v5657_v41 }
 0x5da   : > { %4959 = vpow2.f32 %v2550_v59  ;;  %v3602_v50 = vmul.f32 1.442695, %v3586_v36  ;;  %v3606_v24 = vmul.f32 1.442695, %v3588_v40  ;;  %v3533_v34 = vrot.slane %v6510_v5, %v5664_v28 }
 0x5db   : > { %4961 = vpow2.f32 %v2532_v55  ;;  %v3590_v3 = vsub.f32 %v6344_v44, %v3525_v19  ;;  %v3608_v32 = vmul.f32 1.442695, %v3589_v58  ;;  %v3591_v15 = vsub.f32 %v6348_v2, %v3529_v1 }
 0x5dc   : > { %4963 = vpow2.f32 %v2552_v30  ;;  %v3537_v53 = vrot.slane %v6510_v5, %v5671_v49 }
 0x5dd   : > { %4965 = vpow2.f32 %v2534_v47  ;;  %v3610_v27 = vmul.f32 1.442695, %v3590_v3  ;;  %v3592_v47 = vsub.f32 %v6340_v12, %v3533_v34  ;;  %v7362_v3 = vld [vmem:[#allocation20_spill] sm:$0xff] }
 0x5de   : > { %4967 = vpow2.f32 %v2554_v38  ;;  %v3612_v38 = vmul.f32 1.442695, %v3591_v15 }
 0x5df   : > { %4969 = vpow2.f32 %v2536_v46  ;;  %v3614_v33 = vmul.f32 1.442695, %v3592_v47 }
 0x5e0   : > { %v6515_v20 = vpop.eup %4945  ;;  %4971 = vpow2.f32 %v3604_v22 }
 0x5e1   : > { %v6520_v4 = vpop.eup %4947  ;;  %2575 = vperm.xlu1 %4859, %v6515_v20   ;;  %4973 = vpow2.f32 %v2538_v61 }
 0x5e2   : > { %2578 = vperm.xlu0 %4860, %v6520_v4   ;;  %v6527_v60 = vpop.eup %4949  ;;  %4975 = vpow2.f32 %v2556_v48 }
 0x5e3   : > { %v6532_v23 = vpop.eup %4951  ;;  %4977 = vpow2.f32 %v3602_v50  ;;  %v7360_v50 = vld [vmem:[#allocation21_spill] sm:$0xff] }
 0x5e4   : > { %v6539_v37 = vpop.eup %4953  ;;  %4979 = vpow2.f32 %v3606_v24  ;;  %v7361_v24 = vld [vmem:[#allocation19_spill] sm:$0xff] }
 0x5e5   : > { %2599 = vperm.xlu1 %4859, %v6527_v60   ;;  %v6542_v11 = vpop.eup %4955  ;;  %4981 = vpow2.f32 %v3608_v32  ;;  %v3593_v1 = vsub.f32 %v7361_v24, %v3537_v53 }
 0x5e6   : > { %2605 = vperm.xlu0 %4860, %v6532_v23   ;;  %v6549_v31 = vpop.eup %4957  ;;  %4983 = vpow2.f32 %v3610_v27 }
 0x5e7   : > { %v6551_v18 = vpop.eup %4959  ;;  %v3616_v27 = vmul.f32 1.442695, %v3593_v1 }
 0x5e8   : > { %v6558_v52 = vpop.eup %4961 }
 0x5e9   : > { %2602 = vperm.xlu1 %4859, %v6539_v37   ;;  %v6560_v10 = vpop.eup %4963 }
 0x5ea   : > { %2608 = vperm.xlu0 %4860, %v6542_v11   ;;  %v6567_v63 = vpop.eup %4965 }
 0x5eb   : > { %v6569_v13 = vpop.eup %4967 }
 0x5ec   : > { %v6576_v59 = vpop.eup %4969 }
 0x5ed   : > { %2581 = vperm.xlu1 %4859, %v6549_v31   ;;  %v6578_v25 = vpop.eup %4971 }
 0x5ee   : > { %2611 = vperm.xlu0 %4860, %v6551_v18   ;;  %v6587_v29 = vpop.eup %4973 }
 0x5ef   : > { %v6589_v39 = vpop.eup %4975 }
 0x5f0   : > { %v6598_v46 = vpop.eup %4977 }
 0x5f1   : > { %2584 = vperm.xlu1 %4859, %v6558_v52   ;;  %v6606_v61 = vpop.eup %4979 }
 0x5f2   : > { %2614 = vperm.xlu0 %4860, %v6560_v10   ;;  %v6614_v40 = vpop.eup %4981 }
 0x5f5   : > { %2587 = vperm.xlu1 %4859, %v6567_v63  }
 0x5f6   : > { %2617 = vperm.xlu0 %4860, %v6569_v13  }
 0x5f9   : > { %2590 = vperm.xlu1 %4859, %v6576_v59  }
 0x5fa   : > { %3654 = vperm.xlu0 %4860, %v6578_v25   ;;  %v3503_v55 = vpop.xlane.xlu0 %3502 }
 0x5fb   : > { %v3545_v44 = vrot.slane %v3503_v55, %v5367_v62  ;;  %v3549_v30 = vrot.slane %v3503_v55, %v5636_v26  ;;  %v3553_v2 = vrot.slane %v3503_v55, %v5639_v16  ;;  %v3541_v6 = vrot.slane %v3503_v55, %v7340_v35 }
 0x5fc   : > { %v3561_v14 = vrot.slane %v3503_v55, %v5657_v41  ;;  %v3569_v5 = vrot.slane %v3503_v55, %v5671_v49 }
 0x5fd   : > { %v3595_v17 = vsub.f32 %v6371_v56, %v3545_v44  ;;  %2593 = vperm.xlu1 %4859, %v6587_v29   ;;  %v3596_v42 = vsub.f32 %v6326_v57, %v3549_v30  ;;  %v3557_v56 = vrot.slane %v3503_v55, %v5650_v9  ;;  %v3597_v51 = vsub.f32 %v6367_v45, %v3553_v2  ;;  %v7363_v30 = vld [vmem:[#allocation22_spill] sm:$0xff] }
 0x5fe   : > { %2620 = vperm.xlu0 %4860, %v6589_v39   ;;  %v2461_v57 = vrot.slane %v6478_v21, %v5671_v49  ;;  %v3594_v22 = vsub.f32 %v6352_v8, %v3541_v6  ;;  %v3565_v8 = vrot.slane %v3503_v55, %v5664_v28  ;;  %v3599_v19 = vsub.f32 %v7360_v50, %v3561_v14 }
 0x5ff   : > { %v3620_v54 = vmul.f32 1.442695, %v3595_v17  ;;  %v3622_v12 = vmul.f32 1.442695, %v3596_v42  ;;  %v3598_v36 = vsub.f32 %v6379_v43, %v3557_v56  ;;  %v3624_v48 = vmul.f32 1.442695, %v3597_v51 }
 0x600   : > { %v2517_v45 = vsub.f32 %v6357_v7, %v2461_v57  ;;  %v3618_v21 = vmul.f32 1.442695, %v3594_v22  ;;  %v6620_v7 = vpop.eup %4983  ;;  %v3600_v32 = vsub.f32 %v7362_v3, %v3565_v8  ;;  %v3628_v34 = vmul.f32 1.442695, %v3599_v19 }
 0x601   : > { %3651 = vperm.xlu1 %4859, %v6598_v46   ;;  %4985 = vpow2.f32 %v3620_v54  ;;  %v3626_v58 = vmul.f32 1.442695, %v3598_v36  ;;  %v3601_v17 = vsub.f32 %v7363_v30, %v3569_v5 }
 0x602   : > { %4987 = vpow2.f32 %v3612_v38  ;;  %v2540_v43 = vmul.f32 1.442695, %v2517_v45  ;;  %v3630_v47 = vmul.f32 1.442695, %v3600_v32 }
 0x603   : > { %4989 = vpow2.f32 %v3622_v12  ;;  %v3632_v42 = vmul.f32 1.442695, %v3601_v17 }
 0x604   : > { %4991 = vpow2.f32 %v3614_v33 }
 0x605   : > { %3657 = vperm.xlu1 %4859, %v6606_v61   ;;  %4993 = vpow2.f32 %v3624_v48 }
 0x606   : > { %4995 = vpow2.f32 %v3618_v21 }
 0x607   : > { %4997 = vpow2.f32 %v3626_v58 }
 0x608   : > { %4999 = vpow2.f32 %v2540_v43 }
 0x609   : > { %3660 = vperm.xlu1 %4859, %v6614_v40   ;;  %5001 = vpow2.f32 %v3628_v34 }
 0x60a   : > { %5003 = vpow2.f32 %v3616_v27 }
 0x60b   : > { %5005 = vpow2.f32 %v3630_v47 }
 0x60c   : > { %5007 = vpow2.f32 %v3632_v42 }
 0x60d   : > { %3663 = vperm.xlu1 %4859, %v6620_v7  }
 0x60e   : > { %v6625_v15 = vpop.eup %4985 }
 0x60f   : > { %v6627_v44 = vpop.eup %4987  ;;  %3678 = vperm.xlu0 %4860, %v6625_v15  }
 0x610   : > { %v6632_v2 = vpop.eup %4989 }
 0x611   : > { %3666 = vperm.xlu1 %4859, %v6627_v44   ;;  %v6634_v55 = vpop.eup %4991 }
 0x612   : > { %7364 = vst [vmem:[#allocation21_spill] sm:$0xff] %v6634_v55  ;;  %v6638_v38 = vpop.eup %4993 }
 0x613   : > { %3681 = vperm.xlu0 %4860, %v6632_v2   ;;  %v6640_v6 = vpop.eup %4995 }
 0x614   : > { %7365 = vst [vmem:[#allocation19_spill] sm:$0xff] %v6640_v6  ;;  %v6644_v54 = vpop.eup %4997 }
 0x615   : > { %3669 = vperm.xlu1 %4859, %v6634_v55   ;;  %v6646_v56 = vpop.eup %4999 }
 0x616   : > { %7366 = vst [vmem:[#allocation20_spill] sm:$0xff] %v6646_v56  ;;  %v6650_v51 = vpop.eup %5001 }
 0x617   : > { %3684 = vperm.xlu0 %4860, %v6638_v38   ;;  %v6652_v12 = vpop.eup %5003 }
 0x618   : > { %7367 = vst [vmem:[#allocation22_spill] sm:$0xff] %v6652_v12  ;;  %v6656_v57 = vpop.eup %5005 }
 0x619   : > { %3675 = vperm.xlu1 %4859, %v6640_v6   ;;  %7368 = vst [vmem:[#allocation23_spill] sm:$0xff] %v6656_v57  ;;  %v6659_v33 = vpop.eup %5007 }
 0x61a   : > { %7369 = vst [vmem:[#allocation24_spill] sm:$0xff] %v6659_v33 }
 0x61b   : > { %3687 = vperm.xlu0 %4860, %v6644_v54  }
 0x61d   : > { %2596 = vperm.xlu1 %4859, %v6646_v56  }
 0x61f   : > { %3690 = vperm.xlu0 %4860, %v6650_v51  }
 0x621   : > { %3672 = vperm.xlu1 %4859, %v6652_v12  }
 0x623   : > { %3693 = vperm.xlu0 %4860, %v6656_v57  }
 0x627   : > { %3696 = vperm.xlu0 %4860, %v6659_v33  }
 0x65c   : > { %v2576_v22 = vpop.permute.xlu1 %2575 }
 0x65d   : > { %v2579_v14 = vpop.permute.xlu0 %2578 }
 0x660   : > { %v2600_v36 = vpop.permute.xlu1 %2599 }
 0x661   : > { %v2606_v48 = vpop.permute.xlu0 %2605  ;;  %v2657_v43 = vrot.slane %v2600_v36, %v6394_v0 }
 0x662   : > { %v2665_v5 = vrot.slane %v2606_v48, %v6394_v0 }
 0x664   : > { %v2603_v45 = vpop.permute.xlu1 %2602 }
 0x665   : > { %v2609_v53 = vpop.permute.xlu0 %2608  ;;  %v2661_v50 = vrot.slane %v2603_v45, %v6394_v0 }
 0x666   : > { %v2669_v34 = vrot.slane %v2609_v53, %v6394_v0 }
 0x667   : > { %v2693_v24 = vsel %vm2399_vm7, %v2661_v50, %v2657_v43 }
 0x668   : > { %v2582_v21 = vpop.permute.xlu1 %2581  ;;  %v2694_v32 = vsel %vm2401_vm8, %v2665_v5, %v2693_v24 }
 0x669   : > { %v2612_v8 = vpop.permute.xlu0 %2611  ;;  %v2695_v47 = vsel %vm2403_vm9, %v2669_v34, %v2694_v32 }
 0x66a   : > { %v2673_v30 = vrot.slane %v2612_v8, %v6394_v0 }
 0x66c   : > { %v2585_v19 = vpop.permute.xlu1 %2584  ;;  %v2696_v50 = vsel %vm2405_vm11, %v2673_v30, %v2695_v47  ;;  %v2625_v47 = vrot.slane %v2576_v22, %v6394_v0 }
 0x66d   : > { %v2615_v58 = vpop.permute.xlu0 %2614 }
 0x66e   : > { %v2677_v42 = vrot.slane %v2615_v58, %v6394_v0 }
 0x670   : > { %v2588_v1 = vpop.permute.xlu1 %2587  ;;  %v2697_v48 = vsel %vm2407_vm10, %v2677_v42, %v2696_v50  ;;  %v2629_v42 = vrot.slane %v2579_v14, %v6394_v0  ;;  %v2633_v50 = vrot.slane %v2582_v21, %v6394_v0 }
 0x671   : > { %v2618_v3 = vpop.permute.xlu0 %2617 }
 0x672   : > { %v2681_v36 = vrot.slane %v2618_v3, %v6394_v0 }
 0x674   : > { %v2591_v27 = vpop.permute.xlu1 %2590  ;;  %v2698_v53 = vsel %vm2409_vm12, %v2681_v36, %v2697_v48  ;;  %v2637_v36 = vrot.slane %v2585_v19, %v6394_v0  ;;  %v2641_v48 = vrot.slane %v2588_v1, %v6394_v0 }
 0x675   : > { %v3655_v17 = vpop.permute.xlu0 %3654 }
 0x676   : > { %v3705_v57 = vrot.slane %v3655_v17, %v6394_v0 }
 0x678   : > { %v2594_v45 = vpop.permute.xlu1 %2593 }
 0x679   : > { %v2621_v43 = vpop.permute.xlu0 %2620  ;;  %v2649_v22 = vrot.slane %v2594_v45, %v6394_v0 }
 0x67a   : > { %v2685_v24 = vrot.slane %v2621_v43, %v6394_v0 }
 0x67c   : > { %v3652_v5 = vpop.permute.xlu1 %3651  ;;  %v2699_v8 = vsel %vm2411_vm13, %v2685_v24, %v2698_v53  ;;  %v2645_v53 = vrot.slane %v2591_v27, %v6394_v0 }
 0x67d   : > { %v2705_v12 = vsel %vm1133_vm1, %v2699_v8, 0.0  ;;  %v3701_v8 = vrot.slane %v3652_v5, %v6394_v0 }
 0x67e   : > { %2706 = vadd.xlane.f32.xlu0 %v2705_v12  ;;  %v2686_v12 = vsel %vm2399_vm7, %v2629_v42, %v2625_v47 }
 0x67f   : > { %v2687_v33 = vsel %vm2401_vm8, %v2633_v50, %v2686_v12 }
 0x680   : > { %v3658_v32 = vpop.permute.xlu1 %3657  ;;  %v2688_v19 = vsel %vm2403_vm9, %v2637_v36, %v2687_v33 }
 0x681   : > { %v3709_v14 = vrot.slane %v3658_v32, %v6394_v0  ;;  %v2689_v47 = vsel %vm2405_vm11, %v2641_v48, %v2688_v19  ;;  %v3762_v32 = vsel %vm2399_vm7, %v3705_v57, %v3701_v8 }
 0x682   : > { %v2690_v45 = vsel %vm2407_vm10, %v2645_v53, %v2689_v47 }
 0x683   : > { %v3763_v17 = vsel %vm2401_vm8, %v3709_v14, %v3762_v32  ;;  %v2691_v48 = vsel %vm2409_vm12, %v2649_v22, %v2690_v45 }
 0x684   : > { %v3661_v58 = vpop.permute.xlu1 %3660 }
 0x685   : > { %v3713_v1 = vrot.slane %v3661_v58, %v6394_v0 }
 0x688   : > { %v3664_v34 = vpop.permute.xlu1 %3663 }
 0x689   : > { %v3717_v27 = vrot.slane %v3664_v34, %v6394_v0  ;;  %v3764_v34 = vsel %vm2403_vm9, %v3713_v1, %v3763_v17 }
 0x68a   : > { %v3679_v3 = vpop.permute.xlu0 %3678 }
 0x68b   : > { %v3737_v5 = vrot.slane %v3679_v3, %v6394_v0  ;;  %v3765_v57 = vsel %vm2405_vm11, %v3717_v27, %v3764_v34 }
 0x68c   : > { %v3667_v56 = vpop.permute.xlu1 %3666 }
 0x68d   : > { %v3721_v50 = vrot.slane %v3667_v56, %v6394_v0 }
 0x68e   : > { %v3682_v6 = vpop.permute.xlu0 %3681 }
 0x68f   : > { %v3741_v3 = vrot.slane %v3682_v6, %v6394_v0  ;;  %v3766_v8 = vsel %vm2407_vm10, %v3721_v50, %v3765_v57 }
 0x690   : > { %v3670_v30 = vpop.permute.xlu1 %3669 }
 0x691   : > { %v3725_v58 = vrot.slane %v3670_v30, %v6394_v0 }
 0x692   : > { %v3685_v43 = vpop.permute.xlu0 %3684 }
 0x693   : > { %v3745_v22 = vrot.slane %v3685_v43, %v6394_v0 }
 0x694   : > { %v3676_v24 = vpop.permute.xlu1 %3675 }
 0x695   : > { %v3733_v21 = vrot.slane %v3676_v24, %v6394_v0 }
 0x696   : > { %v3688_v55 = vpop.permute.xlu0 %3687 }
 0x697   : > { %v3769_v36 = vsel %vm2399_vm7, %v3737_v5, %v3733_v21  ;;  %v3767_v21 = vsel %vm2409_vm12, %v3725_v58, %v3766_v8  ;;  %v3749_v6 = vrot.slane %v3688_v55, %v6394_v0 }
 0x698   : > { %v2597_v42 = vpop.permute.xlu1 %2596  ;;  %v3770_v30 = vsel %vm2401_vm8, %v3741_v3, %v3769_v36 }
 0x699   : > { %v2653_v33 = vrot.slane %v2597_v42, %v6394_v0  ;;  %v3771_v47 = vsel %vm2403_vm9, %v3745_v22, %v3770_v30 }
 0x69a   : > { %v3691_v24 = vpop.permute.xlu0 %3690  ;;  %v3772_v45 = vsel %vm2405_vm11, %v3749_v6, %v3771_v47 }
 0x69b   : > { %v2692_v12 = vsel %vm2411_vm13, %v2653_v33, %v2691_v48  ;;  %v3753_v27 = vrot.slane %v3691_v24, %v6394_v0 }
 0x69c   : > { %v3673_v56 = vpop.permute.xlu1 %3672  ;;  %v2702_v53 = vsel %vm1133_vm1, %v2692_v12, 0.0 }
 0x69d   : > { %v3729_v14 = vrot.slane %v3673_v56, %v6394_v0  ;;  %2703 = vadd.xlane.f32.xlu1 %v2702_v53  ;;  %v3773_v43 = vsel %vm2407_vm10, %v3753_v27, %v3772_v45 }
 0x69e   : > { %v3694_v19 = vpop.permute.xlu0 %3693 }
 0x69f   : > { %v3768_v1 = vsel %vm2411_vm13, %v3729_v14, %v3767_v21  ;;  %v3757_v42 = vrot.slane %v3694_v19, %v6394_v0 }
 0x6a0   : > { %v3778_v5 = vsel %vm1133_vm1, %v3768_v1, 0.0 }
 0x6a1   : > { %3779 = vadd.xlane.f32.xlu0 %v3778_v5  ;;  %v3774_v55 = vsel %vm2409_vm12, %v3757_v42, %v3773_v43 }
 0x6a2   : > { %v3697_v32 = vpop.permute.xlu0 %3696 }
 0x6a3   : > { %v3761_v50 = vrot.slane %v3697_v32, %v6394_v0 }
 0x6a5   : > { %v3775_v33 = vsel %vm2411_vm13, %v3761_v50, %v3774_v55 }
 0x6a6   : > { %v3781_v17 = vsel %vm1133_vm1, %v3775_v33, 0.0  ;;  %vm3980_vm1 = vcmask 523648  }
 0x6a7   : > { %3782 = vadd.xlane.f32.xlu0 %v3781_v17 }
 0x707   : > { %v2707_v58 = vpop.xlane.xlu0 %2706 }
 0x708   : > { %5009 = vrcp.f32 %v2707_v58 }
 0x715   : > { %v5010_v48 = vpop.eup %5009 }
 0x716   : > { %v2755_v57 = vrot.slane %v5010_v48, %v5636_v26  ;;  %v2747_v56 = vrot.slane %v5010_v48, %v7340_v35  ;;  %v2759_v8 = vrot.slane %v5010_v48, %v5639_v16  ;;  %v2751_v22 = vrot.slane %v5010_v48, %v5367_v62 }
 0x717   : > { %v2763_v21 = vrot.slane %v5010_v48, %v5650_v9  ;;  %v2771_v27 = vrot.slane %v5010_v48, %v5664_v28  ;;  %v2775_v50 = vrot.slane %v5010_v48, %v5671_v49 }
 0x718   : > { %v2802_v30 = vmul.f32 %v6532_v23, %v2755_v57  ;;  %v2800_v14 = vmul.f32 %v6527_v60, %v2747_v56  ;;  %v2767_v23 = vrot.slane %v5010_v48, %v5657_v41 }
 0x719   : > { %v2804_v60 = vmul.f32 %v6551_v18, %v2763_v21  ;;  %v2807_v55 = vmul.f32 %v6589_v39, %v2775_v50 }
 0x726   : > { %v2704_v36 = vpop.xlane.xlu1 %2703 }
 0x727   : > { %5011 = vrcp.f32 %v2704_v36 }
 0x72a   : > { %v3780_v53 = vpop.xlane.xlu0 %3779 }
 0x72b   : > { %5013 = vrcp.f32 %v3780_v53  ;;  %v7373_v53 = vld [vmem:[#allocation19_spill] sm:$0xff] }
 0x730   : > { %v3783_v19 = vpop.xlane.xlu0 %3782 }
 0x731   : > { %5015 = vrcp.f32 %v3783_v19 }
 0x734   : > { %v6726_v34 = vpop.eup %5011 }
 0x735   : > { %v2715_v3 = vrot.slane %v6726_v34, %v7340_v35  ;;  %v2719_v0 = vrot.slane %v6726_v34, %v5367_v62  ;;  %v2723_v6 = vrot.slane %v6726_v34, %v5636_v26  ;;  %v2731_v5 = vrot.slane %v6726_v34, %v5650_v9 }
 0x736   : > { %v2735_v45 = vrot.slane %v6726_v34, %v5657_v41  ;;  %v2739_v43 = vrot.slane %v6726_v34, %v5664_v28 }
 0x737   : > { %v2792_v24 = vmul.f32 %v6515_v20, %v2715_v3  ;;  %v2793_v12 = vmul.f32 %v6520_v4, %v2719_v0  ;;  %v2803_v20 = vmul.f32 %v6542_v11, %v2759_v8  ;;  %v2801_v4 = vmul.f32 %v6539_v37, %v2751_v22 }
 0x738   : > { %v2794_v1 = vmul.f32 %v6549_v31, %v2723_v6  ;;  %v2727_v11 = vrot.slane %v6726_v34, %v5639_v16  ;;  %v2805_v37 = vmul.f32 %v6560_v10, %v2767_v23  ;;  %v6755_v42 = vpop.eup %5013  ;;  %v2806_v31 = vmul.f32 %v6569_v13, %v2771_v27  ;;  %v6822_v6 = vld [vmem:[%s6814_s21 + $0x20] sm:$0xff]   ;;  %v7377_v27 = vld [vmem:[#allocation5_spill] sm:$0xff] }
 0x739   : > { %2810 = vperm.xlu1 %4859, %v2792_v24   ;;  %2815 = vperm.xlu0 %4860, %v2793_v12   ;;  %v2796_v18 = vmul.f32 %v6567_v63, %v2731_v5  ;;  %v3795_v10 = vrot.slane %v6755_v42, %v5367_v62  ;;  %v2798_v63 = vmul.f32 %v6587_v29, %v2739_v43  ;;  %v7371_v12 = vld [vmem:[#allocation23_spill] sm:$0xff] }
 0x73a   : > { %v2795_v47 = vmul.f32 %v6558_v52, %v2727_v11  ;;  %v2797_v52 = vmul.f32 %v6576_v59, %v2735_v45  ;;  %v3791_v33 = vrot.slane %v6755_v42, %v7340_v35  ;;  %v3799_v58 = vrot.slane %v6755_v42, %v5636_v26  ;;  %v7376_v11 = vld [vmem:[#allocation6_spill] sm:$0xff] }
 0x73b   : > { %v3869_v32 = vmul.f32 %v6578_v25, %v3795_v10  ;;  %v3819_v22 = vrot.slane %v6755_v42, %v5671_v49 }
 0x73c   : > { %v3868_v59 = vmul.f32 %v6598_v46, %v3791_v33  ;;  %v3870_v29 = vmul.f32 %v6606_v61, %v3799_v58 }
 0x73d   : > { %2860 = vperm.xlu0 %4860, %v2802_v30   ;;  %2850 = vperm.xlu1 %4859, %v2800_v14   ;;  %v7374_v30 = vld [vmem:[#allocation20_spill] sm:$0xff] }
 0x73e   : > { %v5016_v13 = vpop.eup %5015 }
 0x73f   : > { %v3827_v17 = vrot.slane %v5016_v13, %v5367_v62  ;;  %v3831_v36 = vrot.slane %v5016_v13, %v5636_v26  ;;  %v3803_v62 = vrot.slane %v6755_v42, %v5639_v16  ;;  %v3835_v48 = vrot.slane %v5016_v13, %v5639_v16 }
 0x740   : > { %v3807_v26 = vrot.slane %v6755_v42, %v5650_v9  ;;  %v3839_v3 = vrot.slane %v5016_v13, %v5650_v9  ;;  %v3811_v16 = vrot.slane %v6755_v42, %v5657_v41  ;;  %v3843_v0 = vrot.slane %v5016_v13, %v5657_v41 }
 0x741   : > { %2865 = vperm.xlu0 %4860, %v2803_v20   ;;  %2855 = vperm.xlu1 %4859, %v2801_v4   ;;  %v3877_v25 = vmul.f32 %v6625_v15, %v3827_v17  ;;  %v3878_v39 = vmul.f32 %v6632_v2, %v3831_v36  ;;  %v3871_v46 = vmul.f32 %v6614_v40, %v3803_v62  ;;  %v7375_v20 = vld [vmem:[#allocation22_spill] sm:$0xff] }
 0x742   : > { %v3879_v15 = vmul.f32 %v6638_v38, %v3835_v48  ;;  %v3872_v61 = vmul.f32 %v6620_v7, %v3807_v26  ;;  %v3880_v2 = vmul.f32 %v6644_v54, %v3839_v3  ;;  %v3873_v40 = vmul.f32 %v6627_v44, %v3811_v16  ;;  %v7370_v7 = vld [vmem:[#allocation21_spill] sm:$0xff]  ;;  %v7372_v44 = vld [vmem:[#allocation24_spill] sm:$0xff] }
 0x743   : > { %v3881_v38 = vmul.f32 %v6650_v51, %v3843_v0  ;;  %v3815_v9 = vrot.slane %v6755_v42, %v5664_v28  ;;  %v3847_v24 = vrot.slane %v5016_v13, %v5664_v28  ;;  %v3851_v41 = vrot.slane %v5016_v13, %v5671_v49  ;;  %v6850_v26 = vld [vmem:[%s6814_s21 + $0x8] sm:$0xff]   ;;  %v6853_v3 = vld [vmem:[%s6814_s21 + $0x30] sm:$0xff]  }
 0x744   : > { %v3823_v56 = vrot.slane %v5016_v13, %v7340_v35  ;;  %v2743_v28 = vrot.slane %v6726_v34, %v5671_v49  ;;  %v3875_v4 = vmul.f32 %v7375_v20, %v3819_v22  ;;  %v6817_v35 = vld [vmem:[%s6814_s21] sm:$0xff]   ;;  %v6825_v49 = vld [vmem:[%s6814_s21 + $0x28] sm:$0xff]   ;;  %v7315_v20 = vunpack.c.h.bf16 %v6850_v26 }
 0x745   : > { %2870 = vperm.xlu0 %4860, %v2804_v60   ;;  %2820 = vperm.xlu1 %4859, %v2794_v1   ;;  %v3874_v54 = vmul.f32 %v7370_v7, %v3815_v9  ;;  %v3882_v57 = vmul.f32 %v7371_v12, %v3847_v24  ;;  %v3883_v51 = vmul.f32 %v7372_v44, %v3851_v41  ;;  %v7310_v34 = vunpack.c.l.bf16 %v6817_v35 }
 0x746   : > { %v3876_v8 = vmul.f32 %v7373_v53, %v3823_v56  ;;  %v2799_v14 = vmul.f32 %v7374_v30, %v2743_v28  ;;  %v7311_v21 = vunpack.c.h.bf16 %v6817_v35  ;;  %v7304_v60 = vunpack.c.l.bf16 %v6822_v6  ;;  %v6860_v53 = vld [vmem:[%s6814_s21 + $0x10] sm:$0xff]   ;;  %v6866_v28 = vld [vmem:[%s6814_s21 + $0x18] sm:$0xff]  }
 0x747   : > { %v7306_v1 = vunpack.c.l.bf16 %v6825_v49  ;;  %v7307_v7 = vunpack.c.h.bf16 %v6822_v6  ;;  %v7309_v12 = vunpack.c.l.bf16 %v6850_v26 }
 0x749   : > { %2875 = vperm.xlu0 %4860, %v2805_v37   ;;  %2825 = vperm.xlu1 %4859, %v2795_v47  }
 0x74d   : > { %2880 = vperm.xlu0 %4860, %v2806_v31   ;;  %2830 = vperm.xlu1 %4859, %v2796_v18  }
 0x751   : > { %2835 = vperm.xlu1 %4859, %v2797_v52   ;;  %3891 = vperm.xlu0 %4860, %v3869_v32  }
 0x755   : > { %2840 = vperm.xlu1 %4859, %v2798_v63   ;;  %2885 = vperm.xlu0 %4860, %v2807_v55   ;;  %v7378_v55 = vld [vmem:[#allocation18_spill] sm:$0xff] }
 0x759   : > { %3886 = vperm.xlu1 %4859, %v3868_v59   ;;  %3931 = vperm.xlu0 %4860, %v3877_v25   ;;  %v7379_v59 = vld [vmem:[#allocation8_spill] sm:$0xff] }
 0x75d   : > { %3896 = vperm.xlu1 %4859, %v3870_v29   ;;  %3936 = vperm.xlu0 %4860, %v3878_v39  }
 0x761   : > { %3901 = vperm.xlu1 %4859, %v3871_v46   ;;  %3941 = vperm.xlu0 %4860, %v3879_v15  }
 0x765   : > { %3906 = vperm.xlu1 %4859, %v3872_v61   ;;  %3946 = vperm.xlu0 %4860, %v3880_v2  }
 0x769   : > { %3911 = vperm.xlu1 %4859, %v3873_v40   ;;  %3951 = vperm.xlu0 %4860, %v3881_v38  }
 0x76d   : > { %3916 = vperm.xlu1 %4859, %v3874_v54   ;;  %3956 = vperm.xlu0 %4860, %v3882_v57   ;;  %v7305_v54 = vunpack.c.h.bf16 %v6825_v49  ;;  %v7308_v57 = vunpack.c.l.bf16 %v6853_v3 }
 0x771   : > { %3961 = vperm.xlu0 %4860, %v3883_v51   ;;  %3926 = vperm.xlu1 %4859, %v3876_v8   ;;  %v6863_v8 = vld [vmem:[%s6814_s21 + $0x38] sm:$0xff]  }
 0x775   : > { %2845 = vperm.xlu1 %4859, %v2799_v14  }
 0x779   : > { %3921 = vperm.xlu1 %4859, %v3875_v4   ;;  %v7313_v4 = vunpack.c.h.bf16 %v6853_v3 }
 0x7b4   : > { %v2811_v19 = vpop.permute.xlu1 %2810  ;;  %v2816_v23 = vpop.permute.xlu0 %2815 }
 0x7b5   : > { %v2888_v37 = vmul.f32 %v2811_v19, %v7376_v11  ;;  %v3017_v47 = vmul.f32 %v7310_v34, %v2811_v19  ;;  %v2889_v5 = vmul.f32 %v2816_v23, %v7377_v27  ;;  %v3018_v42 = vmul.f32 %v7311_v21, %v2816_v23 }
 0x7b6   : > { %v7384_v34 = vmov 0.0  }
 0x7b7   : > { %v2905_v31 = vsel %vm2904_vm14, %v2888_v37, 0.0  ;;  %v3034_v18 = vsel %vm3033_vm15, %v3017_v47, 0.0  ;;  %v2912_v45 = vsel %vm2904_vm14, %v2889_v5, 0.0  ;;  %v3041_v10 = vsel %vm3033_vm15, %v3018_v42, 0.0 }
 0x7b8   : > { %v2906_v52 = vrot.slane %v2905_v31, 4  ;;  %v3035_v32 = vrot.slane %v3034_v18, 4  ;;  %v2913_v43 = vrot.slane %v2912_v45, 4  ;;  %v3042_v50 = vrot.slane %v3041_v10, 4  ;;  %v2851_v13 = vpop.permute.xlu1 %2850  ;;  %v2861_v63 = vpop.permute.xlu0 %2860 }
 0x7b9   : > { %v2896_v33 = vmul.f32 %v2851_v13, %v7378_v55  ;;  %v3025_v17 = vmul.f32 %v7304_v60, %v2851_v13  ;;  %v2898_v25 = vmul.f32 %v2861_v63, %v7379_v59  ;;  %v3027_v58 = vmul.f32 %v7306_v1, %v2861_v63 }
 0x7ba   : > { %v2907_v36 = vadd.f32 %v2906_v52, %v2905_v31  ;;  %v3036_v29 = vadd.f32 %v3035_v32, %v3034_v18  ;;  %v2914_v39 = vadd.f32 %v2913_v43, %v2912_v45  ;;  %v3043_v0 = vadd.f32 %v3042_v50, %v3041_v10  ;;  %v7380_v50 = vld [vmem:[#allocation11_spill] sm:$0xff] }
 0x7bb   : > { %v2961_v62 = vsel %vm2904_vm14, %v2896_v33, 0.0  ;;  %v3090_v48 = vsel %vm3033_vm15, %v3025_v17, 0.0  ;;  %v2975_v46 = vsel %vm2904_vm14, %v2898_v25, 0.0  ;;  %v3104_v15 = vsel %vm3033_vm15, %v3027_v58, 0.0 }
 0x7bc   : > { %v2908_v61 = vrot.slane %v2907_v36, 2  ;;  %v3037_v2 = vrot.slane %v3036_v29, 2  ;;  %v2915_v16 = vrot.slane %v2914_v39, 2  ;;  %v2962_v40 = vrot.slane %v2961_v62, 4  ;;  %v2856_v22 = vpop.permute.xlu1 %2855  ;;  %v2866_v5 = vpop.permute.xlu0 %2865 }
 0x7bd   : > { %v3091_v38 = vrot.slane %v3090_v48, 4  ;;  %v2976_v9 = vrot.slane %v2975_v46, 4  ;;  %v3105_v24 = vrot.slane %v3104_v15, 4  ;;  %v3044_v14 = vrot.slane %v3043_v0, 2 }
 0x7be   : > { %v2963_v41 = vadd.f32 %v2962_v40, %v2961_v62  ;;  %v6868_v30 = vadd.f32 %v2908_v61, %v2907_v36  ;;  %v6872_v19 = vadd.f32 %v3037_v2, %v3036_v29  ;;  %v6874_v23 = vadd.f32 %v2915_v16, %v2914_v39 }
 0x7bf   : > { %v3092_v56 = vadd.f32 %v3091_v38, %v3090_v48  ;;  %v2977_v44 = vadd.f32 %v2976_v9, %v2975_v46  ;;  %v3106_v51 = vadd.f32 %v3105_v24, %v3104_v15  ;;  %v7314_v42 = vunpack.c.l.bf16 %v6860_v53  ;;  %v7381_v48 = vld [vmem:[#allocation9_spill] sm:$0xff] }
 0x7c0   : > { %v2964_v37 = vrot.slane %v2963_v41, 2  ;;  %v7312_v31 = vunpack.c.l.bf16 %v6863_v8  ;;  %v2897_v13 = vmul.f32 %v2856_v22, %v7380_v50  ;;  %v3026_v63 = vmul.f32 %v7307_v7, %v2856_v22  ;;  %v2821_v61 = vpop.permute.xlu1 %2820 }
 0x7c1   : > { %v3093_v47 = vrot.slane %v3092_v56, 2  ;;  %v2978_v32 = vrot.slane %v2977_v44, 2  ;;  %v3107_v43 = vrot.slane %v3106_v51, 2  ;;  %v2910_v25 = vrot.slane %v6868_v30, 1 }
 0x7c2   : > { %v6880_v10 = vadd.f32 %v2964_v37, %v2963_v41  ;;  %v3039_v58 = vrot.slane %v6872_v19, 1  ;;  %v2917_v36 = vrot.slane %v6874_v23, 1  ;;  %v6892_v29 = vadd.f32 %v3044_v14, %v3043_v0  ;;  %v2871_v0 = vpop.permute.xlu0 %2870  ;;  %v7382_v37 = vld [vmem:[#allocation3_spill] sm:$0xff] }
 0x7c3   : > { %v6882_v52 = vadd.f32 %v3093_v47, %v3092_v56  ;;  %v2968_v39 = vsel %vm2904_vm14, %v2897_v13, 0.0  ;;  %v3097_v62 = vsel %vm3033_vm15, %v3026_v63, 0.0  ;;  %v2899_v46 = vmul.f32 %v2866_v5, %v7381_v48 }
 0x7c4   : > { %v3028_v15 = vmul.f32 %v7305_v54, %v2866_v5  ;;  %v2966_v2 = vrot.slane %v6880_v10, 1  ;;  %v6901_v40 = vadd.f32 %v2978_v32, %v2977_v44  ;;  %v6903_v38 = vadd.f32 %v3107_v43, %v3106_v51  ;;  %v7383_v44 = vld [vmem:[#allocation15_spill] sm:$0xff] }
 0x7c5   : > { %v3095_v16 = vrot.slane %v6882_v52, 1  ;;  %v2969_v9 = vrot.slane %v2968_v39, 4  ;;  %v3098_v24 = vrot.slane %v3097_v62, 4  ;;  %v2982_v41 = vsel %vm2904_vm14, %v2899_v46, 0.0 }
 0x7c6   : > { %v3111_v56 = vsel %vm3033_vm15, %v3028_v15, 0.0  ;;  %v2983_v14 = vrot.slane %v2982_v41, 4  ;;  %v2890_v47 = vmul.f32 %v2821_v61, %v7382_v37  ;;  %v3019_v5 = vmul.f32 %v7309_v12, %v2821_v61 }
 0x7c7   : > { %v3112_v22 = vrot.slane %v3111_v56, 4  ;;  %v2970_v13 = vadd.f32 %v2969_v9, %v2968_v39  ;;  %v3099_v63 = vadd.f32 %v3098_v24, %v3097_v62  ;;  %v2900_v32 = vmul.f32 %v2871_v0, %v7383_v44  ;;  %v4875_v39 = vld [vmem:[%s7246_s15 + $0x8] sm:$0xff]  }
 0x7c8   : > { %v3029_v51 = vmul.f32 %v7308_v57, %v2871_v0  ;;  %v2984_v43 = vadd.f32 %v2983_v14, %v2982_v41  ;;  %v2919_v46 = vsel %vm2904_vm14, %v2890_v47, 0.0  ;;  %v3048_v15 = vsel %vm3033_vm15, %v3019_v5, 0.0  ;;  %4834 = vmatpush3.bf16.msra.mxu1 %v4875_v39  ;;  %v2826_v39 = vpop.permute.xlu1 %2825 }
 0x7c9   : > { %v3113_v17 = vadd.f32 %v3112_v22, %v3111_v56  ;;  %v2971_v60 = vrot.slane %v2970_v13, 2  ;;  %v3100_v54 = vrot.slane %v3099_v63, 2  ;;  %v2920_v1 = vrot.slane %v2919_v46, 4  ;;  %v4876_v22 = vld [vmem:[%s7246_s15] sm:$0xff]   ;;  %4835 = vmatprep.subr.bf16.mxu1 %v7384_v34 }
 0x7ca   : > { %v3049_v7 = vrot.slane %v3048_v15, 4  ;;  %v2985_v62 = vrot.slane %v2984_v43, 2  ;;  %v2989_v9 = vsel %vm2904_vm14, %v2900_v32, 0.0  ;;  %v3118_v0 = vsel %vm3033_vm15, %v3029_v51, 0.0 }
 0x7cb   : > { %v3114_v61 = vrot.slane %v3113_v17, 2  ;;  %v2972_v24 = vadd.f32 %v2971_v60, %v2970_v13  ;;  %v3101_v41 = vadd.f32 %v3100_v54, %v3099_v63  ;;  %v2921_v56 = vadd.f32 %v2920_v1, %v2919_v46 }
 0x7cc   : > { %v3050_v14 = vadd.f32 %v3049_v7, %v3048_v15  ;;  %v2986_v47 = vadd.f32 %v2985_v62, %v2984_v43  ;;  %v2990_v57 = vrot.slane %v2989_v9, 4  ;;  %v3119_v12 = vrot.slane %v3118_v0, 4  ;;  %4836 = vmatpush3.bf16.msra.mxu1 %v4876_v22 }
 0x7cd   : > { %v3115_v5 = vadd.f32 %v3114_v61, %v3113_v17  ;;  %v2973_v33 = vrot.slane %v2972_v24, 1  ;;  %v3102_v45 = vrot.slane %v3101_v41, 1  ;;  %v2922_v32 = vrot.slane %v2921_v56, 2  ;;  %v2876_v61 = vpop.permute.xlu0 %2875 }
 0x7ce   : > { %v3051_v21 = vrot.slane %v3050_v14, 2  ;;  %v3046_v60 = vrot.slane %v6892_v29, 1  ;;  %v2980_v1 = vrot.slane %v6901_v40, 1  ;;  %v3109_v7 = vrot.slane %v6903_v38, 1 }
 0x7cf   : > { %v2991_v54 = vadd.f32 %v2990_v57, %v2989_v9  ;;  %v2974_v13 = vadd.f32 %v2973_v33, %v2972_v24  ;;  %v3103_v63 = vadd.f32 %v3102_v45, %v3101_v41  ;;  %v2987_v51 = vrot.slane %v2986_v47, 1  ;;  %v7385_v9 = vld [vmem:[#allocation4_spill] sm:$0xff]  ;;  %v7386_v24 = vld [vmem:[#allocation7_spill] sm:$0xff] }
 0x7d0   : > { %v3116_v43 = vrot.slane %v3115_v5, 1  ;;  %v6930_v34 = vadd.f32 %v2910_v25, %v6868_v30  ;;  %v6935_v17 = vadd.f32 %v3039_v58, %v6872_v19  ;;  %v3120_v15 = vadd.f32 %v3119_v12, %v3118_v0 }
 0x7d1   : > { %v2992_v46 = vrot.slane %v2991_v54, 2  ;;  %v2967_v57 = vadd.f32 %v2966_v2, %v6880_v10  ;;  %v3096_v45 = vadd.f32 %v3095_v16, %v6882_v52  ;;  %v2923_v33 = vadd.f32 %v2922_v32, %v2921_v56 }
 0x7d2   : > { %v3052_v62 = vadd.f32 %v3051_v21, %v3050_v14  ;;  %v6942_v30 = vadd.f32 %v2917_v36, %v6874_v23  ;;  %v6945_v25 = vadd.f32 %v3046_v60, %v6892_v29  ;;  %v2981_v19 = vadd.f32 %v2980_v1, %v6901_v40 }
 0x7d3   : > { %v3110_v12 = vadd.f32 %v3109_v7, %v6903_v38  ;;  %v4245_v58 = vsel %vm2399_vm7, %v2974_v13, %v2967_v57  ;;  %v4396_v10 = vsel %vm2399_vm7, %v3103_v63, %v3096_v45  ;;  %v2988_v52 = vadd.f32 %v2987_v51, %v2986_v47  ;;  %v2831_v47 = vpop.permute.xlu1 %2830  ;;  %v2881_v7 = vpop.permute.xlu0 %2880 }
 0x7d4   : > { %v3117_v2 = vadd.f32 %v3116_v43, %v3115_v5  ;;  %v2993_v21 = vadd.f32 %v2992_v46, %v2991_v54  ;;  %v3121_v16 = vrot.slane %v3120_v15, 2  ;;  %v2891_v0 = vmul.f32 %v2826_v39, %v7385_v9 }
 0x7d5   : > { %v3020_v23 = vmul.f32 %v7315_v20, %v2826_v39  ;;  %v2924_v36 = vrot.slane %v2923_v33, 1  ;;  %v3053_v29 = vrot.slane %v3052_v62, 1  ;;  %v2901_v41 = vmul.f32 %v2876_v61, %v7386_v24  ;;  %v7387_v39 = vld [vmem:[#allocation12_spill] sm:$0xff] }
 0x7d6   : > { %v3030_v40 = vmul.f32 %v7313_v4, %v2876_v61  ;;  %v4246_v38 = vsel %vm2401_vm8, %v2981_v19, %v4245_v58  ;;  %v4397_v56 = vsel %vm2401_vm8, %v3110_v12, %v4396_v10  ;;  %v2926_v14 = vsel %vm2904_vm14, %v2891_v0, 0.0  ;;  %v7388_v12 = vld [vmem:[#allocation13_spill] sm:$0xff] }
 0x7d7   : > { %v3055_v22 = vsel %vm3033_vm15, %v3020_v23, 0.0  ;;  %v2927_v5 = vrot.slane %v2926_v14, 4  ;;  %v2996_v60 = vsel %vm2904_vm14, %v2901_v41, 0.0  ;;  %v2994_v54 = vrot.slane %v2993_v21, 1 }
 0x7d8   : > { %v3056_v32 = vrot.slane %v3055_v22, 4  ;;  %v3125_v1 = vsel %vm3033_vm15, %v3030_v40, 0.0  ;;  %v3122_v13 = vadd.f32 %v3121_v16, %v3120_v15  ;;  %v2997_v63 = vrot.slane %v2996_v60, 4 }
 0x7d9   : > { %v3126_v51 = vrot.slane %v3125_v1, 4  ;;  %v2928_v43 = vadd.f32 %v2927_v5, %v2926_v14  ;;  %v2892_v57 = vmul.f32 %v2831_v47, %v7387_v39  ;;  %v3021_v45 = vmul.f32 %v7314_v42, %v2831_v47 }
 0x7da   : > { %v3057_v46 = vadd.f32 %v3056_v32, %v3055_v22  ;;  %v2998_v61 = vadd.f32 %v2997_v63, %v2996_v60  ;;  %v2902_v58 = vmul.f32 %v2881_v7, %v7388_v12  ;;  %v3031_v10 = vmul.f32 %v7312_v31, %v2881_v7 }
 0x7db   : > { %v3127_v19 = vadd.f32 %v3126_v51, %v3125_v1  ;;  %v2929_v0 = vrot.slane %v2928_v43, 2  ;;  %v2933_v15 = vsel %vm2904_vm14, %v2892_v57, 0.0  ;;  %v3062_v16 = vsel %vm3033_vm15, %v3021_v45, 0.0 }
 0x7dc   : > { %v3058_v23 = vrot.slane %v3057_v46, 2  ;;  %v3123_v41 = vrot.slane %v3122_v13, 1  ;;  %v2999_v40 = vrot.slane %v2998_v61, 2  ;;  %v2934_v14 = vrot.slane %v2933_v15, 4 }
 0x7dd   : > { %v3063_v22 = vrot.slane %v3062_v16, 4  ;;  %v2925_v5 = vadd.f32 %v2924_v36, %v2923_v33  ;;  %v3054_v32 = vadd.f32 %v3053_v29, %v3052_v62  ;;  %v3003_v47 = vsel %vm2904_vm14, %v2902_v58, 0.0  ;;  %v2836_v58 = vpop.permute.xlu1 %2835 }
 0x7de   : > { %v3132_v60 = vsel %vm3033_vm15, %v3031_v10, 0.0  ;;  %v2930_v1 = vadd.f32 %v2929_v0, %v2928_v43  ;;  %v3128_v63 = vrot.slane %v3127_v19, 2  ;;  %v2935_v7 = vadd.f32 %v2934_v14, %v2933_v15  ;;  %v7390_v10 = vld [vmem:[#allocation16_spill] sm:$0xff] }
 0x7df   : > { %v3064_v51 = vadd.f32 %v3063_v22, %v3062_v16  ;;  %v2995_v31 = vadd.f32 %v2994_v54, %v2993_v21  ;;  %v3059_v4 = vadd.f32 %v3058_v23, %v3057_v46  ;;  %v3004_v57 = vrot.slane %v3003_v47, 4 }
 0x7e0   : > { %v3133_v42 = vrot.slane %v3132_v60, 4  ;;  %v4247_v45 = vsel %vm2403_vm9, %v2988_v52, %v4246_v38  ;;  %v3124_v20 = vadd.f32 %v3123_v41, %v3122_v13  ;;  %v3000_v18 = vadd.f32 %v2999_v40, %v2998_v61  ;;  %v3892_v38 = vpop.permute.xlu0 %3891 }
 0x7e1   : > { %v2936_v33 = vrot.slane %v2935_v7, 2  ;;  %v4238_v62 = vsel %vm2399_vm7, %v6942_v30, %v6930_v34  ;;  %v4398_v36 = vsel %vm2403_vm9, %v3117_v2, %v4397_v56  ;;  %v3065_v29 = vrot.slane %v3064_v51, 2 }
 0x7e2   : > { %v3134_v43 = vadd.f32 %v3133_v42, %v3132_v60  ;;  %v4389_v21 = vsel %vm2399_vm7, %v6945_v25, %v6935_v17  ;;  %v4239_v54 = vsel %vm2401_vm8, %v2925_v5, %v4238_v62  ;;  %v2931_v46 = vrot.slane %v2930_v1, 1 }
 0x7e3   : > { %v3129_v52 = vadd.f32 %v3128_v63, %v3127_v19  ;;  %v4390_v13 = vsel %vm2401_vm8, %v3054_v32, %v4389_v21  ;;  %v6984_v61 = vsel %vm2405_vm11, %v2995_v31, %v4247_v45  ;;  %v3060_v34 = vrot.slane %v3059_v4, 1 }
 0x7e4   : > { %7389 = vst [vmem:[#allocation21_spill] sm:$0xff] %v6984_v61  ;;  %v3005_v30 = vadd.f32 %v3004_v57, %v3003_v47  ;;  %v4399_v2 = vsel %vm2405_vm11, %v3124_v20, %v4398_v36  ;;  %v3001_v42 = vrot.slane %v3000_v18, 1  ;;  %v2937_v56 = vadd.f32 %v2936_v33, %v2935_v7  ;;  %v2841_v47 = vpop.permute.xlu1 %2840  ;;  %v2886_v33 = vpop.permute.xlu0 %2885 }
 0x7e5   : > { %v2893_v0 = vmul.f32 %v2836_v58, %v7390_v10  ;;  %v3066_v23 = vadd.f32 %v3065_v29, %v3064_v51  ;;  %v3135_v17 = vrot.slane %v3134_v43, 2  ;;  %v7391_v25 = vunpack.c.h.bf16 %v6860_v53 }
 0x7e6   : > { %v3965_v19 = vmul.f32 %v3892_v38, %v7377_v27  ;;  %v2932_v16 = vadd.f32 %v2931_v46, %v2930_v1  ;;  %v3130_v41 = vrot.slane %v3129_v52, 1  ;;  %v7392_v40 = vunpack.c.h.bf16 %v6817_v35 }
 0x7e7   : > { %v3022_v15 = vmul.f32 %v7391_v25, %v2836_v58  ;;  %v2940_v31 = vsel %vm2904_vm14, %v2893_v0, 0.0  ;;  %v3061_v22 = vadd.f32 %v3060_v34, %v3059_v4  ;;  %v3006_v20 = vrot.slane %v3005_v30, 2  ;;  %v7394_v4 = vld [vmem:[#allocation10_spill] sm:$0xff] }
 0x7e8   : > { %v4094_v14 = vmul.f32 %v7392_v40, %v3892_v38  ;;  %v2941_v5 = vrot.slane %v2940_v31, 4  ;;  %v6995_v60 = vadd.f32 %v3001_v42, %v3000_v18  ;;  %v2938_v63 = vrot.slane %v2937_v56, 1 }
 0x7e9   : > { %v3069_v32 = vsel %vm3033_vm15, %v3022_v15, 0.0  ;;  %v3988_v51 = vsel %vm3980_vm1, %v3965_v19, 0.0  ;;  %v3067_v27 = vrot.slane %v3066_v23, 1  ;;  %v3136_v1 = vadd.f32 %v3135_v17, %v3134_v43  ;;  %v7396_v17 = vld [vmem:[#allocation17_spill] sm:$0xff] }
 0x7ea   : > { %7393 = vst [vmem:[#allocation23_spill] sm:$0xff] %v6995_v60  ;;  %v3070_v7 = vrot.slane %v3069_v32, 4  ;;  %v2942_v57 = vadd.f32 %v2941_v5, %v2940_v31  ;;  %v3989_v45 = vrot.slane %v3988_v51, 4  ;;  %v4117_v36 = vsel %vm4109_vm2, %v4094_v14, 0.0 }
 0x7eb   : > { %v2894_v29 = vmul.f32 %v2841_v47, %v7394_v4  ;;  %v7395_v58 = vunpack.c.l.bf16 %v6866_v28  ;;  %v3007_v46 = vadd.f32 %v3006_v20, %v3005_v30  ;;  %v4118_v34 = vrot.slane %v4117_v36, 4 }
 0x7ec   : > { %v3071_v62 = vadd.f32 %v3070_v7, %v3069_v32  ;;  %v2943_v18 = vrot.slane %v2942_v57, 2  ;;  %v3990_v38 = vadd.f32 %v3989_v45, %v3988_v51  ;;  %v2903_v25 = vmul.f32 %v2886_v33, %v7396_v17 }
 0x7ed   : > { %v3023_v21 = vmul.f32 %v7395_v58, %v2841_v47  ;;  %v2947_v0 = vsel %vm2904_vm14, %v2894_v29, 0.0  ;;  %v4240_v15 = vsel %vm2403_vm9, %v2932_v16, %v4239_v54  ;;  %v3131_v19 = vadd.f32 %v3130_v41, %v3129_v52  ;;  %v3887_v54 = vpop.permute.xlu1 %3886 }
 0x7ee   : > { %v3072_v42 = vrot.slane %v3071_v62, 2  ;;  %v3137_v31 = vrot.slane %v3136_v1, 1  ;;  %v2944_v40 = vadd.f32 %v2943_v18, %v2942_v57  ;;  %v2948_v14 = vrot.slane %v2947_v0, 4 }
 0x7ef   : > { %v3076_v43 = vsel %vm3033_vm15, %v3023_v21, 0.0  ;;  %v3010_v32 = vsel %vm2904_vm14, %v2903_v25, 0.0  ;;  %v7397_v30 = vunpack.c.h.bf16 %v6863_v8  ;;  %v2939_v47 = vadd.f32 %v2938_v63, %v2937_v56 }
 0x7f0   : > { %v3077_v5 = vrot.slane %v3076_v43, 4  ;;  %v3068_v7 = vadd.f32 %v3067_v27, %v3066_v23  ;;  %v3008_v51 = vrot.slane %v3007_v46, 1  ;;  %v3991_v45 = vrot.slane %v3990_v38, 2 }
 0x7f1   : > { %v3032_v20 = vmul.f32 %v7397_v30, %v2886_v33  ;;  %v3073_v29 = vadd.f32 %v3072_v42, %v3071_v62  ;;  %v4119_v58 = vadd.f32 %v4118_v34, %v4117_v36  ;;  %v3011_v21 = vrot.slane %v3010_v32, 4 }
 0x7f2   : > { %v4391_v52 = vsel %vm2403_vm9, %v3061_v22, %v4390_v13  ;;  %v4400_v16 = vsel %vm2407_vm10, %v3131_v19, %v4399_v2  ;;  %v3138_v41 = vadd.f32 %v3137_v31, %v3136_v1  ;;  %v2945_v57 = vrot.slane %v2944_v40, 1  ;;  %v3932_v1 = vpop.permute.xlu0 %3931 }
 0x7f3   : > { %v3139_v60 = vsel %vm3033_vm15, %v3032_v20, 0.0  ;;  %v2949_v18 = vadd.f32 %v2948_v14, %v2947_v0  ;;  %v3078_v25 = vadd.f32 %v3077_v5, %v3076_v43  ;;  %v3012_v61 = vadd.f32 %v3011_v21, %v3010_v32 }
 0x7f4   : > { %v3140_v33 = vrot.slane %v3139_v60, 4  ;;  %v7013_v56 = vsel %vm2405_vm11, %v2939_v47, %v4240_v15  ;;  %v7016_v23 = vsel %vm2405_vm11, %v3068_v7, %v4391_v52  ;;  %v3992_v63 = vadd.f32 %v3991_v45, %v3990_v38 }
 0x7f5   : > { %v3964_v27 = vmul.f32 %v3887_v54, %v7376_v11  ;;  %v7019_v62 = vadd.f32 %v3008_v51, %v3007_v46  ;;  %v3074_v13 = vrot.slane %v3073_v29, 1  ;;  %v4120_v22 = vrot.slane %v4119_v58, 2  ;;  %v3897_v46 = vpop.permute.xlu1 %3896 }
 0x7f6   : > { %v3141_v2 = vadd.f32 %v3140_v33, %v3139_v60  ;;  %v7022_v36 = vsel %vm2409_vm12, %v3138_v41, %v4400_v16  ;;  %v7024_v34 = vadd.f32 %v2945_v57, %v2944_v40  ;;  %v7398_v0 = vunpack.c.l.bf16 %v6817_v35 }
 0x7f7   : > { %v3981_v42 = vsel %vm3980_vm1, %v3964_v27, 0.0  ;;  %v2950_v15 = vrot.slane %v2949_v18, 2  ;;  %v3079_v38 = vrot.slane %v3078_v25, 2  ;;  %v3013_v19 = vrot.slane %v3012_v61, 2 }
 0x7f8   : > { %v4093_v43 = vmul.f32 %v7398_v0, %v3887_v54  ;;  %v3982_v11 = vrot.slane %v3981_v42, 4  ;;  %v3993_v31 = vrot.slane %v3992_v63, 1  ;;  %v3973_v60 = vmul.f32 %v3932_v1, %v7380_v50  ;;  %v3937_v50 = vpop.permute.xlu0 %3936 }
 0x7f9   : > { %v7399_v5 = vunpack.c.h.bf16 %v6822_v6  ;;  %v7033_v40 = vadd.f32 %v3074_v13, %v3073_v29  ;;  %v4121_v30 = vadd.f32 %v4120_v22, %v4119_v58  ;;  %v3142_v20 = vrot.slane %v3141_v2, 2 }
 0x7fa   : > { %v4110_v14 = vsel %vm4109_vm2, %v4093_v43, 0.0  ;;  %v3983_v47 = vadd.f32 %v3982_v11, %v3981_v42  ;;  %v4044_v7 = vsel %vm3980_vm1, %v3973_v60, 0.0  ;;  %v3966_v45 = vmul.f32 %v3897_v46, %v7382_v37 }
 0x7fb   : > { %v4102_v32 = vmul.f32 %v7399_v5, %v3932_v1  ;;  %v4111_v35 = vrot.slane %v4110_v14, 4  ;;  %v2951_v21 = vadd.f32 %v2950_v15, %v2949_v18  ;;  %v3080_v54 = vadd.f32 %v3079_v38, %v3078_v25 }
 0x7fc   : > { %v3014_v52 = vadd.f32 %v3013_v19, %v3012_v61  ;;  %v3984_v16 = vrot.slane %v3983_v47, 2  ;;  %v4045_v57 = vrot.slane %v4044_v7, 4  ;;  %v3995_v29 = vsel %vm3980_vm1, %v3966_v45, 0.0 }
 0x7fd   : > { %v4173_v51 = vsel %vm4109_vm2, %v4102_v32, 0.0  ;;  %v4112_v41 = vadd.f32 %v4111_v35, %v4110_v14  ;;  %v3143_v58 = vadd.f32 %v3142_v20, %v3141_v2  ;;  %v3996_v13 = vrot.slane %v3995_v29, 4 }
 0x7fe   : > { %v4174_v33 = vrot.slane %v4173_v51, 4  ;;  %v3985_v27 = vadd.f32 %v3984_v16, %v3983_v47  ;;  %v7400_v22 = vunpack.c.l.bf16 %v6850_v26  ;;  %v4046_v0 = vadd.f32 %v4045_v57, %v4044_v7  ;;  %v3902_v7 = vpop.permute.xlu1 %3901 }
 0x7ff   : > { %v4113_v42 = vrot.slane %v4112_v41, 2  ;;  %v3974_v37 = vmul.f32 %v3937_v50, %v7379_v59  ;;  %v4122_v18 = vrot.slane %v4121_v30, 1  ;;  %v3997_v25 = vadd.f32 %v3996_v13, %v3995_v29 }
 0x800   : > { %v4095_v1 = vmul.f32 %v7400_v22, %v3897_v46  ;;  %v4175_v43 = vadd.f32 %v4174_v33, %v4173_v51  ;;  %v3986_v61 = vrot.slane %v3985_v27, 1  ;;  %v2952_v38 = vrot.slane %v2951_v21, 1 }
 0x801   : > { %v4114_v19 = vadd.f32 %v4113_v42, %v4112_v41  ;;  %v4047_v11 = vrot.slane %v4046_v0, 2  ;;  %v3994_v2 = vadd.f32 %v3993_v31, %v3992_v63  ;;  %v4051_v5 = vsel %vm3980_vm1, %v3974_v37, 0.0 }
 0x802   : > { %v4124_v15 = vsel %vm4109_vm2, %v4095_v1, 0.0  ;;  %v4176_v60 = vrot.slane %v4175_v43, 2  ;;  %v7401_v46 = vunpack.c.l.bf16 %v6825_v49  ;;  %v3081_v20 = vrot.slane %v3080_v54, 1  ;;  %v3942_v1 = vpop.permute.xlu0 %3941 }
 0x803   : > { %v4125_v14 = vrot.slane %v4124_v15, 4  ;;  %v3015_v47 = vrot.slane %v3014_v52, 1  ;;  %v3144_v35 = vrot.slane %v3143_v58, 1  ;;  %v3987_v51 = vadd.f32 %v3986_v61, %v3985_v27 }
 0x804   : > { %v4103_v32 = vmul.f32 %v7401_v46, %v3937_v50  ;;  %v3998_v45 = vrot.slane %v3997_v25, 2  ;;  %v4052_v16 = vrot.slane %v4051_v5, 4  ;;  %v4123_v41 = vadd.f32 %v4122_v18, %v4121_v30 }
 0x805   : > { %v4126_v59 = vadd.f32 %v4125_v14, %v4124_v15  ;;  %v7047_v33 = vadd.f32 %v2952_v38, %v2951_v21  ;;  %v4115_v63 = vrot.slane %v4114_v19, 1  ;;  %v4048_v31 = vadd.f32 %v4047_v11, %v4046_v0 }
 0x806   : > { %v4180_v57 = vsel %vm4109_vm2, %v4103_v32, 0.0  ;;  %v4177_v29 = vadd.f32 %v4176_v60, %v4175_v43  ;;  %v3967_v50 = vmul.f32 %v3902_v7, %v7385_v9  ;;  %v7050_v42 = vadd.f32 %v3081_v20, %v3080_v54 }
 0x807   : > { %v4127_v13 = vrot.slane %v4126_v59, 2  ;;  %v4181_v22 = vrot.slane %v4180_v57, 4  ;;  %v7052_v37 = vadd.f32 %v3015_v47, %v3014_v52  ;;  %v7054_v27 = vadd.f32 %v3144_v35, %v3143_v58 }
 0x808   : > { %v4053_v61 = vadd.f32 %v4052_v16, %v4051_v5  ;;  %v4274_v15 = vsel %vm2399_vm7, %v3994_v2, %v3987_v51  ;;  %v3999_v30 = vadd.f32 %v3998_v45, %v3997_v25  ;;  %v4002_v18 = vsel %vm3980_vm1, %v3967_v50, 0.0  ;;  %v3907_v5 = vpop.permute.xlu1 %3906 }
 0x809   : > { %v4182_v21 = vadd.f32 %v4181_v22, %v4180_v57  ;;  %v4116_v0 = vadd.f32 %v4115_v63, %v4114_v19  ;;  %v4003_v43 = vrot.slane %v4002_v18, 4  ;;  %v7402_v38 = vunpack.c.h.bf16 %v6850_v26  ;;  %v3947_v57 = vpop.permute.xlu0 %3946 }
 0x80a   : > { %v3975_v9 = vmul.f32 %v3942_v1, %v7381_v48  ;;  %v4049_v54 = vrot.slane %v4048_v31, 1  ;;  %v4178_v14 = vrot.slane %v4177_v29, 1  ;;  %v4128_v52 = vadd.f32 %v4127_v13, %v4126_v59 }
 0x80b   : > { %v4096_v11 = vmul.f32 %v7402_v38, %v3902_v7  ;;  %v7403_v58 = vunpack.c.h.bf16 %v6825_v49  ;;  %v4054_v46 = vrot.slane %v4053_v61, 2  ;;  %v4004_v2 = vadd.f32 %v4003_v43, %v4002_v18 }
 0x80c   : > { %v4058_v32 = vsel %vm3980_vm1, %v3975_v9, 0.0  ;;  %v4000_v19 = vrot.slane %v3999_v30, 1  ;;  %v4183_v20 = vrot.slane %v4182_v21, 2  ;;  %v4421_v35 = vsel %vm2399_vm7, %v4123_v41, %v4116_v0 }
 0x80d   : > { %v4104_v60 = vmul.f32 %v7403_v58, %v3942_v1  ;;  %v4131_v25 = vsel %vm4109_vm2, %v4096_v11, 0.0  ;;  %v4059_v26 = vrot.slane %v4058_v32, 4  ;;  %v4005_v48 = vrot.slane %v4004_v2, 2 }
 0x80e   : > { %v4132_v47 = vrot.slane %v4131_v25, 4  ;;  %v3968_v59 = vmul.f32 %v3907_v5, %v7387_v39  ;;  %v7068_v49 = vadd.f32 %v4049_v54, %v4048_v31  ;;  %v4129_v51 = vrot.slane %v4128_v52, 1 }
 0x80f   : > { %v4187_v7 = vsel %vm4109_vm2, %v4104_v60, 0.0  ;;  %v4060_v16 = vadd.f32 %v4059_v26, %v4058_v32  ;;  %v4055_v63 = vadd.f32 %v4054_v46, %v4053_v61  ;;  %v7404_v50 = vunpack.c.l.bf16 %v6860_v53 }
 0x810   : > { %v4133_v45 = vadd.f32 %v4132_v47, %v4131_v25  ;;  %v4188_v13 = vrot.slane %v4187_v7, 4  ;;  %v4009_v22 = vsel %vm3980_vm1, %v3968_v59, 0.0  ;;  %v4184_v18 = vadd.f32 %v4183_v20, %v4182_v21  ;;  %v3912_v20 = vpop.permute.xlu1 %3911 }
 0x811   : > { %v4097_v1 = vmul.f32 %v7404_v50, %v3907_v5  ;;  %v4006_v41 = vadd.f32 %v4005_v48, %v4004_v2  ;;  %v4010_v43 = vrot.slane %v4009_v22, 4  ;;  %v4001_v38 = vadd.f32 %v4000_v19, %v3999_v30 }
 0x812   : > { %v4134_v0 = vrot.slane %v4133_v45, 2  ;;  %v4061_v11 = vrot.slane %v4060_v16, 2  ;;  %v3976_v31 = vmul.f32 %v3947_v57, %v7383_v44  ;;  %v4130_v9 = vadd.f32 %v4129_v51, %v4128_v52 }
 0x813   : > { %v4138_v39 = vsel %vm4109_vm2, %v4097_v1, 0.0  ;;  %v4189_v54 = vadd.f32 %v4188_v13, %v4187_v7  ;;  %v4011_v58 = vadd.f32 %v4010_v43, %v4009_v22  ;;  %v7075_v60 = vadd.f32 %v4178_v14, %v4177_v29 }
 0x814   : > { %v4139_v61 = vrot.slane %v4138_v39, 4  ;;  %v4135_v46 = vadd.f32 %v4134_v0, %v4133_v45  ;;  %v4065_v25 = vsel %vm3980_vm1, %v3976_v31, 0.0  ;;  %v7405_v21 = vunpack.c.l.bf16 %v6853_v3  ;;  %v3952_v0 = vpop.permute.xlu0 %3951 }
 0x815   : > { %v4056_v2 = vrot.slane %v4055_v63, 1  ;;  %v4185_v32 = vrot.slane %v4184_v18, 1  ;;  %v4007_v30 = vrot.slane %v4006_v41, 1  ;;  %v4062_v47 = vadd.f32 %v4061_v11, %v4060_v16 }
 0x816   : > { %v4105_v5 = vmul.f32 %v7405_v21, %v3947_v57  ;;  %v4140_v19 = vadd.f32 %v4139_v61, %v4138_v39  ;;  %v4012_v26 = vrot.slane %v4011_v58, 2  ;;  %v4066_v44 = vrot.slane %v4065_v25, 4 }
 0x817   : > { %v4275_v48 = vsel %vm2401_vm8, %v4001_v38, %v4274_v15  ;;  %v4422_v29 = vsel %vm2401_vm8, %v4130_v9, %v4421_v35  ;;  %v4190_v14 = vrot.slane %v4189_v54, 2  ;;  %v4136_v59 = vrot.slane %v4135_v46, 1 }
 0x818   : > { %v4194_v52 = vsel %vm4109_vm2, %v4105_v5, 0.0  ;;  %v4141_v7 = vrot.slane %v4140_v19, 2  ;;  %v4067_v51 = vadd.f32 %v4066_v44, %v4065_v25  ;;  %v3969_v57 = vmul.f32 %v3912_v20, %v7390_v10 }
 0x819   : > { %v4195_v45 = vrot.slane %v4194_v52, 4  ;;  %v7084_v13 = vadd.f32 %v4056_v2, %v4055_v63  ;;  %v7086_v22 = vadd.f32 %v4185_v32, %v4184_v18  ;;  %v4008_v16 = vadd.f32 %v4007_v30, %v4006_v41 }
 0x81a   : > { %v7406_v50 = vunpack.c.h.bf16 %v6860_v53  ;;  %v4063_v43 = vrot.slane %v4062_v47, 1  ;;  %v4013_v15 = vadd.f32 %v4012_v26, %v4011_v58  ;;  %v4016_v35 = vsel %vm3980_vm1, %v3969_v57, 0.0 }
 0x81b   : > { %v4196_v38 = vadd.f32 %v4195_v45, %v4194_v52  ;;  %v4142_v11 = vadd.f32 %v4141_v7, %v4140_v19  ;;  %v4068_v39 = vrot.slane %v4067_v51, 2  ;;  %v4017_v31 = vrot.slane %v4016_v35, 4  ;;  %v3917_v19 = vpop.permute.xlu1 %3916 }
 0x81c   : > { %v4098_v1 = vmul.f32 %v7406_v50, %v3912_v20  ;;  %v4137_v10 = vadd.f32 %v4136_v59, %v4135_v46  ;;  %v4191_v63 = vadd.f32 %v4190_v14, %v4189_v54  ;;  %v3977_v18 = vmul.f32 %v3952_v0, %v7386_v24  ;;  %v3957_v24 = vpop.permute.xlu0 %3956 }
 0x81d   : > { %v4276_v41 = vsel %vm2403_vm9, %v4008_v16, %v4275_v48  ;;  %v4197_v53 = vrot.slane %v4196_v38, 2  ;;  %v4018_v25 = vadd.f32 %v4017_v31, %v4016_v35  ;;  %v7407_v21 = vunpack.c.h.bf16 %v6853_v3 }
 0x81e   : > { %v4145_v9 = vsel %vm4109_vm2, %v4098_v1, 0.0  ;;  %v7096_v5 = vadd.f32 %v4063_v43, %v4062_v47  ;;  %v4014_v2 = vrot.slane %v4013_v15, 1  ;;  %v4072_v30 = vsel %vm3980_vm1, %v3977_v18, 0.0 }
 0x81f   : > { %v4146_v61 = vrot.slane %v4145_v9, 4  ;;  %v4106_v58 = vmul.f32 %v7407_v21, %v3952_v0  ;;  %v4143_v20 = vrot.slane %v4142_v11, 1  ;;  %v4069_v46 = vadd.f32 %v4068_v39, %v4067_v51 }
 0x820   : > { %v4073_v54 = vrot.slane %v4072_v30, 4  ;;  %v4423_v44 = vsel %vm2403_vm9, %v4137_v10, %v4422_v29  ;;  %v4192_v52 = vrot.slane %v4191_v63, 1  ;;  %v4019_v48 = vrot.slane %v4018_v25, 2 }
 0x821   : > { %v4147_v32 = vadd.f32 %v4146_v61, %v4145_v9  ;;  %v4201_v26 = vsel %vm4109_vm2, %v4106_v58, 0.0  ;;  %v4198_v3 = vadd.f32 %v4197_v53, %v4196_v38  ;;  %v3970_v47 = vmul.f32 %v3917_v19, %v7394_v4  ;;  %v3927_v9 = vpop.permute.xlu1 %3926 }
 0x822   : > { %v4202_v14 = vrot.slane %v4201_v26, 4  ;;  %v4074_v7 = vadd.f32 %v4073_v54, %v4072_v30  ;;  %v7408_v59 = vunpack.c.l.bf16 %v6866_v28  ;;  %v4015_v57 = vadd.f32 %v4014_v2, %v4013_v15 }
 0x823   : > { %v4148_v16 = vrot.slane %v4147_v32, 2  ;;  %v3978_v51 = vmul.f32 %v3957_v24, %v7388_v12  ;;  %v4144_v1 = vadd.f32 %v4143_v20, %v4142_v11  ;;  %v4070_v0 = vrot.slane %v4069_v46, 1 }
 0x824   : > { %v4099_v45 = vmul.f32 %v7408_v59, %v3917_v19  ;;  %v4203_v50 = vadd.f32 %v4202_v14, %v4201_v26  ;;  %v4023_v43 = vsel %vm3980_vm1, %v3970_v47, 0.0  ;;  %v4020_v35 = vadd.f32 %v4019_v48, %v4018_v25  ;;  %v3962_v26 = vpop.permute.xlu0 %3961 }
 0x825   : > { %v4075_v39 = vrot.slane %v4074_v7, 2  ;;  %v4024_v38 = vrot.slane %v4023_v43, 4  ;;  %v7107_v4 = vadd.f32 %v4192_v52, %v4191_v63  ;;  %v4199_v10 = vrot.slane %v4198_v3, 1 }
 0x826   : > { %v4152_v29 = vsel %vm4109_vm2, %v4099_v45, 0.0  ;;  %v4079_v15 = vsel %vm3980_vm1, %v3978_v51, 0.0  ;;  %v7409_v61 = vunpack.c.l.bf16 %v6863_v8  ;;  %v4149_v12 = vadd.f32 %v4148_v16, %v4147_v32 }
 0x827   : > { %v4153_v31 = vrot.slane %v4152_v29, 4  ;;  %v4204_v11 = vrot.slane %v4203_v50, 2  ;;  %v4025_v53 = vadd.f32 %v4024_v38, %v4023_v43  ;;  %v7113_v58 = vsel %vm2405_vm11, %v4015_v57, %v4276_v41 }
 0x828   : > { %v4107_v18 = vmul.f32 %v7409_v61, %v3957_v24  ;;  %v4080_v25 = vrot.slane %v4079_v15, 4  ;;  %v3972_v30 = vmul.f32 %v3927_v9, %v7378_v55  ;;  %v7118_v63 = vsel %vm2405_vm11, %v4144_v1, %v4423_v44 }
 0x829   : > { %v4154_v21 = vadd.f32 %v4153_v31, %v4152_v29  ;;  %v7120_v19 = vadd.f32 %v4070_v0, %v4069_v46  ;;  %v4021_v20 = vrot.slane %v4020_v35, 1  ;;  %v4076_v54 = vadd.f32 %v4075_v39, %v4074_v7  ;;  %v2846_v0 = vpop.permute.xlu1 %2845 }
 0x82a   : > { %v4208_v2 = vsel %vm4109_vm2, %v4107_v18, 0.0  ;;  %v7122_v32 = vadd.f32 %v4199_v10, %v4198_v3  ;;  %v4026_v24 = vrot.slane %v4025_v53, 2  ;;  %v4037_v41 = vsel %vm3980_vm1, %v3972_v30, 0.0  ;;  %v7412_v30 = vld [vmem:[#allocation14_spill] sm:$0xff] }
 0x82b   : > { %v4209_v52 = vrot.slane %v4208_v2, 4  ;;  %v4150_v48 = vrot.slane %v4149_v12, 1  ;;  %v4205_v14 = vadd.f32 %v4204_v11, %v4203_v50  ;;  %v4155_v47 = vrot.slane %v4154_v21, 2 }
 0x82c   : > { %v4038_v59 = vrot.slane %v4037_v41, 4  ;;  %v4081_v45 = vadd.f32 %v4080_v25, %v4079_v15  ;;  %v7410_v44 = vunpack.c.l.bf16 %v6822_v6  ;;  %v3979_v46 = vmul.f32 %v3962_v26, %v7396_v17 }
 0x82d   : > { %v4210_v55 = vadd.f32 %v4209_v52, %v4208_v2  ;;  %v7128_v16 = vadd.f32 %v4021_v20, %v4020_v35  ;;  %v4077_v7 = vrot.slane %v4076_v54, 1  ;;  %v7411_v51 = vunpack.c.h.bf16 %v6863_v8 }
 0x82e   : > { %v4101_v57 = vmul.f32 %v7410_v44, %v3927_v9  ;;  %v4039_v3 = vadd.f32 %v4038_v59, %v4037_v41  ;;  %v4027_v43 = vadd.f32 %v4026_v24, %v4025_v53  ;;  %v4086_v39 = vsel %vm3980_vm1, %v3979_v46, 0.0  ;;  %v3922_v41 = vpop.permute.xlu1 %3921 }
 0x82f   : > { %v4108_v1 = vmul.f32 %v7411_v51, %v3962_v26  ;;  %v4211_v29 = vrot.slane %v4210_v55, 2  ;;  %v7134_v38 = vadd.f32 %v4150_v48, %v4149_v12  ;;  %v4206_v6 = vrot.slane %v4205_v14, 1 }
 0x830   : > { %v4166_v50 = vsel %vm4109_vm2, %v4101_v57, 0.0  ;;  %v4040_v31 = vrot.slane %v4039_v3, 2  ;;  %v4156_v17 = vadd.f32 %v4155_v47, %v4154_v21  ;;  %v4082_v35 = vrot.slane %v4081_v45, 2 }
 0x831   : > { %v4167_v9 = vrot.slane %v4166_v50, 4  ;;  %v4087_v10 = vrot.slane %v4086_v39, 4  ;;  %v4215_v15 = vsel %vm4109_vm2, %v4108_v1, 0.0  ;;  %v7137_v61 = vadd.f32 %v4077_v7, %v4076_v54 }
 0x832   : > { %v4041_v8 = vadd.f32 %v4040_v31, %v4039_v3  ;;  %v4216_v11 = vrot.slane %v4215_v15, 4  ;;  %v4028_v53 = vrot.slane %v4027_v43, 1  ;;  %v4212_v25 = vadd.f32 %v4211_v29, %v4210_v55 }
 0x833   : > { %v4168_v18 = vadd.f32 %v4167_v9, %v4166_v50  ;;  %v4088_v2 = vadd.f32 %v4087_v10, %v4086_v39  ;;  %v2895_v20 = vmul.f32 %v2846_v0, %v7412_v30  ;;  %v7413_v52 = vunpack.c.h.bf16 %v6866_v28 }
 0x834   : > { %v4042_v12 = vrot.slane %v4041_v8, 1  ;;  %v4217_v24 = vadd.f32 %v4216_v11, %v4215_v15  ;;  %v4207_v48 = vadd.f32 %v4206_v6, %v4205_v14  ;;  %v4157_v47 = vrot.slane %v4156_v17, 1 }
 0x835   : > { %v4169_v26 = vrot.slane %v4168_v18, 2  ;;  %v3024_v21 = vmul.f32 %v7413_v52, %v2846_v0  ;;  %v4083_v59 = vadd.f32 %v4082_v35, %v4081_v45  ;;  %v2954_v54 = vsel %vm2904_vm14, %v2895_v20, 0.0 }
 0x836   : > { %v4043_v44 = vadd.f32 %v4042_v12, %v4041_v8  ;;  %v4218_v46 = vrot.slane %v4217_v24, 2  ;;  %v2955_v7 = vrot.slane %v2954_v54, 4  ;;  %v4213_v55 = vrot.slane %v4212_v25, 1 }
 0x837   : > { %v4170_v57 = vadd.f32 %v4169_v26, %v4168_v18  ;;  %v3083_v3 = vsel %vm3033_vm15, %v3024_v21, 0.0  ;;  %v3971_v51 = vmul.f32 %v3922_v41, %v7412_v30  ;;  %v7414_v1 = vmov %v7413_v52 }
 0x838   : > { %v4100_v29 = vmul.f32 %v7414_v1, %v3922_v41  ;;  %v4029_v50 = vadd.f32 %v4028_v53, %v4027_v43  ;;  %v4089_v39 = vrot.slane %v4088_v2, 2  ;;  %v2956_v14 = vadd.f32 %v2955_v7, %v2954_v54 }
 0x839   : > { %v4171_v0 = vrot.slane %v4170_v57, 1  ;;  %v7147_v6 = vadd.f32 %v4157_v47, %v4156_v17  ;;  %v4281_v45 = vsel %vm2399_vm7, %v7068_v49, %v4043_v44  ;;  %v3084_v31 = vrot.slane %v3083_v3, 4 }
 0x83a   : > { %v4030_v9 = vsel %vm3980_vm1, %v3971_v51, 0.0  ;;  %v4219_v10 = vadd.f32 %v4218_v46, %v4217_v24  ;;  %v2957_v15 = vrot.slane %v2956_v14, 2  ;;  %v4084_v18 = vrot.slane %v4083_v59, 1  ;;  %v7416_v46 = vld [vmem:[#allocation23_spill] sm:$0xff] }
 0x83b   : > { %v4172_v35 = vadd.f32 %v4171_v0, %v4170_v57  ;;  %v4031_v8 = vrot.slane %v4030_v9, 4  ;;  %v4214_v11 = vadd.f32 %v4213_v55, %v4212_v25  ;;  %v3085_v28 = vadd.f32 %v3084_v31, %v3083_v3  ;;  %v7415_v57 = vld [vmem:[#allocation21_spill] sm:$0xff] }
 0x83c   : > { %v4159_v43 = vsel %vm4109_vm2, %v4100_v29, 0.0  ;;  %v4090_v17 = vadd.f32 %v4089_v39, %v4088_v2  ;;  %v2958_v30 = vadd.f32 %v2957_v15, %v2956_v14  ;;  %v4282_v49 = vsel %vm2401_vm8, %v7084_v13, %v4281_v45  ;;  %v4364_v14 = vld [vmem:[#allocation2] sm:$0x1] }
 0x83d   : > { %v4428_v53 = vsel %vm2399_vm7, %v7075_v60, %v4172_v35  ;;  %v4032_v20 = vadd.f32 %v4031_v8, %v4030_v9  ;;  %v3086_v26 = vrot.slane %v3085_v28, 2  ;;  %v4160_v24 = vrot.slane %v4159_v43, 4  ;;  %4842 = vpush %v4364_v14 }
 0x83e   : > { %v4429_v12 = vsel %vm2401_vm8, %v7086_v22, %v4428_v53  ;;  %v4220_v52 = vrot.slane %v4219_v10, 1  ;;  %v2959_v21 = vrot.slane %v2958_v30, 1  ;;  %v4242_v13 = vsel %vm2407_vm10, %v7024_v34, %v7013_v56 }
 0x83f   : > { %v4430_v25 = vsel %vm2403_vm9, %v7107_v4, %v4429_v12  ;;  %v4033_v41 = vrot.slane %v4032_v20, 2  ;;  %v3087_v2 = vadd.f32 %v3086_v26, %v3085_v28  ;;  %v4161_v47 = vadd.f32 %v4160_v24, %v4159_v43  ;;  %v4635_v24 = vld [vmem:[%s7247_s16] ss:$0 sm:$0xff] }
 0x840   : > { %v4431_v60 = vsel %vm2405_vm11, %v7122_v32, %v4430_v25  ;;  %v2960_v22 = vadd.f32 %v2959_v21, %v2958_v30  ;;  %v4249_v4 = vsel %vm2407_vm10, %v7416_v46, %v7415_v57  ;;  %v4243_v3 = vsel %vm2409_vm12, %v7047_v33, %v4242_v13  ;;  %v5018_v57 = vld [vmem:[%s5154_s25 + $0x8] sm:$0xff] }
 0x841   : > { %v4432_v54 = vsel %vm2407_vm10, %v4207_v48, %v4431_v60  ;;  %v4034_v44 = vadd.f32 %v4033_v41, %v4032_v20  ;;  %v3088_v7 = vrot.slane %v3087_v2, 1  ;;  %v4162_v55 = vrot.slane %v4161_v47, 2 }
 0x842   : > { %v4250_v32 = vsel %vm2409_vm12, %v7019_v62, %v4249_v4  ;;  %v4091_v51 = vrot.slane %v4090_v17, 1  ;;  %v4244_v56 = vsel %vm2411_vm13, %v2960_v22, %v4243_v3  ;;  %v4085_v48 = vadd.f32 %v4084_v18, %v4083_v59 }
 0x843   : > { %v4035_v1 = vrot.slane %v4034_v44, 1  ;;  %v4251_v34 = vsel %vm2411_vm13, %v7052_v37, %v4250_v32  ;;  %v4433_v29 = vsel %vm2409_vm12, %v4214_v11, %v4432_v54  ;;  %v4163_v0 = vadd.f32 %v4162_v55, %v4161_v47  ;;  %v5017_v47 = vld [vmem:[%s5154_s25] sm:$0xff] }
 0x844   : > { %v4861_v39 = vpack.i.bf16 %v4251_v34, %v4244_v56  ;;  %v4221_v45 = vadd.f32 %v4220_v52, %v4219_v10  ;;  %v4278_v62 = vsel %vm2407_vm10, %v7128_v16, %v7113_v58  ;;  %v4283_v33 = vsel %vm2403_vm9, %v7096_v5, %v4282_v49 }
 0x845   : > { %v4036_v31 = vadd.f32 %v4035_v1, %v4034_v44  ;;  %v3089_v9 = vadd.f32 %v3088_v7, %v3087_v2  ;;  %v4164_v35 = vrot.slane %v4163_v0, 1  ;;  %v4279_v37 = vsel %vm2409_vm12, %v4029_v50, %v4278_v62 }
 0x846   : > { %4862 = vrot.lane.b32.xlu1 %v4861_v39, %s5031_s29  ;;  %v4284_v59 = vsel %vm2405_vm11, %v7120_v19, %v4283_v33  ;;  %v4092_v15 = vadd.f32 %v4091_v51, %v4090_v17  ;;  %v4434_v10 = vsel %vm2411_vm13, %v4221_v45, %v4433_v29  ;;  %v4393_v5 = vsel %vm2407_vm10, %v7033_v40, %v7016_v23 }
 0x847   : > { %v4280_v8 = vsel %vm2411_vm13, %v4036_v31, %v4279_v37  ;;  %v4285_v58 = vsel %vm2407_vm10, %v7137_v61, %v4284_v59  ;;  %v4425_v16 = vsel %vm2407_vm10, %v7134_v38, %v7118_v63  ;;  %v4165_v50 = vadd.f32 %v4164_v35, %v4163_v0 }
 0x848   : > { %v4286_v19 = vsel %vm2409_vm12, %v4085_v48, %v4285_v58  ;;  %v4394_v18 = vsel %vm2409_vm12, %v7050_v42, %v4393_v5  ;;  %v4402_v11 = vsel %vm2411_vm13, %v7054_v27, %v7022_v36  ;;  %v4426_v61 = vsel %vm2409_vm12, %v7147_v6, %v4425_v16 }
 0x849   : > { %v4287_v28 = vsel %vm2411_vm13, %v4092_v15, %v4286_v19  ;;  %v4438_v23 = vsel %vm3033_vm15, %v4402_v11, %v4434_v10  ;;  %v4395_v40 = vsel %vm2411_vm13, %v3089_v9, %v4394_v18  ;;  %v4427_v63 = vsel %vm2411_vm13, %v4165_v50, %v4426_v61 }
 0x84a   : > { %v4866_v38 = vpack.i.bf16 %v4287_v28, %v4280_v8  ;;  %v4437_v42 = vsel %vm3033_vm15, %v4395_v40, %v4427_v63  ;;  %v4644_v27 = vpack.c.bf16 %v4438_v23, %v4438_v23 }
 0x84b   : > { %v4643_v36 = vpack.c.bf16 %v4437_v42, %v4437_v42 }
 0x84c   : > { %4867 = vrot.lane.b32.xlu0 %v4866_v38, %s5033_s28  ;;  %4449 = vst.msk [vmem:[%s708_s27 + $0x4] sm:$0xf] %vm4447_vm3, %v4644_v27 }
 0x84d   : > { %4448 = vst.msk [vmem:[%s708_s27] sm:$0xf] %vm4447_vm3, %v4643_v36 }
 0x86e   : > { %s4843_s29 = spop %4842 }
 0x86f   : > { %v4366_v52 = vstv %s4843_s29 }
 0x8b8   : > { %v4863_v6 = vpop.permute.xlu1 %4862 }
 0x8b9   : > { %v4865_v53 = vunpack.i.h.bf16 %v4863_v6  ;;  %v4864_v17 = vunpack.i.l.bf16 %v4863_v6 }
 0x8be   : > { %v4868_v43 = vpop.permute.xlu0 %4867 }
 0x8bf   : > { %v4870_v30 = vunpack.i.h.bf16 %v4868_v43  ;;  %v4869_v20 = vunpack.i.l.bf16 %v4868_v43 }
 0x8c1   : > { %v4295_v49 = vsel %vm2074_vm6, %v4865_v53, %v4870_v30  ;;  %v4294_v12 = vsel %vm2074_vm6, %v4864_v17, %v4869_v20 }
 0x8c2   : > { %v4296_v26 = vpack.c.bf16 %v4295_v49, %v4294_v12 }
 0x8c4   : > { %4838 = vmatmul.mubr.msk.bf16.vlgmr.msra.gmra.mxu1 %vm715_vm0, %v4296_v26 }
 0x984   : > { %v4357_v25 = vpop.f32.mrf.mxu1 }
 0x985   : > { %v4358_v21 = vadd.f32 %v4635_v24, %v4357_v25 }
 0x986   : > { %v4839_v41 = vpop.f32.mrf.mxu1 }
 0x987   : > { %v4367_v60 = vmul.f32 %v4366_v52, %v4358_v21 }
 0x988   : > { %v4360_v2 = vpop.f32.mrf.mxu1 }
 0x989   : > { %v4369_v13 = vadd.f32 %v5017_v47, %v4367_v60  ;;  %v4361_v54 = vadd.f32 %v4635_v24, %v4360_v2 }
 0x98a   : > { %v4840_v22 = vpop.f32.mrf.mxu1 }
 0x98b   : > { %4371 = vst.msk [vmem:[%s702_s2] sm:$0xff] %vm715_vm0, %v4369_v13  ;;  %v4368_v44 = vmul.f32 %v4366_v52, %v4361_v54 }
 0x98d   : > { %v4370_v46 = vadd.f32 %v5018_v57, %v4368_v44 }
 0x98f   : > { %4372 = vst.msk [vmem:[%s702_s2 + $0x8] sm:$0xff] %vm715_vm0, %v4370_v46 }
 0x990 PF: > { %s32_s20 = sadd.s32 1, %s5025_s20  }
 0x991   : > { %p29_p5 = scmp.ge.s32.totalorder %s32_s20, 4  }
 0x993   :  { %31 = sbr.rel (!%p29_p5) target bundleno = 5 (0x5), region = 146 }

// kernel: se3_transformer_forward.8
= control target key start
LH: loop header
LB: loop body
LE: loop exit
PB: predicated region body
PF: predicated region fallthrough
CT: control target
= control target key end

     0   :  { %s731_s29 = smov 0   ;;  %s802_s0 = inlined_call_operand.vmem [shape: f32[32,32], index: 0, kind: input, shape index: {}]   ;;  %s803_s1 = inlined_call_operand.vmem [shape: f32[1,32], index: 1, kind: input, shape index: {}]   ;;  %s804_s2 = inlined_call_operand.vmem [shape: f32[1,32], index: 2, kind: input, shape index: {}]   ;;  %s805_s3 = inlined_call_operand.vmem [shape: bf16[32,64], index: 3, kind: input, shape index: {}]   ;;  %s806_s4 = inlined_call_operand.vmem [shape: f32[1,64], index: 4, kind: input, shape index: {}]   ;;  %s807_s5 = inlined_call_operand.vmem [shape: bf16[64,32], index: 5, kind: input, shape index: {}]   ;;  %s808_s6 = inlined_call_operand.vmem [shape: f32[1,32], index: 6, kind: input, shape index: {}]   ;;  %s809_s7 = inlined_call_operand.<no memory space> [shape: f32[1,1], index: 7, kind: input, shape index: {}]   ;;  %s810_s8 = inlined_call_operand.vmem [shape: f32[32,32], index: 8, kind: output, shape index: {}]  }
   0x1   :  { %v13_v0 = vstv %s809_s7 }
   0x2   :  { %14 = vst [vmem:[#allocation2] sm:$0x1] %v13_v0 }
   0x3 LB: > { %s596_s30 = sadd.s32 4294967295, %s679_s29   ;;  %p600_p0 = scmp.ge.s32.totalorder %s679_s29, 1  ;;  %s679_s29 = sphi %s731_s29, %s20_s29  }
   0x4   : > { %p265_p1 = scmp.lt.s32.totalorder %s679_s29, 3 }
   0x6   : > { %p266_p2 = pnand %p600_p0, %p265_p1 }
   0x7   : > { %s601_s9 = sshll.u32 (!%p266_p2), %s596_s30, 1 }
   0x8   : > { %269 = sbr.rel (%p266_p2) target bundleno = 766 (0x2fe), region = 52  ;;  %p300_p3 = scmp.lt.s32.totalorder (!%p266_p2), %s601_s9, 3 }
   0xd   : > { %s812_s9 = smov (!%p300_p3, %s601_s9), 3  ;;  %vm316_vm0 = vcmask 261120   ;;  %v659_v15 = vld [vmem:[%s805_s3 + $0x8] sm:$0xff]   ;;  %v681_v16 = vmov 0.0   ;;  %vm682_vm1 = vmmov 0   ;;  %v660_v17 = vld [vmem:[%s805_s3] sm:$0xff]  }
   0xe   : > { %s602_s7 = sshll.u32 %s812_s9, 3  ;;  %627 = vmatprep.subr.bf16.mxu0 %v681_v16  ;;  %631 = vmatprep.mubr.msk.bf16.mxu0 %vm682_vm1, %v681_v16  ;;  %v605_v26 = vld [vmem:[%s803_s1] ss:$0 sm:$0xff]  ;;  %v661_v35 = vld [vmem:[%s807_s5 + $0x18] sm:$0xff]   ;;  %v662_v36 = vld [vmem:[%s807_s5 + $0x10] sm:$0xff]   ;;  %vm486_vm2 = vcmask 523264  }
   0xf   : > { %s303_s12 = scalar_lea.vmem %s802_s0, %s602_s7  ;;  %628 = vmatpush3.bf16.msra.mxu0 %v659_v15  ;;  %635 = vmatprep.subr.bf16.mxu1 %v681_v16  ;;  %v606_v30 = vld [vmem:[%s804_s2] ss:$0 sm:$0xff]  ;;  %v663_v37 = vld [vmem:[%s807_s5 + $0x8] sm:$0xff]   ;;  %s309_s16 = scalar_lea.vmem %s810_s8, %s602_s7 }
  0x10   : > { %v747_v1 = vld [vmem:[%s303_s12] sm:$0xff]  ;;  %v749_v2 = vld [vmem:[%s303_s12 + $0x8] sm:$0xff]  ;;  %629 = vmatprep.subr.bf16.mxu0 %v681_v16  ;;  %643 = vmatprep.mubr.msk.bf16.mxu1 %vm682_vm1, %v681_v16 }
  0x11   : > { %v317_v3 = vsel %vm316_vm0, %v747_v1, 0.0  ;;  %v320_v4 = vsel %vm316_vm0, %v749_v2, 0.0  ;;  %636 = vmatpush3.bf16.msra.mxu1 %v661_v35  ;;  %v664_v38 = vld [vmem:[%s807_s5] sm:$0xff]  }
  0x12   : > { %318 = vadd.xlane.f32.xlu0 %v317_v3  ;;  %637 = vmatprep.subr.bf16.mxu1 %v681_v16  ;;  %v531_v39 = vld [vmem:[#allocation2] sm:$0x1] }
  0x13   : > { %630 = vmatpush3.bf16.msra.mxu0 %v660_v17  ;;  %647 = vpush %v531_v39  ;;  %v607_v40 = vld [vmem:[%s806_s4] ss:$0 sm:$0xff] }
  0x15   : > { %638 = vmatpush3.bf16.msra.mxu1 %v662_v36 }
  0x16   : > { %321 = vadd.xlane.f32.xlu0 %v320_v4  ;;  %639 = vmatprep.subr.bf16.mxu1 %v681_v16  ;;  %v611_v4 = vld [vmem:[%s808_s6] ss:$0 sm:$0xff] }
  0x19   : > { %640 = vmatpush3.bf16.msra.mxu1 %v663_v37 }
  0x1a   : > { %641 = vmatprep.subr.bf16.mxu1 %v681_v16 }
  0x1d   : > { %642 = vmatpush3.bf16.msra.mxu1 %v664_v38 }
  0x44   : > { %s648_s11 = spop %647 }
  0x9b   : > { %v319_v5 = vpop.xlane.xlu0 %318 }
  0x9c   : > { %v324_v6 = vmul.f32 0.03125, %v319_v5 }
  0x9e   : > { %v326_v7 = vsub.f32 %v747_v1, %v324_v6  ;;  %v533_v6 = vstv %s648_s11 }
  0x9f   : > { %v322_v8 = vpop.xlane.xlu0 %321 }
  0xa0   : > { %v325_v9 = vmul.f32 0.03125, %v322_v8  ;;  %v328_v10 = vmul.f32 %v326_v7, %v326_v7 }
  0xa2   : > { %v327_v11 = vsub.f32 %v749_v2, %v325_v9  ;;  %v330_v12 = vsel %vm316_vm0, %v328_v10, 0.0 }
  0xa3   : > { %331 = vadd.xlane.f32.xlu1 %v330_v12 }
  0xa4   : > { %v329_v13 = vmul.f32 %v327_v11, %v327_v11 }
  0xa6   : > { %v333_v14 = vsel %vm316_vm0, %v329_v13, 0.0 }
  0xa7   : > { %334 = vadd.xlane.f32.xlu1 %v333_v14 }
 0x12c   : > { %v332_v18 = vpop.xlane.xlu1 %331 }
 0x12d   : > { %v336_v19 = vmul.f32 0.03125, %v332_v18 }
 0x12f   : > { %v338_v20 = vadd.f32 1e-05, %v336_v19 }
 0x130   : > { %v335_v21 = vpop.xlane.xlu1 %334 }
 0x131   : > { %665 = vrsqrt.f32 %v338_v20  ;;  %v337_v22 = vmul.f32 0.03125, %v335_v21 }
 0x133   : > { %v339_v23 = vadd.f32 1e-05, %v337_v22 }
 0x135   : > { %667 = vrsqrt.f32 %v339_v23 }
 0x13e   : > { %v666_v24 = vpop.eup %665 }
 0x13f   : > { %v342_v25 = vmul.f32 %v666_v24, %v326_v7 }
 0x141   : > { %v350_v29 = vmul.f32 %v605_v26, %v342_v25 }
 0x142   : > { %v668_v27 = vpop.eup %667 }
 0x143   : > { %v343_v28 = vmul.f32 %v668_v27, %v327_v11  ;;  %v358_v32 = vadd.f32 %v606_v30, %v350_v29 }
 0x145   : > { %v351_v31 = vmul.f32 %v605_v26, %v343_v28 }
 0x147   : > { %v359_v33 = vadd.f32 %v606_v30, %v351_v31 }
 0x149   : > { %v360_v34 = vpack.c.bf16 %v359_v33, %v358_v32 }
 0x14b   : > { %632 = vmatmul.mubr.msk.bf16.vlgmr.msra.gmra.mxu0 %vm316_vm0, %v360_v34 }
 0x20b   : > { %v421_v41 = vpop.f32.mrf.mxu0 }
 0x20c   : > { %v422_v42 = vadd.f32 %v607_v40, %v421_v41 }
 0x20d   : > { %v633_v43 = vpop.f32.mrf.mxu0 }
 0x20e   : > { %v428_v44 = vmul.f32 %v422_v42, %v422_v42 }
 0x20f   : > { %v424_v45 = vpop.f32.mrf.mxu0 }
 0x210   : > { %v430_v46 = vmul.f32 %v428_v44, %v422_v42  ;;  %v425_v47 = vadd.f32 %v607_v40, %v424_v45 }
 0x211   : > { %v634_v48 = vpop.f32.mrf.mxu0 }
 0x212   : > { %v432_v49 = vmul.f32 0.044715, %v430_v46  ;;  %v429_v50 = vmul.f32 %v425_v47, %v425_v47 }
 0x214   : > { %v434_v51 = vadd.f32 %v432_v49, %v422_v42  ;;  %v431_v52 = vmul.f32 %v429_v50, %v425_v47 }
 0x216   : > { %v436_v53 = vmul.f32 0.7978846, %v434_v51  ;;  %v433_v54 = vmul.f32 0.044715, %v431_v52 }
 0x218   : > { %669 = vtanh.f32 %v436_v53  ;;  %v435_v55 = vadd.f32 %v433_v54, %v425_v47 }
 0x21a   : > { %v437_v56 = vmul.f32 0.7978846, %v435_v55 }
 0x21c   : > { %671 = vtanh.f32 %v437_v56 }
 0x225   : > { %v670_v57 = vpop.eup %669 }
 0x226   : > { %v440_v58 = vadd.f32 1.0, %v670_v57 }
 0x228   : > { %v442_v60 = vmul.f32 0.5, %v440_v58 }
 0x229   : > { %v672_v59 = vpop.eup %671 }
 0x22a   : > { %v441_v61 = vadd.f32 1.0, %v672_v59  ;;  %v444_v63 = vmul.f32 %v442_v60, %v422_v42 }
 0x22c   : > { %v443_v62 = vmul.f32 0.5, %v441_v61 }
 0x22e   : > { %v445_v0 = vmul.f32 %v443_v62, %v425_v47 }
 0x230   : > { %v446_v3 = vpack.c.bf16 %v445_v0, %v444_v63 }
 0x232   : > { %644 = vmatmul.mubr.msk.bf16.vlgmr.msra.gmra.mxu1 %vm486_vm2, %v446_v3 }
 0x2f2   : > { %v524_v5 = vpop.f32.mrf.mxu1 }
 0x2f3   : > { %v525_v7 = vadd.f32 %v611_v4, %v524_v5 }
 0x2f4   : > { %v645_v8 = vpop.f32.mrf.mxu1 }
 0x2f5   : > { %v534_v9 = vmul.f32 %v533_v6, %v525_v7 }
 0x2f6   : > { %v527_v10 = vpop.f32.mrf.mxu1 }
 0x2f7   : > { %v536_v11 = vadd.f32 %v534_v9, %v747_v1  ;;  %v528_v12 = vadd.f32 %v611_v4, %v527_v10 }
 0x2f8   : > { %v646_v13 = vpop.f32.mrf.mxu1 }
 0x2f9   : > { %538 = vst.msk [vmem:[%s309_s16] sm:$0xff] %vm316_vm0, %v536_v11  ;;  %v535_v14 = vmul.f32 %v533_v6, %v528_v12 }
 0x2fb   : > { %v537_v15 = vadd.f32 %v535_v14, %v749_v2 }
 0x2fd   : > { %539 = vst.msk [vmem:[%s309_s16 + $0x8] sm:$0xff] %vm316_vm0, %v537_v15 }
 0x2fe PF: > { %s20_s29 = sadd.s32 1, %s679_s29  }
 0x2ff   : > { %p17_p4 = scmp.ge.s32.totalorder %s20_s29, 4  }
 0x301   :  { %19 = sbr.rel (!%p17_p4) target bundleno = 3 (0x3), region = 82 }

// kernel: se3_transformer_forward.11
= control target key start
LH: loop header
LB: loop body
LE: loop exit
PB: predicated region body
PF: predicated region fallthrough
CT: control target
= control target key end

     0   :  { %8 = vsyncpa [#allocation3], 0  ;;  %s593_s0 = inlined_call_operand.vmem [shape: f32[32,32], index: 0, kind: input, shape index: {}]   ;;  %s594_s1 = inlined_call_operand.vmem [shape: bf16[32,16], index: 1, kind: input, shape index: {}]   ;;  %s595_s2 = inlined_call_operand.vmem [shape: f32[1,16], index: 2, kind: input, shape index: {}]   ;;  %s596_s3 = inlined_call_operand.hbm [shape: f32[32,16], index: 3, kind: output, shape index: {}]  }
   0x1   :  { %10 = vsyncpa [#allocation3 + $0x1], 0  ;;  %s483_s12 = smov 0   ;;  %s485_s13 = smov 0  }
   0x2   :  { %s487_s14 = smov 0   ;;  %s489_s15 = smov 0  }
   0x3 LB: > { %s504_s16 = sadd.s32 4294967295, %s456_s15   ;;  %s323_s17 = sadd.s32 4294967294, %s456_s15   ;;  %s456_s15 = sphi %s489_s15, %s602_s15   ;;  %s452_s14 = sphi %s487_s14, %s601_s14   ;;  %s448_s13 = sphi %s485_s13, %s600_s13   ;;  %s444_s12 = sphi %s483_s12, %s599_s12  }
   0x4   : > { %s508_s18 = sadd.s32 1, %s456_s15   ;;  %s91_s19 = sadd.s32 1, %s452_s14 }
   0x5   : > { %s88_s20 = ssub.s32 %s456_s15, %s508_s18  ;;  %p101_p0 = scmp.ne.s32.totalorder %s452_s14, %s448_s13 }
   0x6   : > { %p89_p1 = scmp.eq.s32.totalorder %s88_s20, 0  ;;  %p102_p2 = scmp.eq.s32.totalorder %s504_s16, 1 }
   0x7   : > { %p107_p3 = scmp.ne.s32.totalorder %s448_s13, %s444_s12  ;;  %p108_p4 = scmp.eq.s32.totalorder %s323_s17, 1 }
   0x8   : > { %s519_s21 = scalar_select %p89_p1, %s452_s14, %s91_s19  }
   0x9   : > { %p521_p5 = por %p102_p2, %p101_p0  ;;  %p525_p6 = por %p108_p4, %p107_p3 }
   0xa   : > { %p326_p7 = scmp.ge.s32.totalorder %s456_s15, 1  ;;  %p141_p8 = scmp.lt.s32.totalorder %s456_s15, 3 }
   0xc   : > { %p142_p9 = pnand %p326_p7, %p141_p8 }
   0xd   : > { %s328_s28 = sshll.u32 (!%p142_p9), %s504_s16, 1  ;;  %s162_s6 = sand.u32 (!%p142_p9), 1, %s448_s13  }
   0xe   : > { %145 = sbr.rel (%p142_p9) target bundleno = 241 (0xf1), region = 32  ;;  %p166_p10 = scmp.lt.s32.totalorder (!%p142_p9), %s328_s28, 3 }
   0xf   : > { %s327_s7 = sshll.u32 (!%p142_p9), %s162_s6, 4  ;;  %s339_s17 = sshll.u32 (!%p142_p9), %s504_s16, 8 }
  0x10   : > { %s164_s10 = scalar_lea.vmem (!%p142_p9), [#allocation2], %s327_s7  ;;  %s551_s24 = scalar_lea.hbm (!%p142_p9), %s596_s3, %s339_s17 }
  0x11   : > { %s261_s11 = sshll.u32 (!%p142_p9), %s164_s10, 4  ;;  %s553_s25 = scalar_lea.sflag (!%p142_p9), [#allocation3], %s162_s6  ;;  %s546_s11 = int_to_ptr.vmem [resolvable:$true] %s261_s11 }
  0x12   : > { %s396_s26 = scalar_lea.vmem (!%p142_p9), %s546_s11, 256  ;;  %s460_s16 = smov (!%p142_p9), [#allocation2]  }
  0x13   : > { %v394_v0 = vld [vmem:[%s594_s1 + $0x8] sm:$0xff]   ;;  %v458_v1 = vmov 0.0   ;;  %v395_v2 = vld [vmem:[%s594_s1] sm:$0xff]   ;;  %vm459_vm0 = vmmov 0   ;;  %s604_s28 = smov (!%p166_p10, %s328_s28), 3  ;;  %vm199_vm1 = vcmask 261120   ;;  %p397_p11 = scmp.ne.s32.totalorder %s546_s11, %s396_s26 }
  0x14   : > { %343 = vmatprep.subr.bf16.mxu0 %v458_v1  ;;  %347 = vmatprep.mubr.msk.bf16.mxu0 %vm459_vm0, %v458_v1  ;;  %s329_s29 = sshll.u32 %s604_s28, 3  ;;  %v330_v6 = vld [vmem:[%s595_s2] ss:$0 sm:$0xff]  ;;  %vm244_vm2 = vcmask 130048   ;;  %s400_s27 = sshll.u32 %s460_s16, 4  ;;  %s401_s27 = int_to_ptr.vmem [resolvable:$false] %s400_s27 }
  0x15   : > { %344 = vmatpush3.bf16.msra.mxu0 %v394_v0  ;;  %s169_s5 = scalar_lea.vmem %s593_s0, %s329_s29  ;;  %p398_p12 = pnand %p397_p11, %p521_p5 }
  0x16   : > { %345 = vmatprep.subr.bf16.mxu0 %v458_v1  ;;  %v173_v3 = vld [vmem:[%s169_s5] sm:$0xff]  ;;  %v174_v4 = vld [vmem:[%s169_s5 + $0x8] sm:$0xff]  ;;  %s402_s28 = scalar_lea.vmem %s401_s27, 512  ;;  %p403_p0 = scmp.lt.s32.totalorder %s546_s11, %s401_s27 }
  0x17   : > { %v175_v5 = vpack.c.bf16 %v174_v4, %v173_v3  ;;  %p399_p13 = pneg %p398_p12  ;;  %p404_p1 = scmp.lt.s32.totalorder %s402_s28, %s396_s26 }
  0x19   : > { %346 = vmatpush3.bf16.msra.mxu0 %v395_v2  ;;  %p405_p2 = por %p404_p1, %p403_p0 }
  0x1b   : > { %p406_p3 = pnand %p405_p2, %p399_p13 }
  0x1c   : > { %348 = vmatmul.mubr.msk.bf16.vlgmr.msra.gmra.mxu0 %vm199_vm1, %v175_v5 }
  0xdc   : > { %v237_v7 = vpop.f32.mrf.mxu0 }
  0xdd   : > { %v238_v8 = vadd.f32 %v330_v6, %v237_v7 }
  0xde   : > { %v349_v9 = vpop.f32.mrf.mxu0 }
  0xdf   : > { %245 = vst.msk [vmem:[%s164_s10] sm:$0xff] %vm244_vm2, %v238_v8 }
  0xe0   : > { %v240_v10 = vpop.f32.mrf.mxu0 }
  0xe1   : > { %v241_v11 = vadd.f32 %v330_v6, %v240_v10 }
  0xe2   : > { %v350_v12 = vpop.f32.mrf.mxu0 }
  0xe3   : > { %246 = vst.msk [vmem:[%s164_s10 + $0x8] sm:$0xff] %vm244_vm2, %v241_v11 }
  0xe4   : > { %409 = shalt.err (!%p406_p3)
}
  0xe5   : > { %s410_s29 = scalar_lea.hbm %s551_s24, 256  ;;  %s414_s5 = scalar_lea.hbm %s596_s3, 512 }
  0xe6   : > { %p411_p4 = scmp.ne.s32.totalorder %s551_s24, %s410_s29  ;;  %p415_p9 = scmp.lt.s32.totalorder %s551_s24, %s596_s3 }
  0xe7   : > { %p416_p10 = scmp.lt.s32.totalorder %s414_s5, %s410_s29 }
  0xe8   : > { %p412_p7 = pnand %p411_p4, %p521_p5 }
  0xe9   : > { %p417_p11 = por %p416_p10, %p415_p9 }
  0xea   : > { %p413_p8 = pneg %p412_p7 }
  0xec   : > { %p418_p12 = pnand %p417_p11, %p413_p8 }
  0xee   : > { %421 = shalt.err (!%p418_p12)
}
  0xef   : > { %s461_s8 = smov 128   ;;  %s462_s9 = smov 8  }
  0xf0   : > { %351 = dma.vmem_to_hbm [thread:$0]  (%p521_p5), %s546_s11, 256, %s551_s24, %s553_s25, %s461_s8, %s461_s8, %s462_s9  }
  0xf1 PF: > { %p357_p13 = scmp.ge.s32.totalorder %s456_s15, 2  ;;  %s276_s10 = sand.u32 1, %s444_s12  }
  0xf2   : > { %s277_s17 = scalar_lea.sflag [#allocation3], %s276_s10 }
  0xf3   : > { %p354_p0 = pnand %p357_p13, %p525_p6 }
  0xf5   : > { %p355_p1 = pneg %p354_p0 }
  0xf7   : > { %439 = dma.done.wait (%p355_p1), %s277_s17, 256  }
  0xf8   : > { %441 = vsyncadd (%p355_p1), %s277_s17, 4294967040  ;;  %p13_p2 = scmp.ge.s32.totalorder %s508_s18, 4   ;;  %s599_s12 = smov %s448_s13 }
  0xf9   : > { %s600_s13 = smov %s452_s14  ;;  %s601_s14 = smov %s519_s21 }
  0xfa   : > { %s602_s15 = smov %s508_s18  ;;  %15 = sbr.rel (!%p13_p2) target bundleno = 3 (0x3), region = 67 }
  0xff   :  { %282 = vsyncpa [#allocation3], 1 }
 0x100   :  { %284 = vsyncpa [#allocation3 + $0x1], 1 }

</bundles_post_ra>
